<compile_context>
chip_gen: v7x
topology: tpu7x:2x2x1
jax: 0.10.0
libtpu: 0.0.40
codegen_flags: <defaults>
</compile_context>

<pallas_src>
import jax
import jax.numpy as jnp
from jax.experimental import pallas as pl
from jax.experimental.pallas import tpu as pltpu

LATENT_DIM = 1536
STYLE_DIM = 256
# channel ranges of each body-part mask (mask_dict in the PyTorch source)
PART_SLICES = {
    "upper_mask": (0, 512),
    "hands_mask": (512, 1024),
    "lower_mask": (1024, 1536),
}


# ---------------------------------------------------------------------------
# Single fused kernel:
#   out = x @ W  +  t * w_t  +  u_eff  +  scale * delta
# grid = (cdiv(rows, tm),).  W and the (3, C) bias-vector stack have constant
# index_maps, so they are DMA'd once and stay resident in VMEM.
#   vecs_ref : (3, C)   rows = [w_t, u_eff, delta]
#   scal_ref : (tm, 2)  cols = [t, scale]  (per output row)
# ---------------------------------------------------------------------------
def _fused_cfg_kernel(x_ref, w_ref, vecs_ref, scal_ref, o_ref):
    acc = jnp.dot(x_ref[...], w_ref[...],
                  preferred_element_type=jnp.float32)        # MXU: bf16 in, f32 acc
    vecs = vecs_ref[...]                                     # (3, C)  f32
    sc = scal_ref[...]                                       # (tm, 2) f32
    bias = (sc[:, 0:1] * vecs[0:1, :]                        # t * w_t
            + vecs[1:2, :]                                   # + u_eff
            + sc[:, 1:2] * vecs[2:3, :])                     # + scale * delta
    o_ref[...] = (acc + bias).astype(o_ref.dtype)


def fused_cfg_matmul(x_bf16, w_bf16, vecs, scal, *, tm_max=256):
    rows, cin = x_bf16.shape
    cout = w_bf16.shape[1]

    # M tile: at most tm_max rows; small row counts rounded up to a sublane
    # multiple so the (8, 128) block constraint always holds.
    tm = tm_max if rows >= tm_max else max(8, -(-rows // 8) * 8)
    num_m = pl.cdiv(rows, tm)
    rows_pad = num_m * tm
    if rows_pad != rows:
        pad = rows_pad - rows
        x_bf16 = jnp.pad(x_bf16, ((0, pad), (0, 0)))
        scal = jnp.pad(scal, ((0, pad), (0, 0)))

    cost = pl.CostEstimate(
        flops=2 * rows_pad * cin * cout,
        transcendentals=0,
        bytes_accessed=(x_bf16.size * 2 + w_bf16.size * 2
                        + vecs.size * 4 + scal.size * 4
                        + rows_pad * cout * 4),
    )

    out = pl.pallas_call(
        _fused_cfg_kernel,
        out_shape=jax.ShapeDtypeStruct((rows_pad, cout), jnp.float32),
        grid_spec=pltpu.PrefetchScalarGridSpec(
            num_scalar_prefetch=0,
            grid=(num_m,),
            in_specs=[
                pl.BlockSpec((tm, cin), lambda i: (i, 0)),     # x rows (bf16), streamed
                pl.BlockSpec((cin, cout), lambda i: (0, 0)),   # W (bf16), VMEM-resident
                pl.BlockSpec((3, cout), lambda i: (0, 0)),     # [w_t,u,delta], resident
                pl.BlockSpec((tm, 2), lambda i: (i, 0)),       # [t,scale] per row
            ],
            out_specs=pl.BlockSpec((tm, cout), lambda i: (i, 0)),
        ),
        compiler_params=pltpu.CompilerParams(
            dimension_semantics=("parallel",),        # megacore shards M on v7x
            vmem_limit_bytes=32 * 1024 * 1024),       # fits resident W on v5e too
        cost_estimate=cost,
    )(x_bf16, w_bf16, vecs, scal)
    return out[:rows] if rows_pad != rows else out


# ---------------------------------------------------------------------------
# The wrapper module (mirrors ClassifierFreeSampleModel_Bodypart.forward)
# ---------------------------------------------------------------------------
class ClassifierFreeSampleModelBodypart:
    def __init__(self, params, eval=False):
        self.params = params
        self.latent_dim = LATENT_DIM
        self.eval_metric = eval
        # Weight stored once in bf16 for the MXU hot path (halves W HBM traffic).
        # TODO(synk): fp8 (v7x) / int8 (v5e,v6e) W with per-channel scales would
        # halve it again; kept bf16 so one code path holds the 2e-2 tolerance.
        self.w_bf16 = params["w"].astype(jnp.bfloat16)
        self.w_t = params["w_t"].astype(jnp.float32)

    def _style_proj(self, feat):
        # tiny [1,256] x [256,1536] conditioning projection (trace-time glue)
        return jnp.dot(feat.astype(jnp.float32), self.params["w_style"],
                       precision=jax.lax.Precision.HIGHEST).reshape(LATENT_DIM)

    def forward(self, x, timesteps, y):
        B, C, H, W = x.shape
        assert C == self.latent_dim
        rows = B * W * H
        p = self.params

        # cast to bf16 BEFORE the NCHW -> channel-last transpose (half the bytes),
        # C = 1536 lands on the lane dimension.
        x_bf16 = jnp.transpose(x.astype(jnp.bfloat16), (0, 3, 2, 1)).reshape(rows, C)
        batch_per_row = jnp.repeat(jnp.arange(B), W * H)
        t_rows = timesteps[batch_per_row].astype(jnp.float32)

        if self.eval_metric:
            # eval path: single unconditional pass using the lower-body style
            u_eff = p["u_vec"].astype(jnp.float32) + self._style_proj(
                y["style_feature"]["lower_mask"])
            vecs = jnp.stack([self.w_t, u_eff, jnp.zeros((C,), jnp.float32)])
            scal = jnp.stack([t_rows, jnp.zeros((rows,), jnp.float32)], axis=1)
            out_rows = fused_cfg_matmul(x_bf16, self.w_bf16, vecs, scal)
            return jnp.transpose(out_rows.reshape(B, W, H, C), (0, 3, 2, 1))

        # Algebraic collapse of the 4 model calls into one matmul + rank-1 bias:
        #   out_uncond        = x@W + t*w_t + u_vec
        #   out_part_j        = x@W + t*w_t + style_j@W_style + a_vec
        #   combined(block j) = out_part_j if part j present else out_uncond
        #   final = out_uncond + scale*(combined - out_uncond)
        #         = x@W + t*w_t + u_vec + scale * delta
        # with delta(block j) = style_j@W_style + a_vec - u_vec if present else 0.
        delta = jnp.zeros((C,), jnp.float32)
        for key, (lo, hi) in PART_SLICES.items():
            feat = y["style_feature"].get(key, None)
            if feat is None:
                continue  # trace-time specialization: absent parts cost nothing
            d_full = self._style_proj(feat) + (p["a_vec"] - p["u_vec"])
            delta = delta.at[lo:hi].set(d_full[lo:hi])

        vecs = jnp.stack([self.w_t, p["u_vec"].astype(jnp.float32), delta])
        scale_rows = y["scale"][batch_per_row].astype(jnp.float32)
        scal = jnp.stack([t_rows, scale_rows], axis=1)

        out_rows = fused_cfg_matmul(x_bf16, self.w_bf16, vecs, scal)
        return jnp.transpose(out_rows.reshape(B, W, H, C), (0, 3, 2, 1))


# ---------------------------------------------------------------------------
# Pure-JAX references mirroring the PyTorch forward 1:1 (for verification)
# ---------------------------------------------------------------------------
def _ref_model(params, x, timesteps, style, uncond, uncond_audio):
    B, C, H, W = x.shape
    batch_per_row = jnp.repeat(jnp.arange(B), W * H)
    t_rows = timesteps[batch_per_row].astype(jnp.float32)
    x_rows = jnp.transpose(x, (0, 3, 2, 1)).reshape(B * W * H, C)
    bias = t_rows[:, None] * params["w_t"][None, :] \
        + jnp.dot(style, params["w_style"],
                  precision=jax.lax.Precision.HIGHEST).reshape(1, C)
    if uncond:
        bias = bias + params["u_vec"][None, :]
    if uncond_audio:
        bias = bias + params["a_vec"][None, :]
    out_rows = jnp.dot(x_rows, params["w"],
                       precision=jax.lax.Precision.HIGHEST) + bias
    return jnp.transpose(out_rows.reshape(B, W, H, C), (0, 3, 2, 1))


def reference_forward(params, x, timesteps, y):
    C = x.shape[1]
    out = jnp.zeros_like(x)
    mask_all = jnp.zeros(C, bool)
    for key, feat in y["style_feature"].items():
        if feat is None:
            continue
        out_part = _ref_model(params, x, timesteps, feat,
                              uncond=False, uncond_audio=True)
        lo, hi = PART_SLICES[key]
        tem_mask = jnp.zeros(C, bool).at[lo:hi].set(True)
        mask_all = mask_all.at[lo:hi].set(True)
        out = out + out_part * tem_mask[None, :, None, None]
    out_uncond = _ref_model(params, x, timesteps,
                            jnp.zeros((1, STYLE_DIM), jnp.float32),
                            uncond=True, uncond_audio=False)
    out = out + out_uncond * (~mask_all)[None, :, None, None]
    return out_uncond + y["scale"][:, None, None, None] * (out - out_uncond)


def reference_eval(params, x, timesteps, y):
    return _ref_model(params, x, timesteps, y["style_feature"]["lower_mask"],
                      uncond=True, uncond_audio=False)


if __name__ == "__main__":
    key = jax.random.PRNGKey(0)
    keys = jax.random.split(key, 10)
    B, H, W = 2, 1, 8   # x: [B, 1536, 1, 8]  (small sequence of 8 frames)

    params = {
        "w": jax.random.normal(keys[0], (LATENT_DIM, LATENT_DIM), jnp.float32)
             / jnp.sqrt(LATENT_DIM),
        "w_style": jax.random.normal(keys[1], (STYLE_DIM, LATENT_DIM), jnp.float32)
                   / jnp.sqrt(STYLE_DIM),
        "w_t": 0.1 * jax.random.normal(keys[2], (LATENT_DIM,), jnp.float32),
        "u_vec": 0.1 * jax.random.normal(keys[3], (LATENT_DIM,), jnp.float32),
        "a_vec": 0.1 * jax.random.normal(keys[4], (LATENT_DIM,), jnp.float32),
    }

    x = jax.random.normal(keys[5], (B, LATENT_DIM, H, W), jnp.float32)
    timesteps = jnp.array([3.0, 7.0], jnp.float32)
    y = {
        "scale": jnp.array([2.5, 1.5], jnp.float32),
        "style_feature": {
            "upper_mask": jax.random.normal(keys[6], (1, STYLE_DIM), jnp.float32),
            "hands_mask": jax.random.normal(keys[7], (1, STYLE_DIM), jnp.float32),
            "lower_mask": jax.random.normal(keys[8], (1, STYLE_DIM), jnp.float32),
        },
    }

    model = ClassifierFreeSampleModelBodypart(params, eval=False)

    # case 1: all three body-part styles present
    out = jax.block_until_ready(model.forward(x, timesteps, y))
    ref = reference_forward(params, x, timesteps, y)
    assert out.shape == x.shape and out.dtype == jnp.float32
    assert jnp.allclose(out, ref, rtol=2e-2, atol=2e-2), \
        f"max abs err = {jnp.max(jnp.abs(out - ref))}"

    # case 2: one body part absent (hands) -> that block falls back to uncond
    y_partial = {
        "scale": y["scale"],
        "style_feature": {
            "upper_mask": y["style_feature"]["upper_mask"],
            "hands_mask": None,
            "lower_mask": y["style_feature"]["lower_mask"],
        },
    }
    out2 = jax.block_until_ready(model.forward(x, timesteps, y_partial))
    ref2 = reference_forward(params, x, timesteps, y_partial)
    assert jnp.allclose(out2, ref2, rtol=2e-2, atol=2e-2), \
        f"max abs err (partial) = {jnp.max(jnp.abs(out2 - ref2))}"

    # case 3: eval_metric path (single unconditional pass with lower-body style)
    model_eval = ClassifierFreeSampleModelBodypart(params, eval=True)
    out3 = jax.block_until_ready(model_eval.forward(x, timesteps, y))
    ref3 = reference_eval(params, x, timesteps, y)
    assert jnp.allclose(out3, ref3, rtol=2e-2, atol=2e-2), \
        f"max abs err (eval) = {jnp.max(jnp.abs(out3 - ref3))}"

    print("KERNEL_OK")
</pallas_src>

<mosaic_0001>
module attributes {stable_mosaic.version = 11 : i64} {
  func.func @_fused_cfg_kernel(%arg0: i32, %arg1: memref<16x1536xbf16, #tpu.memory_space<vmem>>, %arg2: memref<1536x1536xbf16, #tpu.memory_space<vmem>>, %arg3: memref<3x1536xf32, #tpu.memory_space<vmem>>, %arg4: memref<16x2xf32, #tpu.memory_space<vmem>>, %arg5: memref<16x1536xf32, #tpu.memory_space<vmem>>) attributes {dimension_semantics = [#tpu.dimension_semantics<parallel>], iteration_bounds = array<i64: 1>, scalar_prefetch = 0 : i64, scratch_operands = 0 : i64, tpu.core_type = #tpu.core_type<tc>, window_params = [{transform_indices = @transform_0, window_bounds = array<i64: 16, 1536>}, {pipeline_mode = #tpu.pipeline_mode<synchronous>, transform_indices = @transform_1, window_bounds = array<i64: 1536, 1536>}, {pipeline_mode = #tpu.pipeline_mode<synchronous>, transform_indices = @transform_2, window_bounds = array<i64: 3, 1536>}, {transform_indices = @transform_3, window_bounds = array<i64: 16, 2>}, {transform_indices = @transform_4, window_bounds = array<i64: 16, 1536>}]} {
    %c0 = arith.constant 0 : index
    %c0_0 = arith.constant 0 : index
    %0 = vector.load %arg1[%c0, %c0_0] : memref<16x1536xbf16, #tpu.memory_space<vmem>>, vector<16x1536xbf16>
    %c0_1 = arith.constant 0 : index
    %c0_2 = arith.constant 0 : index
    %1 = vector.load %arg2[%c0_1, %c0_2] : memref<1536x1536xbf16, #tpu.memory_space<vmem>>, vector<1536x1536xbf16>
    %cst = arith.constant dense<0.000000e+00> : vector<16x1536xf32>
    %2 = tpu.matmul %0, %1, %cst {dimension_numbers = #tpu.dot_dimension_numbers<[1], [0], [0], [1], [0, 0, 1, 1], [], []>} : vector<16x1536xbf16>, vector<1536x1536xbf16>, vector<16x1536xf32> -> vector<16x1536xf32>
    %c0_3 = arith.constant 0 : index
    %c0_4 = arith.constant 0 : index
    %3 = vector.load %arg3[%c0_3, %c0_4] : memref<3x1536xf32, #tpu.memory_space<vmem>>, vector<3x1536xf32>
    %c0_5 = arith.constant 0 : index
    %c0_6 = arith.constant 0 : index
    %4 = vector.load %arg4[%c0_5, %c0_6] : memref<16x2xf32, #tpu.memory_space<vmem>>, vector<16x2xf32>
    %5 = vector.extract_strided_slice %4 {offsets = [0, 0], sizes = [16, 1], strides = [1, 1]} : vector<16x2xf32> to vector<16x1xf32>
    %6 = vector.extract_strided_slice %3 {offsets = [0, 0], sizes = [1, 1536], strides = [1, 1]} : vector<3x1536xf32> to vector<1x1536xf32>
    %7 = vector.broadcast %5 : vector<16x1xf32> to vector<16x1536xf32>
    %8 = vector.broadcast %6 : vector<1x1536xf32> to vector<16x1536xf32>
    %9 = arith.mulf %7, %8 : vector<16x1536xf32>
    %10 = vector.extract_strided_slice %3 {offsets = [1, 0], sizes = [1, 1536], strides = [1, 1]} : vector<3x1536xf32> to vector<1x1536xf32>
    %11 = vector.broadcast %10 : vector<1x1536xf32> to vector<16x1536xf32>
    %12 = arith.addf %9, %11 : vector<16x1536xf32>
    %13 = vector.extract_strided_slice %4 {offsets = [0, 1], sizes = [16, 1], strides = [1, 1]} : vector<16x2xf32> to vector<16x1xf32>
    %14 = vector.extract_strided_slice %3 {offsets = [2, 0], sizes = [1, 1536], strides = [1, 1]} : vector<3x1536xf32> to vector<1x1536xf32>
    %15 = vector.broadcast %13 : vector<16x1xf32> to vector<16x1536xf32>
    %16 = vector.broadcast %14 : vector<1x1536xf32> to vector<16x1536xf32>
    %17 = arith.mulf %15, %16 : vector<16x1536xf32>
    %18 = arith.addf %12, %17 : vector<16x1536xf32>
    %19 = arith.addf %2, %18 : vector<16x1536xf32>
    %c0_7 = arith.constant 0 : index
    %c0_8 = arith.constant 0 : index
    %20 = vector.load %arg5[%c0_7, %c0_8] : memref<16x1536xf32, #tpu.memory_space<vmem>>, vector<16x1536xf32>
    tpu.vector_store %arg5[%c0_7, %c0_8], %19 {strides = array<i32>} : memref<16x1536xf32, #tpu.memory_space<vmem>>, vector<16x1536xf32>,
    return
  }
  func.func @transform_0(%arg0: i32) -> (i32, i32) {
    %c0_i32 = arith.constant 0 : i32
    %c0_i32_0 = arith.constant 0 : i32
    return %arg0, %c0_i32 : i32, i32
  }
  func.func @transform_1(%arg0: i32) -> (i32, i32) {
    %c0_i32 = arith.constant 0 : i32
    %c0_i32_0 = arith.constant 0 : i32
    %c0_i32_1 = arith.constant 0 : i32
    return %c0_i32, %c0_i32_0 : i32, i32
  }
  func.func @transform_2(%arg0: i32) -> (i32, i32) {
    %c0_i32 = arith.constant 0 : i32
    %c0_i32_0 = arith.constant 0 : i32
    %c0_i32_1 = arith.constant 0 : i32
    return %c0_i32, %c0_i32_0 : i32, i32
  }
  func.func @transform_3(%arg0: i32) -> (i32, i32) {
    %c0_i32 = arith.constant 0 : i32
    %c0_i32_0 = arith.constant 0 : i32
    return %arg0, %c0_i32 : i32, i32
  }
  func.func @transform_4(%arg0: i32) -> (i32, i32) {
    %c0_i32 = arith.constant 0 : i32
    %c0_i32_0 = arith.constant 0 : i32
    return %arg0, %c0_i32 : i32, i32
  }
}

</mosaic_0001>

<bundles_post_ra>
// kernel: tpu_custom_call.1
= control target key start
LH: loop header
LB: loop body
LE: loop exit
PB: predicated region body
PF: predicated region fallthrough
CT: control target
= control target key end

     0   :  { %9 = vsyncpa [#allocation3], 0  ;;  %s12528_s0 = inlined_call_operand.hbm [shape: bf16[16,1536], index: 0, kind: input, shape index: {}]   ;;  %s12529_s1 = inlined_call_operand.hbm [shape: bf16[1536,1536], index: 1, kind: input, shape index: {}]   ;;  %s12530_s2 = inlined_call_operand.hbm [shape: f32[3,1536], index: 2, kind: input, shape index: {}]   ;;  %s12531_s3 = inlined_call_operand.vmem [shape: f32[16,2], index: 3, kind: input, shape index: {}]   ;;  %s12532_s4 = inlined_call_operand.hbm [shape: f32[16,1536], index: 4, kind: output, shape index: {}]  }
   0x1   :  { %10 = vsyncpa [#allocation6], 0 }
   0x2   :  { %11 = vsyncpa [#allocation4], 0  ;;  %s12268_s15 = smov [#allocation5]   ;;  %s12269_s17 = smov [#allocation2]  }
   0x3   :  { %s29_s16 = sshll.u32 %s12268_s15, 4  ;;  %s17_s18 = sshll.u32 %s12269_s17, 4  ;;  %s30_s16 = int_to_ptr.vmem [resolvable:$true] %s29_s16  ;;  %s12303_s18 = int_to_ptr.vmem [resolvable:$true] %s17_s18 }
   0x4   :  { %s12174_s21 = scalar_lea.hbm %s12529_s1, 147456 }
   0x5   :  { %p12175_p0 = scmp.ne.s32.totalorder %s12529_s1, %s12174_s21  ;;  %p12178_p1 = scmp.lt.u32.totalorder %s12174_s21, %s12529_s1 }
   0x7   :  { %p12180_p2 = pnand %p12178_p1, %p12175_p0 }
   0x9   :  { %12183 = shalt.err (!%p12180_p2)
}
   0xa   :  { %s12184_s26 = scalar_lea.vmem %s30_s16, 147456  ;;  %p12189_p4 = scmp.lt.s32.totalorder %s30_s16, %s30_s16 }
   0xb   :  { %p12185_p3 = scmp.ne.s32.totalorder %s30_s16, %s12184_s26  ;;  %p12190_p5 = scmp.lt.s32.totalorder %s12184_s26, %s12184_s26 }
   0xd   :  { %p12191_p6 = por %p12190_p5, %p12189_p4 }
   0xf   :  { %p12192_p7 = pnand %p12191_p6, %p12185_p3 }
  0x11   :  { %12195 = shalt.err (!%p12192_p7)
}
  0x12   :  { %s12270_s27 = smov 768   ;;  %s12271_s28 = smov 48  }
  0x13   :  { %35 = dma.hbm_to_vmem [thread:$0]  %s12529_s1, 147456, %s30_s16, [#allocation6], %s12270_s27, %s12270_s27, %s12271_s28  }
  0x14   :  { %s12196_s7 = scalar_lea.hbm %s12528_s0, 1536 }
  0x15   :  { %p12197_p8 = scmp.ne.s32.totalorder %s12528_s0, %s12196_s7  ;;  %p12200_p9 = scmp.lt.u32.totalorder %s12196_s7, %s12528_s0 }
  0x17   :  { %p12202_p10 = pnand %p12200_p9, %p12197_p8 }
  0x19   :  { %12205 = shalt.err (!%p12202_p10)
}
  0x1a   :  { %s12206_s12 = scalar_lea.vmem %s12303_s18, 1536  ;;  %p12211_p12 = scmp.lt.s32.totalorder %s12303_s18, %s12303_s18 }
  0x1b   :  { %p12207_p11 = scmp.ne.s32.totalorder %s12303_s18, %s12206_s12  ;;  %p12212_p13 = scmp.lt.s32.totalorder %s12206_s12, %s12206_s12 }
  0x1d   :  { %p12213_p0 = por %p12212_p13, %p12211_p12 }
  0x1f   :  { %p12214_p1 = pnand %p12213_p0, %p12207_p11 }
  0x21   :  { %12217 = shalt.err (!%p12214_p1)
}
  0x22   :  { %23 = dma.hbm_to_vmem [thread:$0]  %s12528_s0, 1536, %s12303_s18, [#allocation3], %s12270_s27, %s12270_s27, %s12271_s28  }
  0x23   :  { %s12272_s14 = smov [#allocation7]   ;;  %s12218_s19 = scalar_lea.hbm %s12530_s2, 768 }
  0x24   :  { %s42_s15 = sshll.u32 %s12272_s14, 4  ;;  %p12219_p2 = scmp.ne.s32.totalorder %s12530_s2, %s12218_s19  ;;  %s43_s15 = int_to_ptr.vmem [resolvable:$true] %s42_s15 }
  0x25   :  { %p12222_p3 = scmp.lt.u32.totalorder %s12218_s19, %s12530_s2 }
  0x27   :  { %p12224_p4 = pnand %p12222_p3, %p12219_p2 }
  0x29   :  { %12227 = shalt.err (!%p12224_p4)
}
  0x2a   :  { %s12228_s24 = scalar_lea.vmem %s43_s15, 768  ;;  %p12233_p6 = scmp.lt.s32.totalorder %s43_s15, %s43_s15 }
  0x2b   :  { %p12229_p5 = scmp.ne.s32.totalorder %s43_s15, %s12228_s24  ;;  %p12234_p7 = scmp.lt.s32.totalorder %s12228_s24, %s12228_s24 }
  0x2d   :  { %p12235_p8 = por %p12234_p7, %p12233_p6 }
  0x2f   :  { %p12236_p9 = pnand %p12235_p8, %p12229_p5 }
  0x31   :  { %12239 = shalt.err (!%p12236_p9)
}
  0x32   :  { %45 = dma.hbm_to_vmem [thread:$0]  %s12530_s2, 768, %s43_s15, [#allocation6]  }
  0x33   :  { %12262 = dma.done.wait [#allocation3], 1536  }
  0x34   :  { %12263 = vsyncadd [#allocation3], 4294965760 }
  0x35   :  { %12264 = dma.done.wait [#allocation6], 148224  }
  0x36   :  { %12265 = vsyncadd [#allocation6], 4294819072  ;;  %v10404_v0 = vld [vmem:[#allocation5 + $0x4] ss:$48 sps:$4 sm:$0xff]   ;;  %v10406_v1 = vld [vmem:[#allocation5 + $0xc] ss:$48 sps:$4 sm:$0xff]  }
  0x37   :  { %7493 = vmatprep.subr.bf16.mxu0 %v10404_v0  ;;  %v10408_v2 = vld [vmem:[#allocation5] ss:$48 sps:$4 sm:$0xff]   ;;  %v10409_v3 = vld [vmem:[#allocation5 + $0x8] ss:$48 sps:$4 sm:$0xff]   ;;  %7751 = vmatprep.subr.bf16.mxu1 %v10406_v1  ;;  %v10410_v4 = vld [vmem:[#allocation5 + $0x64] ss:$48 sps:$4 sm:$0xff]  }
  0x38   :  { %7494 = vmatpush1.bf16.msra.mxu0 %v10408_v2  ;;  %7752 = vmatpush1.bf16.msra.mxu1 %v10409_v3  ;;  %v10412_v5 = vld [vmem:[#allocation5 + $0x6c] ss:$48 sps:$4 sm:$0xff]   ;;  %v10414_v6 = vld [vmem:[#allocation5 + $0x60] ss:$48 sps:$4 sm:$0xff]   ;;  %v10415_v7 = vld [vmem:[#allocation5 + $0x68] ss:$48 sps:$4 sm:$0xff]  }
  0x39   :  { %7495 = vmatprep.subr.bf16.mxu0 %v10410_v4  ;;  %7753 = vmatprep.subr.bf16.mxu1 %v10412_v5  ;;  %v10416_v8 = vld [vmem:[#allocation5 + $0xc4] ss:$48 sps:$4 sm:$0xff]   ;;  %v10418_v9 = vld [vmem:[#allocation5 + $0xcc] ss:$48 sps:$4 sm:$0xff]   ;;  %v10420_v10 = vld [vmem:[#allocation5 + $0xc0] ss:$48 sps:$4 sm:$0xff]  }
  0x3a   :  { %v10421_v11 = vld [vmem:[#allocation5 + $0xc8] ss:$48 sps:$4 sm:$0xff]   ;;  %v10422_v12 = vld [vmem:[#allocation5 + $0x124] ss:$48 sps:$4 sm:$0xff]   ;;  %v10424_v13 = vld [vmem:[#allocation5 + $0x12c] ss:$48 sps:$4 sm:$0xff]  }
  0x3b   :  { %v10426_v14 = vld [vmem:[#allocation5 + $0x120] ss:$48 sps:$4 sm:$0xff]   ;;  %v10427_v15 = vld [vmem:[#allocation5 + $0x128] ss:$48 sps:$4 sm:$0xff]   ;;  %v10428_v16 = vld [vmem:[#allocation5 + $0x184] ss:$48 sps:$4 sm:$0xff]  }
  0x3c   :  { %7496 = vmatpush1.bf16.msra.mxu0 %v10414_v6  ;;  %7754 = vmatpush1.bf16.msra.mxu1 %v10415_v7  ;;  %v10430_v17 = vld [vmem:[#allocation5 + $0x18c] ss:$48 sps:$4 sm:$0xff]   ;;  %v10432_v18 = vld [vmem:[#allocation5 + $0x180] ss:$48 sps:$4 sm:$0xff]   ;;  %v10433_v19 = vld [vmem:[#allocation5 + $0x188] ss:$48 sps:$4 sm:$0xff]  }
  0x3d   :  { %7497 = vmatprep.subr.bf16.mxu0 %v10416_v8  ;;  %7755 = vmatprep.subr.bf16.mxu1 %v10418_v9  ;;  %v10434_v20 = vld [vmem:[#allocation5 + $0x1e4] ss:$48 sps:$4 sm:$0xff]   ;;  %v10436_v21 = vld [vmem:[#allocation5 + $0x1ec] ss:$48 sps:$4 sm:$0xff]   ;;  %v10438_v22 = vld [vmem:[#allocation5 + $0x1e0] ss:$48 sps:$4 sm:$0xff]  }
  0x3e   :  { %v10439_v23 = vld [vmem:[#allocation5 + $0x1e8] ss:$48 sps:$4 sm:$0xff]   ;;  %v10440_v24 = vld [vmem:[#allocation5 + $0x244] ss:$48 sps:$4 sm:$0xff]   ;;  %v10442_v25 = vld [vmem:[#allocation5 + $0x24c] ss:$48 sps:$4 sm:$0xff]  }
  0x3f   :  { %v10444_v26 = vld [vmem:[#allocation5 + $0x240] ss:$48 sps:$4 sm:$0xff]   ;;  %v10445_v27 = vld [vmem:[#allocation5 + $0x248] ss:$48 sps:$4 sm:$0xff]   ;;  %v10446_v28 = vld [vmem:[#allocation5 + $0x2a4] ss:$48 sps:$4 sm:$0xff]  }
  0x40   :  { %7498 = vmatpush1.bf16.msra.mxu0 %v10420_v10  ;;  %7756 = vmatpush1.bf16.msra.mxu1 %v10421_v11  ;;  %v10448_v29 = vld [vmem:[#allocation5 + $0x2ac] ss:$48 sps:$4 sm:$0xff]   ;;  %v10450_v30 = vld [vmem:[#allocation5 + $0x2a0] ss:$48 sps:$4 sm:$0xff]   ;;  %v10451_v31 = vld [vmem:[#allocation5 + $0x2a8] ss:$48 sps:$4 sm:$0xff]  }
  0x41   :  { %7499 = vmatprep.subr.bf16.mxu0 %v10422_v12  ;;  %7757 = vmatprep.subr.bf16.mxu1 %v10424_v13  ;;  %v10452_v32 = vld [vmem:[#allocation5 + $0x304] ss:$48 sps:$4 sm:$0xff]   ;;  %v10454_v33 = vld [vmem:[#allocation5 + $0x30c] ss:$48 sps:$4 sm:$0xff]   ;;  %v10456_v34 = vld [vmem:[#allocation5 + $0x300] ss:$48 sps:$4 sm:$0xff]  }
  0x42   :  { %v10457_v35 = vld [vmem:[#allocation5 + $0x308] ss:$48 sps:$4 sm:$0xff]   ;;  %v10458_v36 = vld [vmem:[#allocation5 + $0x364] ss:$48 sps:$4 sm:$0xff]   ;;  %v10460_v37 = vld [vmem:[#allocation5 + $0x36c] ss:$48 sps:$4 sm:$0xff]  }
  0x43   :  { %v10462_v38 = vld [vmem:[#allocation5 + $0x360] ss:$48 sps:$4 sm:$0xff]   ;;  %v10463_v39 = vld [vmem:[#allocation5 + $0x368] ss:$48 sps:$4 sm:$0xff]   ;;  %v10464_v40 = vld [vmem:[#allocation5 + $0x3c4] ss:$48 sps:$4 sm:$0xff]  }
  0x44   :  { %7500 = vmatpush1.bf16.msra.mxu0 %v10426_v14  ;;  %7758 = vmatpush1.bf16.msra.mxu1 %v10427_v15  ;;  %v10466_v41 = vld [vmem:[#allocation5 + $0x3cc] ss:$48 sps:$4 sm:$0xff]   ;;  %v10468_v42 = vld [vmem:[#allocation5 + $0x3c0] ss:$48 sps:$4 sm:$0xff]   ;;  %v10469_v43 = vld [vmem:[#allocation5 + $0x3c8] ss:$48 sps:$4 sm:$0xff]  }
  0x45   :  { %7501 = vmatprep.subr.bf16.mxu0 %v10428_v16  ;;  %7759 = vmatprep.subr.bf16.mxu1 %v10430_v17  ;;  %v10470_v44 = vld [vmem:[#allocation5 + $0x424] ss:$48 sps:$4 sm:$0xff]   ;;  %v10472_v45 = vld [vmem:[#allocation5 + $0x42c] ss:$48 sps:$4 sm:$0xff]   ;;  %v10474_v46 = vld [vmem:[#allocation5 + $0x420] ss:$48 sps:$4 sm:$0xff]  }
  0x46   :  { %v10500_v47 = vld [vmem:[#allocation2 + $0x4] ss:$48 sps:$4 sm:$0xff]   ;;  %v10475_v48 = vld [vmem:[#allocation5 + $0x428] ss:$48 sps:$4 sm:$0xff]   ;;  %v10478_v50 = vld [vmem:[#allocation5 + $0x48c] ss:$48 sps:$4 sm:$0xff]  }
  0x47   :  { %v10476_v49 = vld [vmem:[#allocation5 + $0x484] ss:$48 sps:$4 sm:$0xff]   ;;  %7525 = vmatprep.mubr.bf16.mxu0 %v10500_v47  ;;  %7783 = vmatprep.mubr.bf16.mxu1 %v10500_v47  ;;  %v10480_v51 = vld [vmem:[#allocation5 + $0x480] ss:$48 sps:$4 sm:$0xff]   ;;  %v10481_v52 = vld [vmem:[#allocation5 + $0x488] ss:$48 sps:$4 sm:$0xff]  }
  0x48   :  { %7502 = vmatpush1.bf16.msra.mxu0 %v10432_v18  ;;  %7760 = vmatpush1.bf16.msra.mxu1 %v10433_v19  ;;  %v10482_v53 = vld [vmem:[#allocation5 + $0x4e4] ss:$48 sps:$4 sm:$0xff]   ;;  %v10484_v54 = vld [vmem:[#allocation5 + $0x4ec] ss:$48 sps:$4 sm:$0xff]   ;;  %v10486_v55 = vld [vmem:[#allocation5 + $0x4e0] ss:$48 sps:$4 sm:$0xff]  }
  0x49   :  { %7503 = vmatprep.subr.bf16.mxu0 %v10434_v20  ;;  %7761 = vmatprep.subr.bf16.mxu1 %v10436_v21  ;;  %v10487_v56 = vld [vmem:[#allocation5 + $0x4e8] ss:$48 sps:$4 sm:$0xff]   ;;  %v10488_v57 = vld [vmem:[#allocation5 + $0x544] ss:$48 sps:$4 sm:$0xff]   ;;  %v10490_v58 = vld [vmem:[#allocation5 + $0x54c] ss:$48 sps:$4 sm:$0xff]  }
  0x4a   :  { %v10492_v59 = vld [vmem:[#allocation5 + $0x540] ss:$48 sps:$4 sm:$0xff]   ;;  %v10493_v60 = vld [vmem:[#allocation5 + $0x548] ss:$48 sps:$4 sm:$0xff]   ;;  %v10494_v61 = vld [vmem:[#allocation5 + $0x5a4] ss:$48 sps:$4 sm:$0xff]  }
  0x4b   :  { %v10496_v62 = vld [vmem:[#allocation5 + $0x5ac] ss:$48 sps:$4 sm:$0xff]   ;;  %v10498_v63 = vld [vmem:[#allocation5 + $0x5a0] ss:$48 sps:$4 sm:$0xff]   ;;  %v10499_v0 = vld [vmem:[#allocation5 + $0x5a8] ss:$48 sps:$4 sm:$0xff]  }
  0x4c   :  { %7504 = vmatpush1.bf16.msra.mxu0 %v10438_v22  ;;  %7762 = vmatpush1.bf16.msra.mxu1 %v10439_v23  ;;  %v10504_v1 = vld [vmem:[#allocation5 + $0x604] ss:$48 sps:$4 sm:$0xff]   ;;  %v10507_v2 = vld [vmem:[#allocation5 + $0x60c] ss:$48 sps:$4 sm:$0xff]   ;;  %v10502_v3 = vld [vmem:[#allocation5 + $0x600] ss:$48 sps:$4 sm:$0xff]  }
  0x4d   :  { %7505 = vmatprep.subr.bf16.mxu0 %v10440_v24  ;;  %7763 = vmatprep.subr.bf16.mxu1 %v10442_v25  ;;  %v10505_v4 = vld [vmem:[#allocation5 + $0x608] ss:$48 sps:$4 sm:$0xff]   ;;  %v10508_v5 = vld [vmem:[#allocation2] ss:$48 sps:$4 sm:$0xff]   ;;  %v10511_v6 = vld [vmem:[#allocation5 + $0x664] ss:$48 sps:$4 sm:$0xff]  }
  0x4e   :  { %v10514_v7 = vld [vmem:[#allocation5 + $0x66c] ss:$48 sps:$4 sm:$0xff]   ;;  %v10509_v8 = vld [vmem:[#allocation5 + $0x660] ss:$48 sps:$4 sm:$0xff]   ;;  %v10512_v9 = vld [vmem:[#allocation5 + $0x668] ss:$48 sps:$4 sm:$0xff]  }
  0x4f   :  { %v10517_v10 = vld [vmem:[#allocation5 + $0x6c4] ss:$48 sps:$4 sm:$0xff]   ;;  %v10520_v11 = vld [vmem:[#allocation5 + $0x6cc] ss:$48 sps:$4 sm:$0xff]   ;;  %v10515_v12 = vld [vmem:[#allocation5 + $0x6c0] ss:$48 sps:$4 sm:$0xff]  }
  0x50   :  { %7506 = vmatpush1.bf16.msra.mxu0 %v10444_v26  ;;  %7764 = vmatpush1.bf16.msra.mxu1 %v10445_v27  ;;  %v10518_v13 = vld [vmem:[#allocation5 + $0x6c8] ss:$48 sps:$4 sm:$0xff]   ;;  %v10523_v14 = vld [vmem:[#allocation5 + $0x724] ss:$48 sps:$4 sm:$0xff]   ;;  %v10526_v15 = vld [vmem:[#allocation5 + $0x72c] ss:$48 sps:$4 sm:$0xff]  }
  0x51   :  { %7507 = vmatprep.subr.bf16.mxu0 %v10446_v28  ;;  %7765 = vmatprep.subr.bf16.mxu1 %v10448_v29  ;;  %v10521_v16 = vld [vmem:[#allocation5 + $0x720] ss:$48 sps:$4 sm:$0xff]   ;;  %v10524_v17 = vld [vmem:[#allocation5 + $0x728] ss:$48 sps:$4 sm:$0xff]   ;;  %v10529_v18 = vld [vmem:[#allocation5 + $0x784] ss:$48 sps:$4 sm:$0xff]  }
  0x52   :  { %v10532_v19 = vld [vmem:[#allocation5 + $0x78c] ss:$48 sps:$4 sm:$0xff]   ;;  %v10527_v20 = vld [vmem:[#allocation5 + $0x780] ss:$48 sps:$4 sm:$0xff]   ;;  %v10530_v21 = vld [vmem:[#allocation5 + $0x788] ss:$48 sps:$4 sm:$0xff]  }
  0x53   :  { %v10535_v22 = vld [vmem:[#allocation5 + $0x7e4] ss:$48 sps:$4 sm:$0xff]   ;;  %v10538_v23 = vld [vmem:[#allocation5 + $0x7ec] ss:$48 sps:$4 sm:$0xff]   ;;  %v10533_v24 = vld [vmem:[#allocation5 + $0x7e0] ss:$48 sps:$4 sm:$0xff]  }
  0x54   :  { %7508 = vmatpush1.bf16.msra.mxu0 %v10450_v30  ;;  %7766 = vmatpush1.bf16.msra.mxu1 %v10451_v31  ;;  %v10536_v25 = vld [vmem:[#allocation5 + $0x7e8] ss:$48 sps:$4 sm:$0xff]   ;;  %v10541_v26 = vld [vmem:[#allocation5 + $0x844] ss:$48 sps:$4 sm:$0xff]   ;;  %v10544_v27 = vld [vmem:[#allocation5 + $0x84c] ss:$48 sps:$4 sm:$0xff]  }
  0x55   :  { %7509 = vmatprep.subr.bf16.mxu0 %v10452_v32  ;;  %7767 = vmatprep.subr.bf16.mxu1 %v10454_v33  ;;  %v10539_v28 = vld [vmem:[#allocation5 + $0x840] ss:$48 sps:$4 sm:$0xff]   ;;  %v10599_v29 = vld [vmem:[#allocation2 + $0xc] ss:$48 sps:$4 sm:$0xff]   ;;  %v10542_v30 = vld [vmem:[#allocation5 + $0x848] ss:$48 sps:$4 sm:$0xff]  }
  0x56   :  { %v10547_v31 = vld [vmem:[#allocation5 + $0x8a4] ss:$48 sps:$4 sm:$0xff]   ;;  %v10550_v32 = vld [vmem:[#allocation5 + $0x8ac] ss:$48 sps:$4 sm:$0xff]   ;;  %v10545_v33 = vld [vmem:[#allocation5 + $0x8a0] ss:$48 sps:$4 sm:$0xff]  }
  0x57   :  { %v10571_v47 = vld [vmem:[#allocation5 + $0xa24] ss:$48 sps:$4 sm:$0xff]  }
  0x58   :  { %7510 = vmatpush1.bf16.msra.mxu0 %v10456_v34  ;;  %7768 = vmatpush1.bf16.msra.mxu1 %v10457_v35  ;;  %v10548_v34 = vld [vmem:[#allocation5 + $0x8a8] ss:$48 sps:$4 sm:$0xff]   ;;  %v10553_v35 = vld [vmem:[#allocation5 + $0x904] ss:$48 sps:$4 sm:$0xff]  }
  0x59   :  { %7511 = vmatprep.subr.bf16.mxu0 %v10458_v36  ;;  %7769 = vmatprep.subr.bf16.mxu1 %v10460_v37  ;;  %v10556_v36 = vld [vmem:[#allocation5 + $0x90c] ss:$48 sps:$4 sm:$0xff]   ;;  %v10551_v37 = vld [vmem:[#allocation5 + $0x900] ss:$48 sps:$4 sm:$0xff]  }
  0x5c   :  { %7512 = vmatpush1.bf16.msra.mxu0 %v10462_v38  ;;  %7770 = vmatpush1.bf16.msra.mxu1 %v10463_v39  ;;  %v10554_v38 = vld [vmem:[#allocation5 + $0x908] ss:$48 sps:$4 sm:$0xff]   ;;  %v10559_v39 = vld [vmem:[#allocation5 + $0x964] ss:$48 sps:$4 sm:$0xff]  }
  0x5d   :  { %7513 = vmatprep.subr.bf16.mxu0 %v10464_v40  ;;  %7771 = vmatprep.subr.bf16.mxu1 %v10466_v41  ;;  %v10562_v40 = vld [vmem:[#allocation5 + $0x96c] ss:$48 sps:$4 sm:$0xff]   ;;  %v10557_v41 = vld [vmem:[#allocation5 + $0x960] ss:$48 sps:$4 sm:$0xff]  }
  0x60   :  { %7514 = vmatpush1.bf16.msra.mxu0 %v10468_v42  ;;  %7772 = vmatpush1.bf16.msra.mxu1 %v10469_v43  ;;  %v10560_v42 = vld [vmem:[#allocation5 + $0x968] ss:$48 sps:$4 sm:$0xff]   ;;  %v10565_v43 = vld [vmem:[#allocation5 + $0x9c4] ss:$48 sps:$4 sm:$0xff]  }
  0x61   :  { %7515 = vmatprep.subr.bf16.mxu0 %v10470_v44  ;;  %7773 = vmatprep.subr.bf16.mxu1 %v10472_v45  ;;  %v10568_v44 = vld [vmem:[#allocation5 + $0x9cc] ss:$48 sps:$4 sm:$0xff]   ;;  %v10563_v45 = vld [vmem:[#allocation5 + $0x9c0] ss:$48 sps:$4 sm:$0xff]  }
  0x64   :  { %7516 = vmatpush1.bf16.msra.mxu0 %v10474_v46  ;;  %7774 = vmatpush1.bf16.msra.mxu1 %v10475_v48  ;;  %v10566_v46 = vld [vmem:[#allocation5 + $0x9c8] ss:$48 sps:$4 sm:$0xff]   ;;  %v10574_v48 = vld [vmem:[#allocation5 + $0xa2c] ss:$48 sps:$4 sm:$0xff]  }
  0x65   :  { %7517 = vmatprep.subr.bf16.mxu0 %v10476_v49  ;;  %7775 = vmatprep.subr.bf16.mxu1 %v10478_v50  ;;  %v10569_v49 = vld [vmem:[#allocation5 + $0xa20] ss:$48 sps:$4 sm:$0xff]   ;;  %v10572_v50 = vld [vmem:[#allocation5 + $0xa28] ss:$48 sps:$4 sm:$0xff]  }
  0x68   :  { %7518 = vmatpush1.bf16.msra.mxu0 %v10480_v51  ;;  %7776 = vmatpush1.bf16.msra.mxu1 %v10481_v52  ;;  %v10577_v51 = vld [vmem:[#allocation5 + $0xa84] ss:$48 sps:$4 sm:$0xff]   ;;  %v10580_v52 = vld [vmem:[#allocation5 + $0xa8c] ss:$48 sps:$4 sm:$0xff]  }
  0x69   :  { %7519 = vmatprep.subr.bf16.mxu0 %v10482_v53  ;;  %7777 = vmatprep.subr.bf16.mxu1 %v10484_v54  ;;  %v10575_v53 = vld [vmem:[#allocation5 + $0xa80] ss:$48 sps:$4 sm:$0xff]   ;;  %v10578_v54 = vld [vmem:[#allocation5 + $0xa88] ss:$48 sps:$4 sm:$0xff]  }
  0x6c   :  { %7520 = vmatpush1.bf16.msra.mxu0 %v10486_v55  ;;  %7778 = vmatpush1.bf16.msra.mxu1 %v10487_v56  ;;  %v10583_v55 = vld [vmem:[#allocation5 + $0xae4] ss:$48 sps:$4 sm:$0xff]   ;;  %v10586_v56 = vld [vmem:[#allocation5 + $0xaec] ss:$48 sps:$4 sm:$0xff]  }
  0x6d   :  { %7521 = vmatprep.subr.bf16.mxu0 %v10488_v57  ;;  %7779 = vmatprep.subr.bf16.mxu1 %v10490_v58  ;;  %v10581_v57 = vld [vmem:[#allocation5 + $0xae0] ss:$48 sps:$4 sm:$0xff]   ;;  %v10584_v58 = vld [vmem:[#allocation5 + $0xae8] ss:$48 sps:$4 sm:$0xff]  }
  0x70   :  { %7522 = vmatpush1.bf16.msra.mxu0 %v10492_v59  ;;  %7780 = vmatpush1.bf16.msra.mxu1 %v10493_v60  ;;  %v10589_v59 = vld [vmem:[#allocation5 + $0xb44] ss:$48 sps:$4 sm:$0xff]   ;;  %v10592_v60 = vld [vmem:[#allocation5 + $0xb4c] ss:$48 sps:$4 sm:$0xff]  }
  0x71   :  { %7523 = vmatprep.subr.bf16.mxu0 %v10494_v61  ;;  %7781 = vmatprep.subr.bf16.mxu1 %v10496_v62  ;;  %v10587_v61 = vld [vmem:[#allocation5 + $0xb40] ss:$48 sps:$4 sm:$0xff]   ;;  %v10590_v62 = vld [vmem:[#allocation5 + $0xb48] ss:$48 sps:$4 sm:$0xff]  }
  0x74   :  { %7524 = vmatpush1.bf16.msra.mxu0 %v10498_v63  ;;  %7782 = vmatpush1.bf16.msra.mxu1 %v10499_v0  ;;  %v10595_v63 = vld [vmem:[#allocation5 + $0xba4] ss:$48 sps:$4 sm:$0xff]   ;;  %v10598_v0 = vld [vmem:[#allocation5 + $0xbac] ss:$48 sps:$4 sm:$0xff]  }
  0x75   :  { %7536 = vmatprep.subr.bf16.mxu0 %v10504_v1  ;;  %7794 = vmatprep.subr.bf16.mxu1 %v10507_v2  ;;  %v10593_v1 = vld [vmem:[#allocation5 + $0xba0] ss:$48 sps:$4 sm:$0xff]   ;;  %v10596_v2 = vld [vmem:[#allocation5 + $0xba8] ss:$48 sps:$4 sm:$0xff]  }
  0x77   :  { %7526 = vmatmul.mubr.bf16.vlgmr.msra.gmra.mrb[0].mxu0 %v10508_v5  ;;  %7784 = vmatmul.mubr.bf16.vlgmr.msra.gmra.mrb[0].mxu1 %v10508_v5  ;;  %v10601_v5 = vld [vmem:[#allocation5 + $0xc00] ss:$48 sps:$4 sm:$0xff]  }
  0x78   :  { %7537 = vmatpush1.bf16.msra.mxu0 %v10502_v3  ;;  %7795 = vmatpush1.bf16.msra.mxu1 %v10505_v4  ;;  %v10603_v3 = vld [vmem:[#allocation5 + $0xc04] ss:$48 sps:$4 sm:$0xff]   ;;  %v10606_v4 = vld [vmem:[#allocation5 + $0xc0c] ss:$48 sps:$4 sm:$0xff]  }
  0x79   :  { %7538 = vmatprep.subr.bf16.mxu0 %v10511_v6  ;;  %7796 = vmatprep.subr.bf16.mxu1 %v10514_v7  ;;  %v10604_v6 = vld [vmem:[#allocation5 + $0xc08] ss:$48 sps:$4 sm:$0xff]  }
  0x7a   :  { %7568 = vmatprep.mubr.bf16.mxu0 %v10599_v29  ;;  %7826 = vmatprep.mubr.bf16.mxu1 %v10599_v29  ;;  %v10607_v7 = vld [vmem:[#allocation2 + $0x8] ss:$48 sps:$4 sm:$0xff]   ;;  %v10640_v29 = vld [vmem:[#allocation5 + $0xe44] ss:$48 sps:$4 sm:$0xff]  }
  0x7c   :  { %7539 = vmatpush1.bf16.msra.mxu0 %v10509_v8  ;;  %7797 = vmatpush1.bf16.msra.mxu1 %v10512_v9  ;;  %v10610_v8 = vld [vmem:[#allocation5 + $0xc64] ss:$48 sps:$4 sm:$0xff]   ;;  %v10613_v9 = vld [vmem:[#allocation5 + $0xc6c] ss:$48 sps:$4 sm:$0xff]  }
  0x7d   :  { %7540 = vmatprep.subr.bf16.mxu0 %v10517_v10  ;;  %7798 = vmatprep.subr.bf16.mxu1 %v10520_v11  ;;  %v10608_v10 = vld [vmem:[#allocation5 + $0xc60] ss:$48 sps:$4 sm:$0xff]   ;;  %v10698_v11 = vld [vmem:[#allocation2 + $0x14] ss:$48 sps:$4 sm:$0xff]  }
  0x80   :  { %7541 = vmatpush1.bf16.msra.mxu0 %v10515_v12  ;;  %7799 = vmatpush1.bf16.msra.mxu1 %v10518_v13  ;;  %v10611_v12 = vld [vmem:[#allocation5 + $0xc68] ss:$48 sps:$4 sm:$0xff]   ;;  %v10616_v13 = vld [vmem:[#allocation5 + $0xcc4] ss:$48 sps:$4 sm:$0xff]  }
  0x81   :  { %7542 = vmatprep.subr.bf16.mxu0 %v10523_v14  ;;  %7800 = vmatprep.subr.bf16.mxu1 %v10526_v15  ;;  %v10619_v14 = vld [vmem:[#allocation5 + $0xccc] ss:$48 sps:$4 sm:$0xff]   ;;  %v10614_v15 = vld [vmem:[#allocation5 + $0xcc0] ss:$48 sps:$4 sm:$0xff]  }
  0x84   :  { %7543 = vmatpush1.bf16.msra.mxu0 %v10521_v16  ;;  %7801 = vmatpush1.bf16.msra.mxu1 %v10524_v17  ;;  %v10617_v16 = vld [vmem:[#allocation5 + $0xcc8] ss:$48 sps:$4 sm:$0xff]   ;;  %v10622_v17 = vld [vmem:[#allocation5 + $0xd24] ss:$48 sps:$4 sm:$0xff]  }
  0x85   :  { %7544 = vmatprep.subr.bf16.mxu0 %v10529_v18  ;;  %7802 = vmatprep.subr.bf16.mxu1 %v10532_v19  ;;  %v10625_v18 = vld [vmem:[#allocation5 + $0xd2c] ss:$48 sps:$4 sm:$0xff]   ;;  %v10620_v19 = vld [vmem:[#allocation5 + $0xd20] ss:$48 sps:$4 sm:$0xff]  }
  0x88   :  { %7545 = vmatpush1.bf16.msra.mxu0 %v10527_v20  ;;  %7803 = vmatpush1.bf16.msra.mxu1 %v10530_v21  ;;  %v10623_v20 = vld [vmem:[#allocation5 + $0xd28] ss:$48 sps:$4 sm:$0xff]   ;;  %v10628_v21 = vld [vmem:[#allocation5 + $0xd84] ss:$48 sps:$4 sm:$0xff]  }
  0x89   :  { %7546 = vmatprep.subr.bf16.mxu0 %v10535_v22  ;;  %7804 = vmatprep.subr.bf16.mxu1 %v10538_v23  ;;  %v10631_v22 = vld [vmem:[#allocation5 + $0xd8c] ss:$48 sps:$4 sm:$0xff]   ;;  %v10626_v23 = vld [vmem:[#allocation5 + $0xd80] ss:$48 sps:$4 sm:$0xff]  }
  0x8c   :  { %7547 = vmatpush1.bf16.msra.mxu0 %v10533_v24  ;;  %7805 = vmatpush1.bf16.msra.mxu1 %v10536_v25  ;;  %v10629_v24 = vld [vmem:[#allocation5 + $0xd88] ss:$48 sps:$4 sm:$0xff]   ;;  %v10634_v25 = vld [vmem:[#allocation5 + $0xde4] ss:$48 sps:$4 sm:$0xff]  }
  0x8d   :  { %7548 = vmatprep.subr.bf16.mxu0 %v10541_v26  ;;  %7806 = vmatprep.subr.bf16.mxu1 %v10544_v27  ;;  %v10637_v26 = vld [vmem:[#allocation5 + $0xdec] ss:$48 sps:$4 sm:$0xff]   ;;  %v10632_v27 = vld [vmem:[#allocation5 + $0xde0] ss:$48 sps:$4 sm:$0xff]  }
  0x90   :  { %7549 = vmatpush1.bf16.msra.mxu0 %v10539_v28  ;;  %7807 = vmatpush1.bf16.msra.mxu1 %v10542_v30  ;;  %v10635_v28 = vld [vmem:[#allocation5 + $0xde8] ss:$48 sps:$4 sm:$0xff]   ;;  %v10643_v30 = vld [vmem:[#allocation5 + $0xe4c] ss:$48 sps:$4 sm:$0xff]  }
  0x91   :  { %7550 = vmatprep.subr.bf16.mxu0 %v10547_v31  ;;  %7808 = vmatprep.subr.bf16.mxu1 %v10550_v32  ;;  %v10638_v31 = vld [vmem:[#allocation5 + $0xe40] ss:$48 sps:$4 sm:$0xff]   ;;  %v10641_v32 = vld [vmem:[#allocation5 + $0xe48] ss:$48 sps:$4 sm:$0xff]  }
  0x94   :  { %7551 = vmatpush1.bf16.msra.mxu0 %v10545_v33  ;;  %7809 = vmatpush1.bf16.msra.mxu1 %v10548_v34  ;;  %v10646_v33 = vld [vmem:[#allocation5 + $0xea4] ss:$48 sps:$4 sm:$0xff]   ;;  %v10649_v34 = vld [vmem:[#allocation5 + $0xeac] ss:$48 sps:$4 sm:$0xff]  }
  0x95   :  { %7552 = vmatprep.subr.bf16.mxu0 %v10553_v35  ;;  %7810 = vmatprep.subr.bf16.mxu1 %v10556_v36  ;;  %v10644_v35 = vld [vmem:[#allocation5 + $0xea0] ss:$48 sps:$4 sm:$0xff]   ;;  %v10647_v36 = vld [vmem:[#allocation5 + $0xea8] ss:$48 sps:$4 sm:$0xff]  }
  0x98   :  { %7553 = vmatpush1.bf16.msra.mxu0 %v10551_v37  ;;  %7811 = vmatpush1.bf16.msra.mxu1 %v10554_v38  ;;  %v10652_v37 = vld [vmem:[#allocation5 + $0xf04] ss:$48 sps:$4 sm:$0xff]   ;;  %v10655_v38 = vld [vmem:[#allocation5 + $0xf0c] ss:$48 sps:$4 sm:$0xff]  }
  0x99   :  { %7554 = vmatprep.subr.bf16.mxu0 %v10559_v39  ;;  %7812 = vmatprep.subr.bf16.mxu1 %v10562_v40  ;;  %v10650_v39 = vld [vmem:[#allocation5 + $0xf00] ss:$48 sps:$4 sm:$0xff]   ;;  %v10653_v40 = vld [vmem:[#allocation5 + $0xf08] ss:$48 sps:$4 sm:$0xff]  }
  0x9c   :  { %7555 = vmatpush1.bf16.msra.mxu0 %v10557_v41  ;;  %7813 = vmatpush1.bf16.msra.mxu1 %v10560_v42  ;;  %v10658_v41 = vld [vmem:[#allocation5 + $0xf64] ss:$48 sps:$4 sm:$0xff]   ;;  %v10661_v42 = vld [vmem:[#allocation5 + $0xf6c] ss:$48 sps:$4 sm:$0xff]  }
  0x9d   :  { %7556 = vmatprep.subr.bf16.mxu0 %v10565_v43  ;;  %7814 = vmatprep.subr.bf16.mxu1 %v10568_v44  ;;  %v10656_v43 = vld [vmem:[#allocation5 + $0xf60] ss:$48 sps:$4 sm:$0xff]   ;;  %v10659_v44 = vld [vmem:[#allocation5 + $0xf68] ss:$48 sps:$4 sm:$0xff]  }
  0xa0   :  { %7557 = vmatpush1.bf16.msra.mxu0 %v10563_v45  ;;  %7815 = vmatpush1.bf16.msra.mxu1 %v10566_v46  ;;  %v10664_v45 = vld [vmem:[#allocation5 + $0xfc4] ss:$48 sps:$4 sm:$0xff]   ;;  %v10667_v46 = vld [vmem:[#allocation5 + $0xfcc] ss:$48 sps:$4 sm:$0xff]  }
  0xa1   :  { %7558 = vmatprep.subr.bf16.mxu0 %v10571_v47  ;;  %7816 = vmatprep.subr.bf16.mxu1 %v10574_v48  ;;  %v10662_v47 = vld [vmem:[#allocation5 + $0xfc0] ss:$48 sps:$4 sm:$0xff]   ;;  %v10665_v48 = vld [vmem:[#allocation5 + $0xfc8] ss:$48 sps:$4 sm:$0xff]  }
  0xa4   :  { %7559 = vmatpush1.bf16.msra.mxu0 %v10569_v49  ;;  %7817 = vmatpush1.bf16.msra.mxu1 %v10572_v50  ;;  %v10670_v49 = vld [vmem:[#allocation5 + $0x1024] ss:$48 sps:$4 sm:$0xff]   ;;  %v10673_v50 = vld [vmem:[#allocation5 + $0x102c] ss:$48 sps:$4 sm:$0xff]  }
  0xa5   :  { %7560 = vmatprep.subr.bf16.mxu0 %v10577_v51  ;;  %7818 = vmatprep.subr.bf16.mxu1 %v10580_v52  ;;  %v10668_v51 = vld [vmem:[#allocation5 + $0x1020] ss:$48 sps:$4 sm:$0xff]   ;;  %v10671_v52 = vld [vmem:[#allocation5 + $0x1028] ss:$48 sps:$4 sm:$0xff]  }
  0xa8   :  { %7561 = vmatpush1.bf16.msra.mxu0 %v10575_v53  ;;  %7819 = vmatpush1.bf16.msra.mxu1 %v10578_v54  ;;  %v10676_v53 = vld [vmem:[#allocation5 + $0x1084] ss:$48 sps:$4 sm:$0xff]   ;;  %v10679_v54 = vld [vmem:[#allocation5 + $0x108c] ss:$48 sps:$4 sm:$0xff]  }
  0xa9   :  { %7562 = vmatprep.subr.bf16.mxu0 %v10583_v55  ;;  %7820 = vmatprep.subr.bf16.mxu1 %v10586_v56  ;;  %v10674_v55 = vld [vmem:[#allocation5 + $0x1080] ss:$48 sps:$4 sm:$0xff]   ;;  %v10677_v56 = vld [vmem:[#allocation5 + $0x1088] ss:$48 sps:$4 sm:$0xff]  }
  0xac   :  { %7563 = vmatpush1.bf16.msra.mxu0 %v10581_v57  ;;  %7821 = vmatpush1.bf16.msra.mxu1 %v10584_v58  ;;  %v10682_v57 = vld [vmem:[#allocation5 + $0x10e4] ss:$48 sps:$4 sm:$0xff]   ;;  %v10685_v58 = vld [vmem:[#allocation5 + $0x10ec] ss:$48 sps:$4 sm:$0xff]  }
  0xad   :  { %7564 = vmatprep.subr.bf16.mxu0 %v10589_v59  ;;  %7822 = vmatprep.subr.bf16.mxu1 %v10592_v60  ;;  %v10680_v59 = vld [vmem:[#allocation5 + $0x10e0] ss:$48 sps:$4 sm:$0xff]   ;;  %v10683_v60 = vld [vmem:[#allocation5 + $0x10e8] ss:$48 sps:$4 sm:$0xff]  }
  0xb0   :  { %7565 = vmatpush1.bf16.msra.mxu0 %v10587_v61  ;;  %7823 = vmatpush1.bf16.msra.mxu1 %v10590_v62  ;;  %v10688_v61 = vld [vmem:[#allocation5 + $0x1144] ss:$48 sps:$4 sm:$0xff]   ;;  %v10691_v62 = vld [vmem:[#allocation5 + $0x114c] ss:$48 sps:$4 sm:$0xff]  }
  0xb1   :  { %7566 = vmatprep.subr.bf16.mxu0 %v10595_v63  ;;  %7824 = vmatprep.subr.bf16.mxu1 %v10598_v0  ;;  %v10686_v63 = vld [vmem:[#allocation5 + $0x1140] ss:$48 sps:$4 sm:$0xff]   ;;  %v10689_v0 = vld [vmem:[#allocation5 + $0x1148] ss:$48 sps:$4 sm:$0xff]  }
  0xb4   :  { %7567 = vmatpush1.bf16.msra.mxu0 %v10593_v1  ;;  %7825 = vmatpush1.bf16.msra.mxu1 %v10596_v2  ;;  %v10694_v1 = vld [vmem:[#allocation5 + $0x11a4] ss:$48 sps:$4 sm:$0xff]   ;;  %v10697_v2 = vld [vmem:[#allocation5 + $0x11ac] ss:$48 sps:$4 sm:$0xff]  }
  0xb5   :  { %7579 = vmatprep.subr.bf16.mxu0 %v10603_v3  ;;  %7837 = vmatprep.subr.bf16.mxu1 %v10606_v4  ;;  %v10692_v3 = vld [vmem:[#allocation5 + $0x11a0] ss:$48 sps:$4 sm:$0xff]   ;;  %v10695_v4 = vld [vmem:[#allocation5 + $0x11a8] ss:$48 sps:$4 sm:$0xff]  }
  0xb7   :  { %7569 = vmatmul.mubr.bf16.vlgmr.msra.gmra.mrb[0].mxu0 %v10607_v7  ;;  %7827 = vmatmul.mubr.bf16.vlgmr.msra.gmra.mrb[0].mxu1 %v10607_v7  ;;  %v10700_v7 = vld [vmem:[#allocation5 + $0x1200] ss:$48 sps:$4 sm:$0xff]  }
  0xb8   :  { %7580 = vmatpush1.bf16.msra.mxu0 %v10601_v5  ;;  %7838 = vmatpush1.bf16.msra.mxu1 %v10604_v6  ;;  %v10702_v5 = vld [vmem:[#allocation5 + $0x1204] ss:$48 sps:$4 sm:$0xff]   ;;  %v10705_v6 = vld [vmem:[#allocation5 + $0x120c] ss:$48 sps:$4 sm:$0xff]  }
  0xb9   :  { %7581 = vmatprep.subr.bf16.mxu0 %v10610_v8  ;;  %7839 = vmatprep.subr.bf16.mxu1 %v10613_v9  ;;  %v10703_v8 = vld [vmem:[#allocation5 + $0x1208] ss:$48 sps:$4 sm:$0xff]   ;;  %v10706_v9 = vld [vmem:[#allocation2 + $0x10] ss:$48 sps:$4 sm:$0xff]  }
  0xba   :  { %7611 = vmatprep.mubr.bf16.mxu0 %v10698_v11  ;;  %7869 = vmatprep.mubr.bf16.mxu1 %v10698_v11  ;;  %v10712_v11 = vld [vmem:[#allocation5 + $0x126c] ss:$48 sps:$4 sm:$0xff]  }
  0xbc   :  { %7582 = vmatpush1.bf16.msra.mxu0 %v10608_v10  ;;  %7840 = vmatpush1.bf16.msra.mxu1 %v10611_v12  ;;  %v10709_v10 = vld [vmem:[#allocation5 + $0x1264] ss:$48 sps:$4 sm:$0xff]   ;;  %v10797_v12 = vld [vmem:[#allocation2 + $0x1c] ss:$48 sps:$4 sm:$0xff]  }
  0xbd   :  { %7583 = vmatprep.subr.bf16.mxu0 %v10616_v13  ;;  %7841 = vmatprep.subr.bf16.mxu1 %v10619_v14  ;;  %v10707_v13 = vld [vmem:[#allocation5 + $0x1260] ss:$48 sps:$4 sm:$0xff]   ;;  %v10710_v14 = vld [vmem:[#allocation5 + $0x1268] ss:$48 sps:$4 sm:$0xff]  }
  0xc0   :  { %7584 = vmatpush1.bf16.msra.mxu0 %v10614_v15  ;;  %7842 = vmatpush1.bf16.msra.mxu1 %v10617_v16  ;;  %v10715_v15 = vld [vmem:[#allocation5 + $0x12c4] ss:$48 sps:$4 sm:$0xff]   ;;  %v10718_v16 = vld [vmem:[#allocation5 + $0x12cc] ss:$48 sps:$4 sm:$0xff]  }
  0xc1   :  { %7585 = vmatprep.subr.bf16.mxu0 %v10622_v17  ;;  %7843 = vmatprep.subr.bf16.mxu1 %v10625_v18  ;;  %v10713_v17 = vld [vmem:[#allocation5 + $0x12c0] ss:$48 sps:$4 sm:$0xff]   ;;  %v10716_v18 = vld [vmem:[#allocation5 + $0x12c8] ss:$48 sps:$4 sm:$0xff]  }
  0xc4   :  { %7586 = vmatpush1.bf16.msra.mxu0 %v10620_v19  ;;  %7844 = vmatpush1.bf16.msra.mxu1 %v10623_v20  ;;  %v10721_v19 = vld [vmem:[#allocation5 + $0x1324] ss:$48 sps:$4 sm:$0xff]   ;;  %v10724_v20 = vld [vmem:[#allocation5 + $0x132c] ss:$48 sps:$4 sm:$0xff]  }
  0xc5   :  { %7587 = vmatprep.subr.bf16.mxu0 %v10628_v21  ;;  %7845 = vmatprep.subr.bf16.mxu1 %v10631_v22  ;;  %v10719_v21 = vld [vmem:[#allocation5 + $0x1320] ss:$48 sps:$4 sm:$0xff]   ;;  %v10722_v22 = vld [vmem:[#allocation5 + $0x1328] ss:$48 sps:$4 sm:$0xff]  }
  0xc8   :  { %7588 = vmatpush1.bf16.msra.mxu0 %v10626_v23  ;;  %7846 = vmatpush1.bf16.msra.mxu1 %v10629_v24  ;;  %v10727_v23 = vld [vmem:[#allocation5 + $0x1384] ss:$48 sps:$4 sm:$0xff]   ;;  %v10730_v24 = vld [vmem:[#allocation5 + $0x138c] ss:$48 sps:$4 sm:$0xff]  }
  0xc9   :  { %7589 = vmatprep.subr.bf16.mxu0 %v10634_v25  ;;  %7847 = vmatprep.subr.bf16.mxu1 %v10637_v26  ;;  %v10725_v25 = vld [vmem:[#allocation5 + $0x1380] ss:$48 sps:$4 sm:$0xff]   ;;  %v10728_v26 = vld [vmem:[#allocation5 + $0x1388] ss:$48 sps:$4 sm:$0xff]  }
  0xcc   :  { %7590 = vmatpush1.bf16.msra.mxu0 %v10632_v27  ;;  %7848 = vmatpush1.bf16.msra.mxu1 %v10635_v28  ;;  %v10733_v27 = vld [vmem:[#allocation5 + $0x13e4] ss:$48 sps:$4 sm:$0xff]   ;;  %v10736_v28 = vld [vmem:[#allocation5 + $0x13ec] ss:$48 sps:$4 sm:$0xff]  }
  0xcd   :  { %7591 = vmatprep.subr.bf16.mxu0 %v10640_v29  ;;  %7849 = vmatprep.subr.bf16.mxu1 %v10643_v30  ;;  %v10731_v29 = vld [vmem:[#allocation5 + $0x13e0] ss:$48 sps:$4 sm:$0xff]   ;;  %v10734_v30 = vld [vmem:[#allocation5 + $0x13e8] ss:$48 sps:$4 sm:$0xff]  }
  0xd0   :  { %7592 = vmatpush1.bf16.msra.mxu0 %v10638_v31  ;;  %7850 = vmatpush1.bf16.msra.mxu1 %v10641_v32  ;;  %v10739_v31 = vld [vmem:[#allocation5 + $0x1444] ss:$48 sps:$4 sm:$0xff]   ;;  %v10742_v32 = vld [vmem:[#allocation5 + $0x144c] ss:$48 sps:$4 sm:$0xff]  }
  0xd1   :  { %7593 = vmatprep.subr.bf16.mxu0 %v10646_v33  ;;  %7851 = vmatprep.subr.bf16.mxu1 %v10649_v34  ;;  %v10737_v33 = vld [vmem:[#allocation5 + $0x1440] ss:$48 sps:$4 sm:$0xff]   ;;  %v10740_v34 = vld [vmem:[#allocation5 + $0x1448] ss:$48 sps:$4 sm:$0xff]  }
  0xd4   :  { %7594 = vmatpush1.bf16.msra.mxu0 %v10644_v35  ;;  %7852 = vmatpush1.bf16.msra.mxu1 %v10647_v36  ;;  %v10745_v35 = vld [vmem:[#allocation5 + $0x14a4] ss:$48 sps:$4 sm:$0xff]   ;;  %v10748_v36 = vld [vmem:[#allocation5 + $0x14ac] ss:$48 sps:$4 sm:$0xff]  }
  0xd5   :  { %7595 = vmatprep.subr.bf16.mxu0 %v10652_v37  ;;  %7853 = vmatprep.subr.bf16.mxu1 %v10655_v38  ;;  %v10743_v37 = vld [vmem:[#allocation5 + $0x14a0] ss:$48 sps:$4 sm:$0xff]   ;;  %v10746_v38 = vld [vmem:[#allocation5 + $0x14a8] ss:$48 sps:$4 sm:$0xff]  }
  0xd8   :  { %7596 = vmatpush1.bf16.msra.mxu0 %v10650_v39  ;;  %7854 = vmatpush1.bf16.msra.mxu1 %v10653_v40  ;;  %v10751_v39 = vld [vmem:[#allocation5 + $0x1504] ss:$48 sps:$4 sm:$0xff]   ;;  %v10754_v40 = vld [vmem:[#allocation5 + $0x150c] ss:$48 sps:$4 sm:$0xff]  }
  0xd9   :  { %7597 = vmatprep.subr.bf16.mxu0 %v10658_v41  ;;  %7855 = vmatprep.subr.bf16.mxu1 %v10661_v42  ;;  %v10749_v41 = vld [vmem:[#allocation5 + $0x1500] ss:$48 sps:$4 sm:$0xff]   ;;  %v10752_v42 = vld [vmem:[#allocation5 + $0x1508] ss:$48 sps:$4 sm:$0xff]  }
  0xdc   :  { %7598 = vmatpush1.bf16.msra.mxu0 %v10656_v43  ;;  %7856 = vmatpush1.bf16.msra.mxu1 %v10659_v44  ;;  %v10757_v43 = vld [vmem:[#allocation5 + $0x1564] ss:$48 sps:$4 sm:$0xff]   ;;  %v10760_v44 = vld [vmem:[#allocation5 + $0x156c] ss:$48 sps:$4 sm:$0xff]  }
  0xdd   :  { %7599 = vmatprep.subr.bf16.mxu0 %v10664_v45  ;;  %7857 = vmatprep.subr.bf16.mxu1 %v10667_v46  ;;  %v10755_v45 = vld [vmem:[#allocation5 + $0x1560] ss:$48 sps:$4 sm:$0xff]   ;;  %v10758_v46 = vld [vmem:[#allocation5 + $0x1568] ss:$48 sps:$4 sm:$0xff]  }
  0xe0   :  { %7600 = vmatpush1.bf16.msra.mxu0 %v10662_v47  ;;  %7858 = vmatpush1.bf16.msra.mxu1 %v10665_v48  ;;  %v10763_v47 = vld [vmem:[#allocation5 + $0x15c4] ss:$48 sps:$4 sm:$0xff]   ;;  %v10766_v48 = vld [vmem:[#allocation5 + $0x15cc] ss:$48 sps:$4 sm:$0xff]  }
  0xe1   :  { %7601 = vmatprep.subr.bf16.mxu0 %v10670_v49  ;;  %7859 = vmatprep.subr.bf16.mxu1 %v10673_v50  ;;  %v10761_v49 = vld [vmem:[#allocation5 + $0x15c0] ss:$48 sps:$4 sm:$0xff]   ;;  %v10764_v50 = vld [vmem:[#allocation5 + $0x15c8] ss:$48 sps:$4 sm:$0xff]  }
  0xe4   :  { %7602 = vmatpush1.bf16.msra.mxu0 %v10668_v51  ;;  %7860 = vmatpush1.bf16.msra.mxu1 %v10671_v52  ;;  %v10769_v51 = vld [vmem:[#allocation5 + $0x1624] ss:$48 sps:$4 sm:$0xff]   ;;  %v10772_v52 = vld [vmem:[#allocation5 + $0x162c] ss:$48 sps:$4 sm:$0xff]  }
  0xe5   :  { %7603 = vmatprep.subr.bf16.mxu0 %v10676_v53  ;;  %7861 = vmatprep.subr.bf16.mxu1 %v10679_v54  ;;  %v10767_v53 = vld [vmem:[#allocation5 + $0x1620] ss:$48 sps:$4 sm:$0xff]   ;;  %v10770_v54 = vld [vmem:[#allocation5 + $0x1628] ss:$48 sps:$4 sm:$0xff]  }
  0xe8   :  { %7604 = vmatpush1.bf16.msra.mxu0 %v10674_v55  ;;  %7862 = vmatpush1.bf16.msra.mxu1 %v10677_v56  ;;  %v10775_v55 = vld [vmem:[#allocation5 + $0x1684] ss:$48 sps:$4 sm:$0xff]   ;;  %v10778_v56 = vld [vmem:[#allocation5 + $0x168c] ss:$48 sps:$4 sm:$0xff]  }
  0xe9   :  { %7605 = vmatprep.subr.bf16.mxu0 %v10682_v57  ;;  %7863 = vmatprep.subr.bf16.mxu1 %v10685_v58  ;;  %v10773_v57 = vld [vmem:[#allocation5 + $0x1680] ss:$48 sps:$4 sm:$0xff]   ;;  %v10776_v58 = vld [vmem:[#allocation5 + $0x1688] ss:$48 sps:$4 sm:$0xff]  }
  0xec   :  { %7606 = vmatpush1.bf16.msra.mxu0 %v10680_v59  ;;  %7864 = vmatpush1.bf16.msra.mxu1 %v10683_v60  ;;  %v10781_v59 = vld [vmem:[#allocation5 + $0x16e4] ss:$48 sps:$4 sm:$0xff]   ;;  %v10784_v60 = vld [vmem:[#allocation5 + $0x16ec] ss:$48 sps:$4 sm:$0xff]  }
  0xed   :  { %7607 = vmatprep.subr.bf16.mxu0 %v10688_v61  ;;  %7865 = vmatprep.subr.bf16.mxu1 %v10691_v62  ;;  %v10779_v61 = vld [vmem:[#allocation5 + $0x16e0] ss:$48 sps:$4 sm:$0xff]   ;;  %v10782_v62 = vld [vmem:[#allocation5 + $0x16e8] ss:$48 sps:$4 sm:$0xff]  }
  0xf0   :  { %7608 = vmatpush1.bf16.msra.mxu0 %v10686_v63  ;;  %7866 = vmatpush1.bf16.msra.mxu1 %v10689_v0  ;;  %v10787_v63 = vld [vmem:[#allocation5 + $0x1744] ss:$48 sps:$4 sm:$0xff]   ;;  %v10790_v0 = vld [vmem:[#allocation5 + $0x174c] ss:$48 sps:$4 sm:$0xff]  }
  0xf1   :  { %7609 = vmatprep.subr.bf16.mxu0 %v10694_v1  ;;  %7867 = vmatprep.subr.bf16.mxu1 %v10697_v2  ;;  %v10785_v1 = vld [vmem:[#allocation5 + $0x1740] ss:$48 sps:$4 sm:$0xff]   ;;  %v10788_v2 = vld [vmem:[#allocation5 + $0x1748] ss:$48 sps:$4 sm:$0xff]  }
  0xf4   :  { %7610 = vmatpush1.bf16.msra.mxu0 %v10692_v3  ;;  %7868 = vmatpush1.bf16.msra.mxu1 %v10695_v4  ;;  %v10793_v3 = vld [vmem:[#allocation5 + $0x17a4] ss:$48 sps:$4 sm:$0xff]   ;;  %v10796_v4 = vld [vmem:[#allocation5 + $0x17ac] ss:$48 sps:$4 sm:$0xff]  }
  0xf5   :  { %7622 = vmatprep.subr.bf16.mxu0 %v10702_v5  ;;  %7880 = vmatprep.subr.bf16.mxu1 %v10705_v6  ;;  %v10791_v5 = vld [vmem:[#allocation5 + $0x17a0] ss:$48 sps:$4 sm:$0xff]   ;;  %v10794_v6 = vld [vmem:[#allocation5 + $0x17a8] ss:$48 sps:$4 sm:$0xff]  }
  0xf7   :  { %7612 = vmatmul.mubr.bf16.vlgmr.msra.gmra.mrb[0].mxu0 %v10706_v9  ;;  %7870 = vmatmul.mubr.bf16.vlgmr.msra.gmra.mrb[0].mxu1 %v10706_v9  ;;  %v10799_v9 = vld [vmem:[#allocation5 + $0x1800] ss:$48 sps:$4 sm:$0xff]  }
  0xf8   :  { %7623 = vmatpush1.bf16.msra.mxu0 %v10700_v7  ;;  %7881 = vmatpush1.bf16.msra.mxu1 %v10703_v8  ;;  %v10801_v7 = vld [vmem:[#allocation5 + $0x1804] ss:$48 sps:$4 sm:$0xff]   ;;  %v10804_v8 = vld [vmem:[#allocation5 + $0x180c] ss:$48 sps:$4 sm:$0xff]  }
  0xf9   :  { %7624 = vmatprep.subr.bf16.mxu0 %v10709_v10  ;;  %7882 = vmatprep.subr.bf16.mxu1 %v10712_v11  ;;  %v10802_v10 = vld [vmem:[#allocation5 + $0x1808] ss:$48 sps:$4 sm:$0xff]  }
  0xfa   :  { %7654 = vmatprep.mubr.bf16.mxu0 %v10797_v12  ;;  %7912 = vmatprep.mubr.bf16.mxu1 %v10797_v12  ;;  %v10805_v11 = vld [vmem:[#allocation2 + $0x18] ss:$48 sps:$4 sm:$0xff]   ;;  %v10808_v12 = vld [vmem:[#allocation5 + $0x1864] ss:$48 sps:$4 sm:$0xff]  }
  0xfc   :  { %7625 = vmatpush1.bf16.msra.mxu0 %v10707_v13  ;;  %7883 = vmatpush1.bf16.msra.mxu1 %v10710_v14  ;;  %v10811_v13 = vld [vmem:[#allocation5 + $0x186c] ss:$48 sps:$4 sm:$0xff]   ;;  %v10896_v14 = vld [vmem:[#allocation2 + $0x24] ss:$48 sps:$4 sm:$0xff]  }
  0xfd   :  { %7626 = vmatprep.subr.bf16.mxu0 %v10715_v15  ;;  %7884 = vmatprep.subr.bf16.mxu1 %v10718_v16  ;;  %v10806_v15 = vld [vmem:[#allocation5 + $0x1860] ss:$48 sps:$4 sm:$0xff]   ;;  %v10809_v16 = vld [vmem:[#allocation5 + $0x1868] ss:$48 sps:$4 sm:$0xff]  }
 0x100   :  { %7627 = vmatpush1.bf16.msra.mxu0 %v10713_v17  ;;  %7885 = vmatpush1.bf16.msra.mxu1 %v10716_v18  ;;  %v10814_v17 = vld [vmem:[#allocation5 + $0x18c4] ss:$48 sps:$4 sm:$0xff]   ;;  %v10817_v18 = vld [vmem:[#allocation5 + $0x18cc] ss:$48 sps:$4 sm:$0xff]  }
 0x101   :  { %7628 = vmatprep.subr.bf16.mxu0 %v10721_v19  ;;  %7886 = vmatprep.subr.bf16.mxu1 %v10724_v20  ;;  %v10812_v19 = vld [vmem:[#allocation5 + $0x18c0] ss:$48 sps:$4 sm:$0xff]   ;;  %v10815_v20 = vld [vmem:[#allocation5 + $0x18c8] ss:$48 sps:$4 sm:$0xff]  }
 0x104   :  { %7629 = vmatpush1.bf16.msra.mxu0 %v10719_v21  ;;  %7887 = vmatpush1.bf16.msra.mxu1 %v10722_v22  ;;  %v10820_v21 = vld [vmem:[#allocation5 + $0x1924] ss:$48 sps:$4 sm:$0xff]   ;;  %v10823_v22 = vld [vmem:[#allocation5 + $0x192c] ss:$48 sps:$4 sm:$0xff]  }
 0x105   :  { %7630 = vmatprep.subr.bf16.mxu0 %v10727_v23  ;;  %7888 = vmatprep.subr.bf16.mxu1 %v10730_v24  ;;  %v10818_v23 = vld [vmem:[#allocation5 + $0x1920] ss:$48 sps:$4 sm:$0xff]   ;;  %v10821_v24 = vld [vmem:[#allocation5 + $0x1928] ss:$48 sps:$4 sm:$0xff]  }
 0x108   :  { %7631 = vmatpush1.bf16.msra.mxu0 %v10725_v25  ;;  %7889 = vmatpush1.bf16.msra.mxu1 %v10728_v26  ;;  %v10826_v25 = vld [vmem:[#allocation5 + $0x1984] ss:$48 sps:$4 sm:$0xff]   ;;  %v10829_v26 = vld [vmem:[#allocation5 + $0x198c] ss:$48 sps:$4 sm:$0xff]  }
 0x109   :  { %7632 = vmatprep.subr.bf16.mxu0 %v10733_v27  ;;  %7890 = vmatprep.subr.bf16.mxu1 %v10736_v28  ;;  %v10824_v27 = vld [vmem:[#allocation5 + $0x1980] ss:$48 sps:$4 sm:$0xff]   ;;  %v10827_v28 = vld [vmem:[#allocation5 + $0x1988] ss:$48 sps:$4 sm:$0xff]  }
 0x10c   :  { %7633 = vmatpush1.bf16.msra.mxu0 %v10731_v29  ;;  %7891 = vmatpush1.bf16.msra.mxu1 %v10734_v30  ;;  %v10832_v29 = vld [vmem:[#allocation5 + $0x19e4] ss:$48 sps:$4 sm:$0xff]   ;;  %v10835_v30 = vld [vmem:[#allocation5 + $0x19ec] ss:$48 sps:$4 sm:$0xff]  }
 0x10d   :  { %7634 = vmatprep.subr.bf16.mxu0 %v10739_v31  ;;  %7892 = vmatprep.subr.bf16.mxu1 %v10742_v32  ;;  %v10830_v31 = vld [vmem:[#allocation5 + $0x19e0] ss:$48 sps:$4 sm:$0xff]   ;;  %v10833_v32 = vld [vmem:[#allocation5 + $0x19e8] ss:$48 sps:$4 sm:$0xff]  }
 0x110   :  { %7635 = vmatpush1.bf16.msra.mxu0 %v10737_v33  ;;  %7893 = vmatpush1.bf16.msra.mxu1 %v10740_v34  ;;  %v10838_v33 = vld [vmem:[#allocation5 + $0x1a44] ss:$48 sps:$4 sm:$0xff]   ;;  %v10841_v34 = vld [vmem:[#allocation5 + $0x1a4c] ss:$48 sps:$4 sm:$0xff]  }
 0x111   :  { %7636 = vmatprep.subr.bf16.mxu0 %v10745_v35  ;;  %7894 = vmatprep.subr.bf16.mxu1 %v10748_v36  ;;  %v10836_v35 = vld [vmem:[#allocation5 + $0x1a40] ss:$48 sps:$4 sm:$0xff]   ;;  %v10839_v36 = vld [vmem:[#allocation5 + $0x1a48] ss:$48 sps:$4 sm:$0xff]  }
 0x114   :  { %7637 = vmatpush1.bf16.msra.mxu0 %v10743_v37  ;;  %7895 = vmatpush1.bf16.msra.mxu1 %v10746_v38  ;;  %v10844_v37 = vld [vmem:[#allocation5 + $0x1aa4] ss:$48 sps:$4 sm:$0xff]   ;;  %v10847_v38 = vld [vmem:[#allocation5 + $0x1aac] ss:$48 sps:$4 sm:$0xff]  }
 0x115   :  { %7638 = vmatprep.subr.bf16.mxu0 %v10751_v39  ;;  %7896 = vmatprep.subr.bf16.mxu1 %v10754_v40  ;;  %v10842_v39 = vld [vmem:[#allocation5 + $0x1aa0] ss:$48 sps:$4 sm:$0xff]   ;;  %v10845_v40 = vld [vmem:[#allocation5 + $0x1aa8] ss:$48 sps:$4 sm:$0xff]  }
 0x118   :  { %7639 = vmatpush1.bf16.msra.mxu0 %v10749_v41  ;;  %7897 = vmatpush1.bf16.msra.mxu1 %v10752_v42  ;;  %v10850_v41 = vld [vmem:[#allocation5 + $0x1b04] ss:$48 sps:$4 sm:$0xff]   ;;  %v10853_v42 = vld [vmem:[#allocation5 + $0x1b0c] ss:$48 sps:$4 sm:$0xff]  }
 0x119   :  { %7640 = vmatprep.subr.bf16.mxu0 %v10757_v43  ;;  %7898 = vmatprep.subr.bf16.mxu1 %v10760_v44  ;;  %v10848_v43 = vld [vmem:[#allocation5 + $0x1b00] ss:$48 sps:$4 sm:$0xff]   ;;  %v10851_v44 = vld [vmem:[#allocation5 + $0x1b08] ss:$48 sps:$4 sm:$0xff]  }
 0x11c   :  { %7641 = vmatpush1.bf16.msra.mxu0 %v10755_v45  ;;  %7899 = vmatpush1.bf16.msra.mxu1 %v10758_v46  ;;  %v10856_v45 = vld [vmem:[#allocation5 + $0x1b64] ss:$48 sps:$4 sm:$0xff]   ;;  %v10859_v46 = vld [vmem:[#allocation5 + $0x1b6c] ss:$48 sps:$4 sm:$0xff]  }
 0x11d   :  { %7642 = vmatprep.subr.bf16.mxu0 %v10763_v47  ;;  %7900 = vmatprep.subr.bf16.mxu1 %v10766_v48  ;;  %v10854_v47 = vld [vmem:[#allocation5 + $0x1b60] ss:$48 sps:$4 sm:$0xff]   ;;  %v10857_v48 = vld [vmem:[#allocation5 + $0x1b68] ss:$48 sps:$4 sm:$0xff]  }
 0x120   :  { %7643 = vmatpush1.bf16.msra.mxu0 %v10761_v49  ;;  %7901 = vmatpush1.bf16.msra.mxu1 %v10764_v50  ;;  %v10862_v49 = vld [vmem:[#allocation5 + $0x1bc4] ss:$48 sps:$4 sm:$0xff]   ;;  %v10865_v50 = vld [vmem:[#allocation5 + $0x1bcc] ss:$48 sps:$4 sm:$0xff]  }
 0x121   :  { %7644 = vmatprep.subr.bf16.mxu0 %v10769_v51  ;;  %7902 = vmatprep.subr.bf16.mxu1 %v10772_v52  ;;  %v10860_v51 = vld [vmem:[#allocation5 + $0x1bc0] ss:$48 sps:$4 sm:$0xff]   ;;  %v10863_v52 = vld [vmem:[#allocation5 + $0x1bc8] ss:$48 sps:$4 sm:$0xff]  }
 0x124   :  { %7645 = vmatpush1.bf16.msra.mxu0 %v10767_v53  ;;  %7903 = vmatpush1.bf16.msra.mxu1 %v10770_v54  ;;  %v10868_v53 = vld [vmem:[#allocation5 + $0x1c24] ss:$48 sps:$4 sm:$0xff]   ;;  %v10871_v54 = vld [vmem:[#allocation5 + $0x1c2c] ss:$48 sps:$4 sm:$0xff]  }
 0x125   :  { %7646 = vmatprep.subr.bf16.mxu0 %v10775_v55  ;;  %7904 = vmatprep.subr.bf16.mxu1 %v10778_v56  ;;  %v10866_v55 = vld [vmem:[#allocation5 + $0x1c20] ss:$48 sps:$4 sm:$0xff]   ;;  %v10869_v56 = vld [vmem:[#allocation5 + $0x1c28] ss:$48 sps:$4 sm:$0xff]  }
 0x128   :  { %7647 = vmatpush1.bf16.msra.mxu0 %v10773_v57  ;;  %7905 = vmatpush1.bf16.msra.mxu1 %v10776_v58  ;;  %v10874_v57 = vld [vmem:[#allocation5 + $0x1c84] ss:$48 sps:$4 sm:$0xff]   ;;  %v10877_v58 = vld [vmem:[#allocation5 + $0x1c8c] ss:$48 sps:$4 sm:$0xff]  }
 0x129   :  { %7648 = vmatprep.subr.bf16.mxu0 %v10781_v59  ;;  %7906 = vmatprep.subr.bf16.mxu1 %v10784_v60  ;;  %v10872_v59 = vld [vmem:[#allocation5 + $0x1c80] ss:$48 sps:$4 sm:$0xff]   ;;  %v10875_v60 = vld [vmem:[#allocation5 + $0x1c88] ss:$48 sps:$4 sm:$0xff]  }
 0x12c   :  { %7649 = vmatpush1.bf16.msra.mxu0 %v10779_v61  ;;  %7907 = vmatpush1.bf16.msra.mxu1 %v10782_v62  ;;  %v10880_v61 = vld [vmem:[#allocation5 + $0x1ce4] ss:$48 sps:$4 sm:$0xff]   ;;  %v10883_v62 = vld [vmem:[#allocation5 + $0x1cec] ss:$48 sps:$4 sm:$0xff]  }
 0x12d   :  { %7650 = vmatprep.subr.bf16.mxu0 %v10787_v63  ;;  %7908 = vmatprep.subr.bf16.mxu1 %v10790_v0  ;;  %v10878_v63 = vld [vmem:[#allocation5 + $0x1ce0] ss:$48 sps:$4 sm:$0xff]   ;;  %v10881_v0 = vld [vmem:[#allocation5 + $0x1ce8] ss:$48 sps:$4 sm:$0xff]  }
 0x130   :  { %7651 = vmatpush1.bf16.msra.mxu0 %v10785_v1  ;;  %7909 = vmatpush1.bf16.msra.mxu1 %v10788_v2  ;;  %v10886_v1 = vld [vmem:[#allocation5 + $0x1d44] ss:$48 sps:$4 sm:$0xff]   ;;  %v10889_v2 = vld [vmem:[#allocation5 + $0x1d4c] ss:$48 sps:$4 sm:$0xff]  }
 0x131   :  { %7652 = vmatprep.subr.bf16.mxu0 %v10793_v3  ;;  %7910 = vmatprep.subr.bf16.mxu1 %v10796_v4  ;;  %v10884_v3 = vld [vmem:[#allocation5 + $0x1d40] ss:$48 sps:$4 sm:$0xff]   ;;  %v10887_v4 = vld [vmem:[#allocation5 + $0x1d48] ss:$48 sps:$4 sm:$0xff]  }
 0x134   :  { %7653 = vmatpush1.bf16.msra.mxu0 %v10791_v5  ;;  %7911 = vmatpush1.bf16.msra.mxu1 %v10794_v6  ;;  %v10892_v5 = vld [vmem:[#allocation5 + $0x1da4] ss:$48 sps:$4 sm:$0xff]   ;;  %v10895_v6 = vld [vmem:[#allocation5 + $0x1dac] ss:$48 sps:$4 sm:$0xff]  }
 0x135   :  { %7665 = vmatprep.subr.bf16.mxu0 %v10801_v7  ;;  %7923 = vmatprep.subr.bf16.mxu1 %v10804_v8  ;;  %v10890_v7 = vld [vmem:[#allocation5 + $0x1da0] ss:$48 sps:$4 sm:$0xff]   ;;  %v10893_v8 = vld [vmem:[#allocation5 + $0x1da8] ss:$48 sps:$4 sm:$0xff]  }
 0x137   :  { %7655 = vmatmul.mubr.bf16.vlgmr.msra.gmra.mrb[0].mxu0 %v10805_v11  ;;  %7913 = vmatmul.mubr.bf16.vlgmr.msra.gmra.mrb[0].mxu1 %v10805_v11  ;;  %v10904_v11 = vld [vmem:[#allocation2 + $0x20] ss:$48 sps:$4 sm:$0xff]  }
 0x138   :  { %7666 = vmatpush1.bf16.msra.mxu0 %v10799_v9  ;;  %7924 = vmatpush1.bf16.msra.mxu1 %v10802_v10  ;;  %v10900_v9 = vld [vmem:[#allocation5 + $0x1e04] ss:$48 sps:$4 sm:$0xff]   ;;  %v10903_v10 = vld [vmem:[#allocation5 + $0x1e0c] ss:$48 sps:$4 sm:$0xff]  }
 0x139   :  { %7667 = vmatprep.subr.bf16.mxu0 %v10808_v12  ;;  %7925 = vmatprep.subr.bf16.mxu1 %v10811_v13  ;;  %v10898_v12 = vld [vmem:[#allocation5 + $0x1e00] ss:$48 sps:$4 sm:$0xff]   ;;  %v10901_v13 = vld [vmem:[#allocation5 + $0x1e08] ss:$48 sps:$4 sm:$0xff]  }
 0x13a   :  { %7697 = vmatprep.mubr.bf16.mxu0 %v10896_v14  ;;  %7955 = vmatprep.mubr.bf16.mxu1 %v10896_v14  ;;  %v10907_v14 = vld [vmem:[#allocation5 + $0x1e64] ss:$48 sps:$4 sm:$0xff]  }
 0x13c   :  { %7668 = vmatpush1.bf16.msra.mxu0 %v10806_v15  ;;  %7926 = vmatpush1.bf16.msra.mxu1 %v10809_v16  ;;  %v10910_v15 = vld [vmem:[#allocation5 + $0x1e6c] ss:$48 sps:$4 sm:$0xff]  }
 0x13d   :  { %7669 = vmatprep.subr.bf16.mxu0 %v10814_v17  ;;  %7927 = vmatprep.subr.bf16.mxu1 %v10817_v18  ;;  %v10995_v16 = vld [vmem:[#allocation2 + $0x2c] ss:$48 sps:$4 sm:$0xff]   ;;  %v10905_v17 = vld [vmem:[#allocation5 + $0x1e60] ss:$48 sps:$4 sm:$0xff]   ;;  %v10908_v18 = vld [vmem:[#allocation5 + $0x1e68] ss:$48 sps:$4 sm:$0xff]  }
 0x140   :  { %7670 = vmatpush1.bf16.msra.mxu0 %v10812_v19  ;;  %7928 = vmatpush1.bf16.msra.mxu1 %v10815_v20  ;;  %v10913_v19 = vld [vmem:[#allocation5 + $0x1ec4] ss:$48 sps:$4 sm:$0xff]   ;;  %v10916_v20 = vld [vmem:[#allocation5 + $0x1ecc] ss:$48 sps:$4 sm:$0xff]  }
 0x141   :  { %7671 = vmatprep.subr.bf16.mxu0 %v10820_v21  ;;  %7929 = vmatprep.subr.bf16.mxu1 %v10823_v22  ;;  %v10911_v21 = vld [vmem:[#allocation5 + $0x1ec0] ss:$48 sps:$4 sm:$0xff]   ;;  %v10914_v22 = vld [vmem:[#allocation5 + $0x1ec8] ss:$48 sps:$4 sm:$0xff]  }
 0x144   :  { %7672 = vmatpush1.bf16.msra.mxu0 %v10818_v23  ;;  %7930 = vmatpush1.bf16.msra.mxu1 %v10821_v24  ;;  %v10919_v23 = vld [vmem:[#allocation5 + $0x1f24] ss:$48 sps:$4 sm:$0xff]   ;;  %v10922_v24 = vld [vmem:[#allocation5 + $0x1f2c] ss:$48 sps:$4 sm:$0xff]  }
 0x145   :  { %7673 = vmatprep.subr.bf16.mxu0 %v10826_v25  ;;  %7931 = vmatprep.subr.bf16.mxu1 %v10829_v26  ;;  %v10917_v25 = vld [vmem:[#allocation5 + $0x1f20] ss:$48 sps:$4 sm:$0xff]   ;;  %v10920_v26 = vld [vmem:[#allocation5 + $0x1f28] ss:$48 sps:$4 sm:$0xff]  }
 0x148   :  { %7674 = vmatpush1.bf16.msra.mxu0 %v10824_v27  ;;  %7932 = vmatpush1.bf16.msra.mxu1 %v10827_v28  ;;  %v1227_v27 = vld [vmem:[%s12531_s3] sm:$0xff] }
 0x149   :  { %7675 = vmatprep.subr.bf16.mxu0 %v10832_v29  ;;  %7933 = vmatprep.subr.bf16.mxu1 %v10835_v30  ;;  %v10925_v28 = vld [vmem:[#allocation5 + $0x1f84] ss:$48 sps:$4 sm:$0xff]   ;;  %v10928_v29 = vld [vmem:[#allocation5 + $0x1f8c] ss:$48 sps:$4 sm:$0xff]   ;;  %v12273_v30 = vmov 0  }
 0x14a   :  { %10401 = vset.pattern.permute.xlu0 %v12273_v30  ;;  %v11021_v30 = vld [vmem:[#allocation5 + $0x13c] ss:$48 sps:$4 sm:$0xff]  }
 0x14b   :  { %1231 = vperm.xlu0 %10401, %v1227_v27  }
 0x14c   :  { %7676 = vmatpush1.bf16.msra.mxu0 %v10830_v31  ;;  %7934 = vmatpush1.bf16.msra.mxu1 %v10833_v32  ;;  %v12274_v31 = vmov 1   ;;  %v10923_v32 = vld [vmem:[#allocation5 + $0x1f80] ss:$48 sps:$4 sm:$0xff]  }
 0x14d   :  { %7677 = vmatprep.subr.bf16.mxu0 %v10838_v33  ;;  %7935 = vmatprep.subr.bf16.mxu1 %v10841_v34  ;;  %v10926_v33 = vld [vmem:[#allocation5 + $0x1f88] ss:$48 sps:$4 sm:$0xff]  }
 0x14e   :  { %10402 = vset.pattern.permute.xlu1 %v12274_v31  ;;  %v1228_v34 = vld [vmem:[%s12531_s3 + $0x8] sm:$0xff]  ;;  %s12275_s3 = smov [#allocation8]  }
 0x14f   :  { %1510 = vperm.xlu1 %10402, %v1227_v27   ;;  %1236 = vperm.xlu0 %10401, %v1228_v34   ;;  %v11010_v27 = vld [vmem:[#allocation5 + $0xd0] ss:$48 sps:$4 sm:$0xff]   ;;  %s9070_s28 = sshll.u32 %s12275_s3, 4  ;;  %s9071_s28 = int_to_ptr.vmem [resolvable:$true] %s9070_s28 }
 0x150   :  { %7678 = vmatpush1.bf16.msra.mxu0 %v10836_v35  ;;  %7936 = vmatpush1.bf16.msra.mxu1 %v10839_v36  ;;  %v10931_v35 = vld [vmem:[#allocation5 + $0x1fe4] ss:$48 sps:$4 sm:$0xff]   ;;  %v10934_v36 = vld [vmem:[#allocation5 + $0x1fec] ss:$48 sps:$4 sm:$0xff]   ;;  %s12240_s29 = scalar_lea.vmem %s9071_s28, 3072  ;;  %p12245_p11 = scmp.lt.s32.totalorder %s9071_s28, %s9071_s28 }
 0x151   :  { %7679 = vmatprep.subr.bf16.mxu0 %v10844_v37  ;;  %7937 = vmatprep.subr.bf16.mxu1 %v10847_v38  ;;  %v10929_v37 = vld [vmem:[#allocation5 + $0x1fe0] ss:$48 sps:$4 sm:$0xff]   ;;  %v10932_v38 = vld [vmem:[#allocation5 + $0x1fe8] ss:$48 sps:$4 sm:$0xff]   ;;  %p12241_p10 = scmp.ne.s32.totalorder %s9071_s28, %s12240_s29  ;;  %p12246_p12 = scmp.lt.s32.totalorder %s12240_s29, %s12240_s29 }
 0x153   :  { %1514 = vperm.xlu1 %10402, %v1228_v34   ;;  %10403 = vset.pattern.permute.xlu0 %v12274_v31  ;;  %v11016_v31 = vld [vmem:[#allocation5 + $0x130] ss:$48 sps:$4 sm:$0xff]   ;;  %v11027_v34 = vld [vmem:[#allocation5 + $0x19c] ss:$48 sps:$4 sm:$0xff]   ;;  %p12247_p13 = por %p12246_p12, %p12245_p11 }
 0x154   :  { %7680 = vmatpush1.bf16.msra.mxu0 %v10842_v39  ;;  %7938 = vmatpush1.bf16.msra.mxu1 %v10845_v40  ;;  %v10937_v39 = vld [vmem:[#allocation5 + $0x2044] ss:$48 sps:$4 sm:$0xff]   ;;  %v10940_v40 = vld [vmem:[#allocation5 + $0x204c] ss:$48 sps:$4 sm:$0xff]  }
 0x155   :  { %7681 = vmatprep.subr.bf16.mxu0 %v10850_v41  ;;  %7939 = vmatprep.subr.bf16.mxu1 %v10853_v42  ;;  %v10935_v41 = vld [vmem:[#allocation5 + $0x2040] ss:$48 sps:$4 sm:$0xff]   ;;  %v10938_v42 = vld [vmem:[#allocation5 + $0x2048] ss:$48 sps:$4 sm:$0xff]   ;;  %p12248_p0 = pnand %p12247_p13, %p12241_p10 }
 0x158   :  { %7682 = vmatpush1.bf16.msra.mxu0 %v10848_v43  ;;  %7940 = vmatpush1.bf16.msra.mxu1 %v10851_v44  ;;  %v10943_v43 = vld [vmem:[#allocation5 + $0x20a4] ss:$48 sps:$4 sm:$0xff]   ;;  %v10946_v44 = vld [vmem:[#allocation5 + $0x20ac] ss:$48 sps:$4 sm:$0xff]  }
 0x159   :  { %7683 = vmatprep.subr.bf16.mxu0 %v10856_v45  ;;  %7941 = vmatprep.subr.bf16.mxu1 %v10859_v46  ;;  %v10941_v45 = vld [vmem:[#allocation5 + $0x20a0] ss:$48 sps:$4 sm:$0xff]   ;;  %v10944_v46 = vld [vmem:[#allocation5 + $0x20a8] ss:$48 sps:$4 sm:$0xff]  }
 0x15c   :  { %7684 = vmatpush1.bf16.msra.mxu0 %v10854_v47  ;;  %7942 = vmatpush1.bf16.msra.mxu1 %v10857_v48  ;;  %v10949_v47 = vld [vmem:[#allocation5 + $0x2104] ss:$48 sps:$4 sm:$0xff]   ;;  %v10952_v48 = vld [vmem:[#allocation5 + $0x210c] ss:$48 sps:$4 sm:$0xff]  }
 0x15d   :  { %7685 = vmatprep.subr.bf16.mxu0 %v10862_v49  ;;  %7943 = vmatprep.subr.bf16.mxu1 %v10865_v50  ;;  %v10947_v49 = vld [vmem:[#allocation5 + $0x2100] ss:$48 sps:$4 sm:$0xff]   ;;  %v10950_v50 = vld [vmem:[#allocation5 + $0x2108] ss:$48 sps:$4 sm:$0xff]  }
 0x160   :  { %7686 = vmatpush1.bf16.msra.mxu0 %v10860_v51  ;;  %7944 = vmatpush1.bf16.msra.mxu1 %v10863_v52  ;;  %v10955_v51 = vld [vmem:[#allocation5 + $0x2164] ss:$48 sps:$4 sm:$0xff]   ;;  %v10958_v52 = vld [vmem:[#allocation5 + $0x216c] ss:$48 sps:$4 sm:$0xff]  }
 0x161   :  { %7687 = vmatprep.subr.bf16.mxu0 %v10868_v53  ;;  %7945 = vmatprep.subr.bf16.mxu1 %v10871_v54  ;;  %v10953_v53 = vld [vmem:[#allocation5 + $0x2160] ss:$48 sps:$4 sm:$0xff]   ;;  %v10956_v54 = vld [vmem:[#allocation5 + $0x2168] ss:$48 sps:$4 sm:$0xff]  }
 0x164   :  { %7688 = vmatpush1.bf16.msra.mxu0 %v10866_v55  ;;  %7946 = vmatpush1.bf16.msra.mxu1 %v10869_v56  ;;  %v10961_v55 = vld [vmem:[#allocation5 + $0x21c4] ss:$48 sps:$4 sm:$0xff]   ;;  %v10964_v56 = vld [vmem:[#allocation5 + $0x21cc] ss:$48 sps:$4 sm:$0xff]  }
 0x165   :  { %7689 = vmatprep.subr.bf16.mxu0 %v10874_v57  ;;  %7947 = vmatprep.subr.bf16.mxu1 %v10877_v58  ;;  %v10959_v57 = vld [vmem:[#allocation5 + $0x21c0] ss:$48 sps:$4 sm:$0xff]   ;;  %v10962_v58 = vld [vmem:[#allocation5 + $0x21c8] ss:$48 sps:$4 sm:$0xff]  }
 0x168   :  { %7690 = vmatpush1.bf16.msra.mxu0 %v10872_v59  ;;  %7948 = vmatpush1.bf16.msra.mxu1 %v10875_v60  ;;  %v10967_v59 = vld [vmem:[#allocation5 + $0x2224] ss:$48 sps:$4 sm:$0xff]   ;;  %v10970_v60 = vld [vmem:[#allocation5 + $0x222c] ss:$48 sps:$4 sm:$0xff]  }
 0x169   :  { %7691 = vmatprep.subr.bf16.mxu0 %v10880_v61  ;;  %7949 = vmatprep.subr.bf16.mxu1 %v10883_v62  ;;  %v10965_v61 = vld [vmem:[#allocation5 + $0x2220] ss:$48 sps:$4 sm:$0xff]   ;;  %v10968_v62 = vld [vmem:[#allocation5 + $0x2228] ss:$48 sps:$4 sm:$0xff]  }
 0x16c   :  { %7692 = vmatpush1.bf16.msra.mxu0 %v10878_v63  ;;  %7950 = vmatpush1.bf16.msra.mxu1 %v10881_v0  ;;  %v10973_v63 = vld [vmem:[#allocation5 + $0x2284] ss:$48 sps:$4 sm:$0xff]   ;;  %v10976_v0 = vld [vmem:[#allocation5 + $0x228c] ss:$48 sps:$4 sm:$0xff]  }
 0x16d   :  { %7693 = vmatprep.subr.bf16.mxu0 %v10886_v1  ;;  %7951 = vmatprep.subr.bf16.mxu1 %v10889_v2  ;;  %v10971_v1 = vld [vmem:[#allocation5 + $0x2280] ss:$48 sps:$4 sm:$0xff]   ;;  %v10974_v2 = vld [vmem:[#allocation5 + $0x2288] ss:$48 sps:$4 sm:$0xff]  }
 0x170   :  { %7694 = vmatpush1.bf16.msra.mxu0 %v10884_v3  ;;  %7952 = vmatpush1.bf16.msra.mxu1 %v10887_v4  ;;  %v10979_v3 = vld [vmem:[#allocation5 + $0x22e4] ss:$48 sps:$4 sm:$0xff]   ;;  %v10982_v4 = vld [vmem:[#allocation5 + $0x22ec] ss:$48 sps:$4 sm:$0xff]  }
 0x171   :  { %7695 = vmatprep.subr.bf16.mxu0 %v10892_v5  ;;  %7953 = vmatprep.subr.bf16.mxu1 %v10895_v6  ;;  %v10977_v5 = vld [vmem:[#allocation5 + $0x22e0] ss:$48 sps:$4 sm:$0xff]   ;;  %v10980_v6 = vld [vmem:[#allocation5 + $0x22e8] ss:$48 sps:$4 sm:$0xff]  }
 0x174   :  { %7696 = vmatpush1.bf16.msra.mxu0 %v10890_v7  ;;  %7954 = vmatpush1.bf16.msra.mxu1 %v10893_v8  ;;  %v10985_v7 = vld [vmem:[#allocation5 + $0x2344] ss:$48 sps:$4 sm:$0xff]   ;;  %v10988_v8 = vld [vmem:[#allocation5 + $0x234c] ss:$48 sps:$4 sm:$0xff]  }
 0x175   :  { %7708 = vmatprep.subr.bf16.mxu0 %v10900_v9  ;;  %7966 = vmatprep.subr.bf16.mxu1 %v10903_v10  ;;  %v10983_v9 = vld [vmem:[#allocation5 + $0x2340] ss:$48 sps:$4 sm:$0xff]   ;;  %v10986_v10 = vld [vmem:[#allocation5 + $0x2348] ss:$48 sps:$4 sm:$0xff]  }
 0x177   :  { %7698 = vmatmul.mubr.bf16.vlgmr.msra.gmra.mrb[0].mxu0 %v10904_v11  ;;  %7956 = vmatmul.mubr.bf16.vlgmr.msra.gmra.mrb[0].mxu1 %v10904_v11  ;;  %v10991_v11 = vld [vmem:[#allocation5 + $0x23a4] ss:$48 sps:$4 sm:$0xff]  }
 0x178   :  { %7709 = vmatpush1.bf16.msra.mxu0 %v10898_v12  ;;  %7967 = vmatpush1.bf16.msra.mxu1 %v10901_v13  ;;  %v10994_v12 = vld [vmem:[#allocation5 + $0x23ac] ss:$48 sps:$4 sm:$0xff]   ;;  %v10989_v13 = vld [vmem:[#allocation5 + $0x23a0] ss:$48 sps:$4 sm:$0xff]  }
 0x179   :  { %7710 = vmatprep.subr.bf16.mxu0 %v10907_v14  ;;  %7968 = vmatprep.subr.bf16.mxu1 %v10910_v15  ;;  %v10992_v14 = vld [vmem:[#allocation5 + $0x23a8] ss:$48 sps:$4 sm:$0xff]  }
 0x17a   :  { %7740 = vmatprep.mubr.bf16.mxu0 %v10995_v16  ;;  %7998 = vmatprep.mubr.bf16.mxu1 %v10995_v16  ;;  %v10997_v15 = vld [vmem:[#allocation2 + $0x28] ss:$48 sps:$4 sm:$0xff]   ;;  %v11000_v16 = vld [vmem:[#allocation5 + $0x14] ss:$48 sps:$4 sm:$0xff]  }
 0x17c   :  { %7711 = vmatpush1.bf16.msra.mxu0 %v10905_v17  ;;  %7969 = vmatpush1.bf16.msra.mxu1 %v10908_v18  ;;  %v11003_v17 = vld [vmem:[#allocation5 + $0x1c] ss:$48 sps:$4 sm:$0xff]   ;;  %v10998_v18 = vld [vmem:[#allocation5 + $0x10] ss:$48 sps:$4 sm:$0xff]  }
 0x17d   :  { %7712 = vmatprep.subr.bf16.mxu0 %v10913_v19  ;;  %7970 = vmatprep.subr.bf16.mxu1 %v10916_v20  ;;  %v11001_v19 = vld [vmem:[#allocation5 + $0x18] ss:$48 sps:$4 sm:$0xff]   ;;  %v11006_v20 = vld [vmem:[#allocation5 + $0x74] ss:$48 sps:$4 sm:$0xff]  }
 0x180   :  { %7713 = vmatpush1.bf16.msra.mxu0 %v10911_v21  ;;  %7971 = vmatpush1.bf16.msra.mxu1 %v10914_v22  ;;  %v11009_v21 = vld [vmem:[#allocation5 + $0x7c] ss:$48 sps:$4 sm:$0xff]   ;;  %v11004_v22 = vld [vmem:[#allocation5 + $0x70] ss:$48 sps:$4 sm:$0xff]  }
 0x181   :  { %7714 = vmatprep.subr.bf16.mxu0 %v10919_v23  ;;  %7972 = vmatprep.subr.bf16.mxu1 %v10922_v24  ;;  %v11007_v23 = vld [vmem:[#allocation5 + $0x78] ss:$48 sps:$4 sm:$0xff]   ;;  %v11012_v24 = vld [vmem:[#allocation5 + $0xd4] ss:$48 sps:$4 sm:$0xff]  }
 0x184   :  { %7715 = vmatpush1.bf16.msra.mxu0 %v10917_v25  ;;  %7973 = vmatpush1.bf16.msra.mxu1 %v10920_v26  ;;  %v11015_v25 = vld [vmem:[#allocation5 + $0xdc] ss:$48 sps:$4 sm:$0xff]   ;;  %v12150_v26 = vld [vmem:[#allocation2 + $0x4] ss:$48 sps:$4 sm:$0xff]  }
 0x185   :  { %7716 = vmatprep.subr.bf16.mxu0 %v10925_v28  ;;  %7974 = vmatprep.subr.bf16.mxu1 %v10928_v29  ;;  %v11013_v28 = vld [vmem:[#allocation5 + $0xd8] ss:$48 sps:$4 sm:$0xff]   ;;  %v11018_v29 = vld [vmem:[#allocation5 + $0x134] ss:$48 sps:$4 sm:$0xff]  }
 0x188   :  { %7717 = vmatpush1.bf16.msra.mxu0 %v10923_v32  ;;  %7975 = vmatpush1.bf16.msra.mxu1 %v10926_v33  ;;  %v11019_v32 = vld [vmem:[#allocation5 + $0x138] ss:$48 sps:$4 sm:$0xff]   ;;  %v11024_v33 = vld [vmem:[#allocation5 + $0x194] ss:$48 sps:$4 sm:$0xff]  }
 0x189   :  { %7718 = vmatprep.subr.bf16.mxu0 %v10931_v35  ;;  %7976 = vmatprep.subr.bf16.mxu1 %v10934_v36  ;;  %v11022_v35 = vld [vmem:[#allocation5 + $0x190] ss:$48 sps:$4 sm:$0xff]   ;;  %v11025_v36 = vld [vmem:[#allocation5 + $0x198] ss:$48 sps:$4 sm:$0xff]  }
 0x18c   :  { %7719 = vmatpush1.bf16.msra.mxu0 %v10929_v37  ;;  %7977 = vmatpush1.bf16.msra.mxu1 %v10932_v38  ;;  %v11030_v37 = vld [vmem:[#allocation5 + $0x1f4] ss:$48 sps:$4 sm:$0xff]   ;;  %v11033_v38 = vld [vmem:[#allocation5 + $0x1fc] ss:$48 sps:$4 sm:$0xff]  }
 0x18d   :  { %7720 = vmatprep.subr.bf16.mxu0 %v10937_v39  ;;  %7978 = vmatprep.subr.bf16.mxu1 %v10940_v40  ;;  %v11028_v39 = vld [vmem:[#allocation5 + $0x1f0] ss:$48 sps:$4 sm:$0xff]   ;;  %v11031_v40 = vld [vmem:[#allocation5 + $0x1f8] ss:$48 sps:$4 sm:$0xff]  }
 0x190   :  { %7721 = vmatpush1.bf16.msra.mxu0 %v10935_v41  ;;  %7979 = vmatpush1.bf16.msra.mxu1 %v10938_v42  ;;  %v11036_v41 = vld [vmem:[#allocation5 + $0x254] ss:$48 sps:$4 sm:$0xff]   ;;  %v11039_v42 = vld [vmem:[#allocation5 + $0x25c] ss:$48 sps:$4 sm:$0xff]  }
 0x191   :  { %7722 = vmatprep.subr.bf16.mxu0 %v10943_v43  ;;  %7980 = vmatprep.subr.bf16.mxu1 %v10946_v44  ;;  %v11034_v43 = vld [vmem:[#allocation5 + $0x250] ss:$48 sps:$4 sm:$0xff]   ;;  %v11037_v44 = vld [vmem:[#allocation5 + $0x258] ss:$48 sps:$4 sm:$0xff]  }
 0x194   :  { %7723 = vmatpush1.bf16.msra.mxu0 %v10941_v45  ;;  %7981 = vmatpush1.bf16.msra.mxu1 %v10944_v46  ;;  %v11042_v45 = vld [vmem:[#allocation5 + $0x2b4] ss:$48 sps:$4 sm:$0xff]   ;;  %v11045_v46 = vld [vmem:[#allocation5 + $0x2bc] ss:$48 sps:$4 sm:$0xff]  }
 0x195   :  { %7724 = vmatprep.subr.bf16.mxu0 %v10949_v47  ;;  %7982 = vmatprep.subr.bf16.mxu1 %v10952_v48  ;;  %v11040_v47 = vld [vmem:[#allocation5 + $0x2b0] ss:$48 sps:$4 sm:$0xff]   ;;  %v11043_v48 = vld [vmem:[#allocation5 + $0x2b8] ss:$48 sps:$4 sm:$0xff]  }
 0x198   :  { %7725 = vmatpush1.bf16.msra.mxu0 %v10947_v49  ;;  %7983 = vmatpush1.bf16.msra.mxu1 %v10950_v50  ;;  %v11048_v49 = vld [vmem:[#allocation5 + $0x314] ss:$48 sps:$4 sm:$0xff]   ;;  %v11051_v50 = vld [vmem:[#allocation5 + $0x31c] ss:$48 sps:$4 sm:$0xff]  }
 0x199   :  { %7726 = vmatprep.subr.bf16.mxu0 %v10955_v51  ;;  %7984 = vmatprep.subr.bf16.mxu1 %v10958_v52  ;;  %v11046_v51 = vld [vmem:[#allocation5 + $0x310] ss:$48 sps:$4 sm:$0xff]   ;;  %v11049_v52 = vld [vmem:[#allocation5 + $0x318] ss:$48 sps:$4 sm:$0xff]  }
 0x19c   :  { %7727 = vmatpush1.bf16.msra.mxu0 %v10953_v53  ;;  %7985 = vmatpush1.bf16.msra.mxu1 %v10956_v54  ;;  %v11054_v53 = vld [vmem:[#allocation5 + $0x374] ss:$48 sps:$4 sm:$0xff]   ;;  %v11057_v54 = vld [vmem:[#allocation5 + $0x37c] ss:$48 sps:$4 sm:$0xff]  }
 0x19d   :  { %7728 = vmatprep.subr.bf16.mxu0 %v10961_v55  ;;  %7986 = vmatprep.subr.bf16.mxu1 %v10964_v56  ;;  %v11052_v55 = vld [vmem:[#allocation5 + $0x370] ss:$48 sps:$4 sm:$0xff]   ;;  %v11055_v56 = vld [vmem:[#allocation5 + $0x378] ss:$48 sps:$4 sm:$0xff]  }
 0x1a0   :  { %7729 = vmatpush1.bf16.msra.mxu0 %v10959_v57  ;;  %7987 = vmatpush1.bf16.msra.mxu1 %v10962_v58  ;;  %v11060_v57 = vld [vmem:[#allocation5 + $0x3d4] ss:$48 sps:$4 sm:$0xff]   ;;  %v11063_v58 = vld [vmem:[#allocation5 + $0x3dc] ss:$48 sps:$4 sm:$0xff]  }
 0x1a1   :  { %7730 = vmatprep.subr.bf16.mxu0 %v10967_v59  ;;  %7988 = vmatprep.subr.bf16.mxu1 %v10970_v60  ;;  %v11058_v59 = vld [vmem:[#allocation5 + $0x3d0] ss:$48 sps:$4 sm:$0xff]   ;;  %v11061_v60 = vld [vmem:[#allocation5 + $0x3d8] ss:$48 sps:$4 sm:$0xff]  }
 0x1a4   :  { %7731 = vmatpush1.bf16.msra.mxu0 %v10965_v61  ;;  %7989 = vmatpush1.bf16.msra.mxu1 %v10968_v62  ;;  %v11066_v61 = vld [vmem:[#allocation5 + $0x434] ss:$48 sps:$4 sm:$0xff]   ;;  %v11069_v62 = vld [vmem:[#allocation5 + $0x43c] ss:$48 sps:$4 sm:$0xff]  }
 0x1a5   :  { %7732 = vmatprep.subr.bf16.mxu0 %v10973_v63  ;;  %7990 = vmatprep.subr.bf16.mxu1 %v10976_v0  ;;  %v11064_v63 = vld [vmem:[#allocation5 + $0x430] ss:$48 sps:$4 sm:$0xff]   ;;  %v11067_v0 = vld [vmem:[#allocation5 + $0x438] ss:$48 sps:$4 sm:$0xff]  }
 0x1a8   :  { %7733 = vmatpush1.bf16.msra.mxu0 %v10971_v1  ;;  %7991 = vmatpush1.bf16.msra.mxu1 %v10974_v2  ;;  %v11072_v1 = vld [vmem:[#allocation5 + $0x494] ss:$48 sps:$4 sm:$0xff]   ;;  %v11075_v2 = vld [vmem:[#allocation5 + $0x49c] ss:$48 sps:$4 sm:$0xff]  }
 0x1a9   :  { %7734 = vmatprep.subr.bf16.mxu0 %v10979_v3  ;;  %7992 = vmatprep.subr.bf16.mxu1 %v10982_v4  ;;  %v11070_v3 = vld [vmem:[#allocation5 + $0x490] ss:$48 sps:$4 sm:$0xff]   ;;  %v11073_v4 = vld [vmem:[#allocation5 + $0x498] ss:$48 sps:$4 sm:$0xff]  }
 0x1ac   :  { %7735 = vmatpush1.bf16.msra.mxu0 %v10977_v5  ;;  %7993 = vmatpush1.bf16.msra.mxu1 %v10980_v6  ;;  %v11078_v5 = vld [vmem:[#allocation5 + $0x4f4] ss:$48 sps:$4 sm:$0xff]   ;;  %v11081_v6 = vld [vmem:[#allocation5 + $0x4fc] ss:$48 sps:$4 sm:$0xff]  }
 0x1ad   :  { %7736 = vmatprep.subr.bf16.mxu0 %v10985_v7  ;;  %7994 = vmatprep.subr.bf16.mxu1 %v10988_v8  ;;  %v11076_v7 = vld [vmem:[#allocation5 + $0x4f0] ss:$48 sps:$4 sm:$0xff]   ;;  %v11079_v8 = vld [vmem:[#allocation5 + $0x4f8] ss:$48 sps:$4 sm:$0xff]  }
 0x1b0   :  { %7737 = vmatpush1.bf16.msra.mxu0 %v10983_v9  ;;  %7995 = vmatpush1.bf16.msra.mxu1 %v10986_v10  ;;  %v11084_v9 = vld [vmem:[#allocation5 + $0x554] ss:$48 sps:$4 sm:$0xff]   ;;  %v11087_v10 = vld [vmem:[#allocation5 + $0x55c] ss:$48 sps:$4 sm:$0xff]  }
 0x1b1   :  { %7738 = vmatprep.subr.bf16.mxu0 %v10991_v11  ;;  %7996 = vmatprep.subr.bf16.mxu1 %v10994_v12  ;;  %v11082_v11 = vld [vmem:[#allocation5 + $0x550] ss:$48 sps:$4 sm:$0xff]   ;;  %v11085_v12 = vld [vmem:[#allocation5 + $0x558] ss:$48 sps:$4 sm:$0xff]  }
 0x1b4   :  { %7739 = vmatpush1.bf16.msra.mxu0 %v10989_v13  ;;  %7997 = vmatpush1.bf16.msra.mxu1 %v10992_v14  ;;  %v11090_v13 = vld [vmem:[#allocation5 + $0x5b4] ss:$48 sps:$4 sm:$0xff]   ;;  %v11093_v14 = vld [vmem:[#allocation5 + $0x5bc] ss:$48 sps:$4 sm:$0xff]  }
 0x1b5   :  { %8009 = vmatprep.subr.bf16.mxu0 %v11000_v16  ;;  %8267 = vmatprep.subr.bf16.mxu1 %v11003_v17  ;;  %v11091_v16 = vld [vmem:[#allocation5 + $0x5b8] ss:$48 sps:$4 sm:$0xff]   ;;  %v11096_v17 = vld [vmem:[#allocation5 + $0x614] ss:$48 sps:$4 sm:$0xff]  }
 0x1b7   :  { %7741 = vmatmul.mubr.bf16.vlgmr.msra.gmra.mrb[0].mxu0 %v10997_v15  ;;  %7999 = vmatmul.mubr.bf16.vlgmr.msra.gmra.mrb[0].mxu1 %v10997_v15  ;;  %v11088_v15 = vld [vmem:[#allocation5 + $0x5b0] ss:$48 sps:$4 sm:$0xff]  }
 0x1b8   :  { %8010 = vmatpush1.bf16.msra.mxu0 %v10998_v18  ;;  %8268 = vmatpush1.bf16.msra.mxu1 %v11001_v19  ;;  %v11099_v18 = vld [vmem:[#allocation5 + $0x61c] ss:$48 sps:$4 sm:$0xff]   ;;  %v11094_v19 = vld [vmem:[#allocation5 + $0x610] ss:$48 sps:$4 sm:$0xff]  }
 0x1b9   :  { %8011 = vmatprep.subr.bf16.mxu0 %v11006_v20  ;;  %8269 = vmatprep.subr.bf16.mxu1 %v11009_v21  ;;  %v11097_v20 = vld [vmem:[#allocation5 + $0x618] ss:$48 sps:$4 sm:$0xff]   ;;  %v11102_v21 = vld [vmem:[#allocation5 + $0x674] ss:$48 sps:$4 sm:$0xff]  }
 0x1ba   :  { %8041 = vmatprep.mubr.bf16.mxu0 %v12150_v26  ;;  %8299 = vmatprep.mubr.bf16.mxu1 %v12150_v26  ;;  %v11108_v26 = vld [vmem:[#allocation5 + $0x6d4] ss:$48 sps:$4 sm:$0xff]  }
 0x1bc   :  { %8012 = vmatpush1.bf16.msra.mxu0 %v11004_v22  ;;  %8270 = vmatpush1.bf16.msra.mxu1 %v11007_v23  ;;  %v11105_v22 = vld [vmem:[#allocation5 + $0x67c] ss:$48 sps:$4 sm:$0xff]   ;;  %v12151_v23 = vld [vmem:[#allocation2] ss:$48 sps:$4 sm:$0xff]  }
 0x1bd   :  { %8013 = vmatprep.subr.bf16.mxu0 %v11012_v24  ;;  %8271 = vmatprep.subr.bf16.mxu1 %v11015_v25  ;;  %v11100_v24 = vld [vmem:[#allocation5 + $0x670] ss:$48 sps:$4 sm:$0xff]   ;;  %v11103_v25 = vld [vmem:[#allocation5 + $0x678] ss:$48 sps:$4 sm:$0xff]  }
 0x1c0   :  { %8014 = vmatpush1.bf16.msra.mxu0 %v11010_v27  ;;  %8272 = vmatpush1.bf16.msra.mxu1 %v11013_v28  ;;  %v11111_v27 = vld [vmem:[#allocation5 + $0x6dc] ss:$48 sps:$4 sm:$0xff]  }
 0x1c1   :  { %8015 = vmatprep.subr.bf16.mxu0 %v11018_v29  ;;  %8273 = vmatprep.subr.bf16.mxu1 %v11021_v30  ;;  %v12152_v28 = vld [vmem:[#allocation2 + $0xc] ss:$48 sps:$4 sm:$0xff]   ;;  %v11106_v29 = vld [vmem:[#allocation5 + $0x6d0] ss:$48 sps:$4 sm:$0xff]   ;;  %v11109_v30 = vld [vmem:[#allocation5 + $0x6d8] ss:$48 sps:$4 sm:$0xff]  }
 0x1c4   :  { %8016 = vmatpush1.bf16.msra.mxu0 %v11016_v31  ;;  %8274 = vmatpush1.bf16.msra.mxu1 %v11019_v32  ;;  %v11114_v31 = vld [vmem:[#allocation5 + $0x734] ss:$48 sps:$4 sm:$0xff]   ;;  %v11117_v32 = vld [vmem:[#allocation5 + $0x73c] ss:$48 sps:$4 sm:$0xff]  }
 0x1c5   :  { %8017 = vmatprep.subr.bf16.mxu0 %v11024_v33  ;;  %8275 = vmatprep.subr.bf16.mxu1 %v11027_v34  ;;  %v11112_v33 = vld [vmem:[#allocation5 + $0x730] ss:$48 sps:$4 sm:$0xff]   ;;  %v11115_v34 = vld [vmem:[#allocation5 + $0x738] ss:$48 sps:$4 sm:$0xff]  }
 0x1c8   :  { %8018 = vmatpush1.bf16.msra.mxu0 %v11022_v35  ;;  %8276 = vmatpush1.bf16.msra.mxu1 %v11025_v36  ;;  %v11120_v35 = vld [vmem:[#allocation5 + $0x794] ss:$48 sps:$4 sm:$0xff]   ;;  %v11123_v36 = vld [vmem:[#allocation5 + $0x79c] ss:$48 sps:$4 sm:$0xff]  }
 0x1c9   :  { %8019 = vmatprep.subr.bf16.mxu0 %v11030_v37  ;;  %8277 = vmatprep.subr.bf16.mxu1 %v11033_v38  ;;  %v11118_v37 = vld [vmem:[#allocation5 + $0x790] ss:$48 sps:$4 sm:$0xff]   ;;  %v11121_v38 = vld [vmem:[#allocation5 + $0x798] ss:$48 sps:$4 sm:$0xff]  }
 0x1cc   :  { %8020 = vmatpush1.bf16.msra.mxu0 %v11028_v39  ;;  %8278 = vmatpush1.bf16.msra.mxu1 %v11031_v40  ;;  %v11126_v39 = vld [vmem:[#allocation5 + $0x7f4] ss:$48 sps:$4 sm:$0xff]   ;;  %v11129_v40 = vld [vmem:[#allocation5 + $0x7fc] ss:$48 sps:$4 sm:$0xff]  }
 0x1cd   :  { %8021 = vmatprep.subr.bf16.mxu0 %v11036_v41  ;;  %8279 = vmatprep.subr.bf16.mxu1 %v11039_v42  ;;  %v11124_v41 = vld [vmem:[#allocation5 + $0x7f0] ss:$48 sps:$4 sm:$0xff]   ;;  %v11127_v42 = vld [vmem:[#allocation5 + $0x7f8] ss:$48 sps:$4 sm:$0xff]  }
 0x1d0   :  { %8022 = vmatpush1.bf16.msra.mxu0 %v11034_v43  ;;  %8280 = vmatpush1.bf16.msra.mxu1 %v11037_v44  ;;  %v11132_v43 = vld [vmem:[#allocation5 + $0x854] ss:$48 sps:$4 sm:$0xff]   ;;  %v11135_v44 = vld [vmem:[#allocation5 + $0x85c] ss:$48 sps:$4 sm:$0xff]  }
 0x1d1   :  { %8023 = vmatprep.subr.bf16.mxu0 %v11042_v45  ;;  %8281 = vmatprep.subr.bf16.mxu1 %v11045_v46  ;;  %v11130_v45 = vld [vmem:[#allocation5 + $0x850] ss:$48 sps:$4 sm:$0xff]   ;;  %v11133_v46 = vld [vmem:[#allocation5 + $0x858] ss:$48 sps:$4 sm:$0xff]  }
 0x1d4   :  { %8024 = vmatpush1.bf16.msra.mxu0 %v11040_v47  ;;  %8282 = vmatpush1.bf16.msra.mxu1 %v11043_v48  ;;  %v11138_v47 = vld [vmem:[#allocation5 + $0x8b4] ss:$48 sps:$4 sm:$0xff]   ;;  %v11141_v48 = vld [vmem:[#allocation5 + $0x8bc] ss:$48 sps:$4 sm:$0xff]  }
 0x1d5   :  { %8025 = vmatprep.subr.bf16.mxu0 %v11048_v49  ;;  %8283 = vmatprep.subr.bf16.mxu1 %v11051_v50  ;;  %v11136_v49 = vld [vmem:[#allocation5 + $0x8b0] ss:$48 sps:$4 sm:$0xff]   ;;  %v11139_v50 = vld [vmem:[#allocation5 + $0x8b8] ss:$48 sps:$4 sm:$0xff]  }
 0x1d8   :  { %8026 = vmatpush1.bf16.msra.mxu0 %v11046_v51  ;;  %8284 = vmatpush1.bf16.msra.mxu1 %v11049_v52  ;;  %v11144_v51 = vld [vmem:[#allocation5 + $0x914] ss:$48 sps:$4 sm:$0xff]   ;;  %v11147_v52 = vld [vmem:[#allocation5 + $0x91c] ss:$48 sps:$4 sm:$0xff]  }
 0x1d9   :  { %8027 = vmatprep.subr.bf16.mxu0 %v11054_v53  ;;  %8285 = vmatprep.subr.bf16.mxu1 %v11057_v54  ;;  %v11142_v53 = vld [vmem:[#allocation5 + $0x910] ss:$48 sps:$4 sm:$0xff]   ;;  %v11145_v54 = vld [vmem:[#allocation5 + $0x918] ss:$48 sps:$4 sm:$0xff]  }
 0x1dc   :  { %8028 = vmatpush1.bf16.msra.mxu0 %v11052_v55  ;;  %8286 = vmatpush1.bf16.msra.mxu1 %v11055_v56  ;;  %v11150_v55 = vld [vmem:[#allocation5 + $0x974] ss:$48 sps:$4 sm:$0xff]   ;;  %v11153_v56 = vld [vmem:[#allocation5 + $0x97c] ss:$48 sps:$4 sm:$0xff]  }
 0x1dd   :  { %8029 = vmatprep.subr.bf16.mxu0 %v11060_v57  ;;  %8287 = vmatprep.subr.bf16.mxu1 %v11063_v58  ;;  %v11148_v57 = vld [vmem:[#allocation5 + $0x970] ss:$48 sps:$4 sm:$0xff]   ;;  %v11151_v58 = vld [vmem:[#allocation5 + $0x978] ss:$48 sps:$4 sm:$0xff]  }
 0x1e0   :  { %8030 = vmatpush1.bf16.msra.mxu0 %v11058_v59  ;;  %8288 = vmatpush1.bf16.msra.mxu1 %v11061_v60  ;;  %v11156_v59 = vld [vmem:[#allocation5 + $0x9d4] ss:$48 sps:$4 sm:$0xff]   ;;  %v11159_v60 = vld [vmem:[#allocation5 + $0x9dc] ss:$48 sps:$4 sm:$0xff]  }
 0x1e1   :  { %8031 = vmatprep.subr.bf16.mxu0 %v11066_v61  ;;  %8289 = vmatprep.subr.bf16.mxu1 %v11069_v62  ;;  %v11154_v61 = vld [vmem:[#allocation5 + $0x9d0] ss:$48 sps:$4 sm:$0xff]   ;;  %v11157_v62 = vld [vmem:[#allocation5 + $0x9d8] ss:$48 sps:$4 sm:$0xff]  }
 0x1e4   :  { %8032 = vmatpush1.bf16.msra.mxu0 %v11064_v63  ;;  %8290 = vmatpush1.bf16.msra.mxu1 %v11067_v0  ;;  %v11162_v63 = vld [vmem:[#allocation5 + $0xa34] ss:$48 sps:$4 sm:$0xff]   ;;  %v11165_v0 = vld [vmem:[#allocation5 + $0xa3c] ss:$48 sps:$4 sm:$0xff]  }
 0x1e5   :  { %8033 = vmatprep.subr.bf16.mxu0 %v11072_v1  ;;  %8291 = vmatprep.subr.bf16.mxu1 %v11075_v2  ;;  %v11160_v1 = vld [vmem:[#allocation5 + $0xa30] ss:$48 sps:$4 sm:$0xff]   ;;  %v11163_v2 = vld [vmem:[#allocation5 + $0xa38] ss:$48 sps:$4 sm:$0xff]  }
 0x1e8   :  { %8034 = vmatpush1.bf16.msra.mxu0 %v11070_v3  ;;  %8292 = vmatpush1.bf16.msra.mxu1 %v11073_v4  ;;  %v11168_v3 = vld [vmem:[#allocation5 + $0xa94] ss:$48 sps:$4 sm:$0xff]   ;;  %v11171_v4 = vld [vmem:[#allocation5 + $0xa9c] ss:$48 sps:$4 sm:$0xff]  }
 0x1e9   :  { %8035 = vmatprep.subr.bf16.mxu0 %v11078_v5  ;;  %8293 = vmatprep.subr.bf16.mxu1 %v11081_v6  ;;  %v11166_v5 = vld [vmem:[#allocation5 + $0xa90] ss:$48 sps:$4 sm:$0xff]   ;;  %v11169_v6 = vld [vmem:[#allocation5 + $0xa98] ss:$48 sps:$4 sm:$0xff]  }
 0x1ec   :  { %8036 = vmatpush1.bf16.msra.mxu0 %v11076_v7  ;;  %8294 = vmatpush1.bf16.msra.mxu1 %v11079_v8  ;;  %v11174_v7 = vld [vmem:[#allocation5 + $0xaf4] ss:$48 sps:$4 sm:$0xff]   ;;  %v11177_v8 = vld [vmem:[#allocation5 + $0xafc] ss:$48 sps:$4 sm:$0xff]  }
 0x1ed   :  { %8037 = vmatprep.subr.bf16.mxu0 %v11084_v9  ;;  %8295 = vmatprep.subr.bf16.mxu1 %v11087_v10  ;;  %v11172_v9 = vld [vmem:[#allocation5 + $0xaf0] ss:$48 sps:$4 sm:$0xff]   ;;  %v11175_v10 = vld [vmem:[#allocation5 + $0xaf8] ss:$48 sps:$4 sm:$0xff]  }
 0x1f0   :  { %8038 = vmatpush1.bf16.msra.mxu0 %v11082_v11  ;;  %8296 = vmatpush1.bf16.msra.mxu1 %v11085_v12  ;;  %v11180_v11 = vld [vmem:[#allocation5 + $0xb54] ss:$48 sps:$4 sm:$0xff]   ;;  %v11183_v12 = vld [vmem:[#allocation5 + $0xb5c] ss:$48 sps:$4 sm:$0xff]  }
 0x1f1   :  { %8039 = vmatprep.subr.bf16.mxu0 %v11090_v13  ;;  %8297 = vmatprep.subr.bf16.mxu1 %v11093_v14  ;;  %v11178_v13 = vld [vmem:[#allocation5 + $0xb50] ss:$48 sps:$4 sm:$0xff]   ;;  %v11181_v14 = vld [vmem:[#allocation5 + $0xb58] ss:$48 sps:$4 sm:$0xff]  }
 0x1f4   :  { %8040 = vmatpush1.bf16.msra.mxu0 %v11088_v15  ;;  %8298 = vmatpush1.bf16.msra.mxu1 %v11091_v16  ;;  %v11186_v15 = vld [vmem:[#allocation5 + $0xbb4] ss:$48 sps:$4 sm:$0xff]   ;;  %v11189_v16 = vld [vmem:[#allocation5 + $0xbbc] ss:$48 sps:$4 sm:$0xff]  }
 0x1f5   :  { %8052 = vmatprep.subr.bf16.mxu0 %v11096_v17  ;;  %8310 = vmatprep.subr.bf16.mxu1 %v11099_v18  ;;  %v11184_v17 = vld [vmem:[#allocation5 + $0xbb0] ss:$48 sps:$4 sm:$0xff]   ;;  %v11187_v18 = vld [vmem:[#allocation5 + $0xbb8] ss:$48 sps:$4 sm:$0xff]  }
 0x1f7   :  { %8042 = vmatmul.mubr.bf16.vlgmr.msra.gmra.mrb[4].mxu0 %v12151_v23  ;;  %8300 = vmatmul.mubr.bf16.vlgmr.msra.gmra.mrb[4].mxu1 %v12151_v23  ;;  %v11198_v23 = vld [vmem:[#allocation5 + $0xc74] ss:$48 sps:$4 sm:$0xff]  }
 0x1f8   :  { %8053 = vmatpush1.bf16.msra.mxu0 %v11094_v19  ;;  %8311 = vmatpush1.bf16.msra.mxu1 %v11097_v20  ;;  %v11192_v19 = vld [vmem:[#allocation5 + $0xc14] ss:$48 sps:$4 sm:$0xff]   ;;  %v11195_v20 = vld [vmem:[#allocation5 + $0xc1c] ss:$48 sps:$4 sm:$0xff]  }
 0x1f9   :  { %8054 = vmatprep.subr.bf16.mxu0 %v11102_v21  ;;  %8312 = vmatprep.subr.bf16.mxu1 %v11105_v22  ;;  %v11190_v21 = vld [vmem:[#allocation5 + $0xc10] ss:$48 sps:$4 sm:$0xff]   ;;  %v11193_v22 = vld [vmem:[#allocation5 + $0xc18] ss:$48 sps:$4 sm:$0xff]  }
 0x1fa   :  { %8084 = vmatprep.mubr.bf16.mxu0 %v12152_v28  ;;  %8342 = vmatprep.mubr.bf16.mxu1 %v12152_v28  ;;  %v11204_v28 = vld [vmem:[#allocation5 + $0xcd4] ss:$48 sps:$4 sm:$0xff]  }
 0x1fc   :  { %8055 = vmatpush1.bf16.msra.mxu0 %v11100_v24  ;;  %8313 = vmatpush1.bf16.msra.mxu1 %v11103_v25  ;;  %v11201_v24 = vld [vmem:[#allocation5 + $0xc7c] ss:$48 sps:$4 sm:$0xff]   ;;  %v12153_v25 = vld [vmem:[#allocation2 + $0x8] ss:$48 sps:$4 sm:$0xff]  }
 0x1fd   :  { %8056 = vmatprep.subr.bf16.mxu0 %v11108_v26  ;;  %8314 = vmatprep.subr.bf16.mxu1 %v11111_v27  ;;  %v11196_v26 = vld [vmem:[#allocation5 + $0xc70] ss:$48 sps:$4 sm:$0xff]   ;;  %v11199_v27 = vld [vmem:[#allocation5 + $0xc78] ss:$48 sps:$4 sm:$0xff]  }
 0x200   :  { %8057 = vmatpush1.bf16.msra.mxu0 %v11106_v29  ;;  %8315 = vmatpush1.bf16.msra.mxu1 %v11109_v30  ;;  %v11207_v29 = vld [vmem:[#allocation5 + $0xcdc] ss:$48 sps:$4 sm:$0xff]   ;;  %v12154_v30 = vld [vmem:[#allocation2 + $0x14] ss:$48 sps:$4 sm:$0xff]  }
 0x201   :  { %8058 = vmatprep.subr.bf16.mxu0 %v11114_v31  ;;  %8316 = vmatprep.subr.bf16.mxu1 %v11117_v32  ;;  %v11202_v31 = vld [vmem:[#allocation5 + $0xcd0] ss:$48 sps:$4 sm:$0xff]   ;;  %v11205_v32 = vld [vmem:[#allocation5 + $0xcd8] ss:$48 sps:$4 sm:$0xff]  }
 0x204   :  { %8059 = vmatpush1.bf16.msra.mxu0 %v11112_v33  ;;  %8317 = vmatpush1.bf16.msra.mxu1 %v11115_v34  ;;  %v11210_v33 = vld [vmem:[#allocation5 + $0xd34] ss:$48 sps:$4 sm:$0xff]   ;;  %v11213_v34 = vld [vmem:[#allocation5 + $0xd3c] ss:$48 sps:$4 sm:$0xff]  }
 0x205   :  { %8060 = vmatprep.subr.bf16.mxu0 %v11120_v35  ;;  %8318 = vmatprep.subr.bf16.mxu1 %v11123_v36  ;;  %v11208_v35 = vld [vmem:[#allocation5 + $0xd30] ss:$48 sps:$4 sm:$0xff]   ;;  %v11211_v36 = vld [vmem:[#allocation5 + $0xd38] ss:$48 sps:$4 sm:$0xff]  }
 0x208   :  { %8061 = vmatpush1.bf16.msra.mxu0 %v11118_v37  ;;  %8319 = vmatpush1.bf16.msra.mxu1 %v11121_v38  ;;  %v11216_v37 = vld [vmem:[#allocation5 + $0xd94] ss:$48 sps:$4 sm:$0xff]   ;;  %v11219_v38 = vld [vmem:[#allocation5 + $0xd9c] ss:$48 sps:$4 sm:$0xff]  }
 0x209   :  { %8062 = vmatprep.subr.bf16.mxu0 %v11126_v39  ;;  %8320 = vmatprep.subr.bf16.mxu1 %v11129_v40  ;;  %v11214_v39 = vld [vmem:[#allocation5 + $0xd90] ss:$48 sps:$4 sm:$0xff]   ;;  %v11217_v40 = vld [vmem:[#allocation5 + $0xd98] ss:$48 sps:$4 sm:$0xff]  }
 0x20c   :  { %8063 = vmatpush1.bf16.msra.mxu0 %v11124_v41  ;;  %8321 = vmatpush1.bf16.msra.mxu1 %v11127_v42  ;;  %v11222_v41 = vld [vmem:[#allocation5 + $0xdf4] ss:$48 sps:$4 sm:$0xff]   ;;  %v11225_v42 = vld [vmem:[#allocation5 + $0xdfc] ss:$48 sps:$4 sm:$0xff]  }
 0x20d   :  { %8064 = vmatprep.subr.bf16.mxu0 %v11132_v43  ;;  %8322 = vmatprep.subr.bf16.mxu1 %v11135_v44  ;;  %v11220_v43 = vld [vmem:[#allocation5 + $0xdf0] ss:$48 sps:$4 sm:$0xff]   ;;  %v11223_v44 = vld [vmem:[#allocation5 + $0xdf8] ss:$48 sps:$4 sm:$0xff]  }
 0x210   :  { %8065 = vmatpush1.bf16.msra.mxu0 %v11130_v45  ;;  %8323 = vmatpush1.bf16.msra.mxu1 %v11133_v46  ;;  %v11228_v45 = vld [vmem:[#allocation5 + $0xe54] ss:$48 sps:$4 sm:$0xff]   ;;  %v11231_v46 = vld [vmem:[#allocation5 + $0xe5c] ss:$48 sps:$4 sm:$0xff]  }
 0x211   :  { %8066 = vmatprep.subr.bf16.mxu0 %v11138_v47  ;;  %8324 = vmatprep.subr.bf16.mxu1 %v11141_v48  ;;  %v11226_v47 = vld [vmem:[#allocation5 + $0xe50] ss:$48 sps:$4 sm:$0xff]   ;;  %v11229_v48 = vld [vmem:[#allocation5 + $0xe58] ss:$48 sps:$4 sm:$0xff]  }
 0x214   :  { %8067 = vmatpush1.bf16.msra.mxu0 %v11136_v49  ;;  %8325 = vmatpush1.bf16.msra.mxu1 %v11139_v50  ;;  %v11234_v49 = vld [vmem:[#allocation5 + $0xeb4] ss:$48 sps:$4 sm:$0xff]   ;;  %v11237_v50 = vld [vmem:[#allocation5 + $0xebc] ss:$48 sps:$4 sm:$0xff]  }
 0x215   :  { %8068 = vmatprep.subr.bf16.mxu0 %v11144_v51  ;;  %8326 = vmatprep.subr.bf16.mxu1 %v11147_v52  ;;  %v11232_v51 = vld [vmem:[#allocation5 + $0xeb0] ss:$48 sps:$4 sm:$0xff]   ;;  %v11235_v52 = vld [vmem:[#allocation5 + $0xeb8] ss:$48 sps:$4 sm:$0xff]  }
 0x218   :  { %8069 = vmatpush1.bf16.msra.mxu0 %v11142_v53  ;;  %8327 = vmatpush1.bf16.msra.mxu1 %v11145_v54  ;;  %v11240_v53 = vld [vmem:[#allocation5 + $0xf14] ss:$48 sps:$4 sm:$0xff]   ;;  %v11243_v54 = vld [vmem:[#allocation5 + $0xf1c] ss:$48 sps:$4 sm:$0xff]  }
 0x219   :  { %8070 = vmatprep.subr.bf16.mxu0 %v11150_v55  ;;  %8328 = vmatprep.subr.bf16.mxu1 %v11153_v56  ;;  %v11238_v55 = vld [vmem:[#allocation5 + $0xf10] ss:$48 sps:$4 sm:$0xff]   ;;  %v11241_v56 = vld [vmem:[#allocation5 + $0xf18] ss:$48 sps:$4 sm:$0xff]  }
 0x21c   :  { %8071 = vmatpush1.bf16.msra.mxu0 %v11148_v57  ;;  %8329 = vmatpush1.bf16.msra.mxu1 %v11151_v58  ;;  %v11246_v57 = vld [vmem:[#allocation5 + $0xf74] ss:$48 sps:$4 sm:$0xff]   ;;  %v11249_v58 = vld [vmem:[#allocation5 + $0xf7c] ss:$48 sps:$4 sm:$0xff]  }
 0x21d   :  { %8072 = vmatprep.subr.bf16.mxu0 %v11156_v59  ;;  %8330 = vmatprep.subr.bf16.mxu1 %v11159_v60  ;;  %v11244_v59 = vld [vmem:[#allocation5 + $0xf70] ss:$48 sps:$4 sm:$0xff]   ;;  %v11247_v60 = vld [vmem:[#allocation5 + $0xf78] ss:$48 sps:$4 sm:$0xff]  }
 0x220   :  { %8073 = vmatpush1.bf16.msra.mxu0 %v11154_v61  ;;  %8331 = vmatpush1.bf16.msra.mxu1 %v11157_v62  ;;  %v11252_v61 = vld [vmem:[#allocation5 + $0xfd4] ss:$48 sps:$4 sm:$0xff]   ;;  %v11255_v62 = vld [vmem:[#allocation5 + $0xfdc] ss:$48 sps:$4 sm:$0xff]  }
 0x221   :  { %8074 = vmatprep.subr.bf16.mxu0 %v11162_v63  ;;  %8332 = vmatprep.subr.bf16.mxu1 %v11165_v0  ;;  %v11250_v63 = vld [vmem:[#allocation5 + $0xfd0] ss:$48 sps:$4 sm:$0xff]   ;;  %v11253_v0 = vld [vmem:[#allocation5 + $0xfd8] ss:$48 sps:$4 sm:$0xff]  }
 0x224   :  { %8075 = vmatpush1.bf16.msra.mxu0 %v11160_v1  ;;  %8333 = vmatpush1.bf16.msra.mxu1 %v11163_v2  ;;  %v11258_v1 = vld [vmem:[#allocation5 + $0x1034] ss:$48 sps:$4 sm:$0xff]   ;;  %v11261_v2 = vld [vmem:[#allocation5 + $0x103c] ss:$48 sps:$4 sm:$0xff]  }
 0x225   :  { %8076 = vmatprep.subr.bf16.mxu0 %v11168_v3  ;;  %8334 = vmatprep.subr.bf16.mxu1 %v11171_v4  ;;  %v11256_v3 = vld [vmem:[#allocation5 + $0x1030] ss:$48 sps:$4 sm:$0xff]   ;;  %v11259_v4 = vld [vmem:[#allocation5 + $0x1038] ss:$48 sps:$4 sm:$0xff]  }
 0x228   :  { %8077 = vmatpush1.bf16.msra.mxu0 %v11166_v5  ;;  %8335 = vmatpush1.bf16.msra.mxu1 %v11169_v6  ;;  %v11264_v5 = vld [vmem:[#allocation5 + $0x1094] ss:$48 sps:$4 sm:$0xff]   ;;  %v11267_v6 = vld [vmem:[#allocation5 + $0x109c] ss:$48 sps:$4 sm:$0xff]  }
 0x229   :  { %8078 = vmatprep.subr.bf16.mxu0 %v11174_v7  ;;  %8336 = vmatprep.subr.bf16.mxu1 %v11177_v8  ;;  %v11262_v7 = vld [vmem:[#allocation5 + $0x1090] ss:$48 sps:$4 sm:$0xff]   ;;  %v11265_v8 = vld [vmem:[#allocation5 + $0x1098] ss:$48 sps:$4 sm:$0xff]  }
 0x22c   :  { %8079 = vmatpush1.bf16.msra.mxu0 %v11172_v9  ;;  %8337 = vmatpush1.bf16.msra.mxu1 %v11175_v10  ;;  %v11270_v9 = vld [vmem:[#allocation5 + $0x10f4] ss:$48 sps:$4 sm:$0xff]   ;;  %v11273_v10 = vld [vmem:[#allocation5 + $0x10fc] ss:$48 sps:$4 sm:$0xff]  }
 0x22d   :  { %8080 = vmatprep.subr.bf16.mxu0 %v11180_v11  ;;  %8338 = vmatprep.subr.bf16.mxu1 %v11183_v12  ;;  %v11268_v11 = vld [vmem:[#allocation5 + $0x10f0] ss:$48 sps:$4 sm:$0xff]   ;;  %v11271_v12 = vld [vmem:[#allocation5 + $0x10f8] ss:$48 sps:$4 sm:$0xff]  }
 0x230   :  { %8081 = vmatpush1.bf16.msra.mxu0 %v11178_v13  ;;  %8339 = vmatpush1.bf16.msra.mxu1 %v11181_v14  ;;  %v11276_v13 = vld [vmem:[#allocation5 + $0x1154] ss:$48 sps:$4 sm:$0xff]   ;;  %v11279_v14 = vld [vmem:[#allocation5 + $0x115c] ss:$48 sps:$4 sm:$0xff]  }
 0x231   :  { %8082 = vmatprep.subr.bf16.mxu0 %v11186_v15  ;;  %8340 = vmatprep.subr.bf16.mxu1 %v11189_v16  ;;  %v1245_v15 = vlaneseq  ;;  %v11274_v16 = vld [vmem:[#allocation5 + $0x1150] ss:$48 sps:$4 sm:$0xff]  }
 0x234   :  { %8083 = vmatpush1.bf16.msra.mxu0 %v11184_v17  ;;  %8341 = vmatpush1.bf16.msra.mxu1 %v11187_v18  ;;  %v11277_v17 = vld [vmem:[#allocation5 + $0x1158] ss:$48 sps:$4 sm:$0xff]   ;;  %v11282_v18 = vld [vmem:[#allocation5 + $0x11b4] ss:$48 sps:$4 sm:$0xff]  }
 0x235   :  { %8095 = vmatprep.subr.bf16.mxu0 %v11192_v19  ;;  %8353 = vmatprep.subr.bf16.mxu1 %v11195_v20  ;;  %v11285_v19 = vld [vmem:[#allocation5 + $0x11bc] ss:$48 sps:$4 sm:$0xff]   ;;  %v1246_v20 = vshrl.u32 %v1245_v15, 7 }
 0x237   :  { %8085 = vmatmul.mubr.bf16.vlgmr.msra.gmra.mrb[4].mxu0 %v12153_v25  ;;  %8343 = vmatmul.mubr.bf16.vlgmr.msra.gmra.mrb[4].mxu1 %v12153_v25  ;;  %v12352_v25 = vld [vmem:[#allocation7] sm:$0x77] }
 0x238   :  { %8096 = vmatpush1.bf16.msra.mxu0 %v11190_v21  ;;  %8354 = vmatpush1.bf16.msra.mxu1 %v11193_v22  ;;  %v11280_v21 = vld [vmem:[#allocation5 + $0x11b0] ss:$48 sps:$4 sm:$0xff]   ;;  %v11283_v22 = vld [vmem:[#allocation5 + $0x11b8] ss:$48 sps:$4 sm:$0xff]  }
 0x239   :  { %8097 = vmatprep.subr.bf16.mxu0 %v11198_v23  ;;  %8355 = vmatprep.subr.bf16.mxu1 %v11201_v24  ;;  %v11288_v23 = vld [vmem:[#allocation5 + $0x1214] ss:$48 sps:$4 sm:$0xff]   ;;  %v11291_v24 = vld [vmem:[#allocation5 + $0x121c] ss:$48 sps:$4 sm:$0xff]  }
 0x23a   :  { %8127 = vmatprep.mubr.bf16.mxu0 %v12154_v30  ;;  %8385 = vmatprep.mubr.bf16.mxu1 %v12154_v30  ;;  %v12358_v30 = vld [vmem:[#allocation7 + $0x8] sm:$0x77] }
 0x23c   :  { %8098 = vmatpush1.bf16.msra.mxu0 %v11196_v26  ;;  %8356 = vmatpush1.bf16.msra.mxu1 %v11199_v27  ;;  %v12354_v26 = vsub.s32 0, %v1246_v20  ;;  %v11286_v27 = vld [vmem:[#allocation5 + $0x1210] ss:$48 sps:$4 sm:$0xff]  }
 0x23d   :  { %8099 = vmatprep.subr.bf16.mxu0 %v11204_v28  ;;  %8357 = vmatprep.subr.bf16.mxu1 %v11207_v29  ;;  %v12356_v28 = vsub.s32 4, %v1246_v20  ;;  %v11289_v29 = vld [vmem:[#allocation5 + $0x1218] ss:$48 sps:$4 sm:$0xff]  }
 0x240   :  { %8100 = vmatpush1.bf16.msra.mxu0 %v11202_v31  ;;  %8358 = vmatpush1.bf16.msra.mxu1 %v11205_v32  ;;  %v11294_v31 = vld [vmem:[#allocation5 + $0x1274] ss:$48 sps:$4 sm:$0xff]   ;;  %v11297_v32 = vld [vmem:[#allocation5 + $0x127c] ss:$48 sps:$4 sm:$0xff]  }
 0x241   :  { %8101 = vmatprep.subr.bf16.mxu0 %v11210_v33  ;;  %8359 = vmatprep.subr.bf16.mxu1 %v11213_v34  ;;  %v1248_v33 = vrot.slane %v12352_v25, %v12354_v26  ;;  %v12362_v34 = vsub.s32 1, %v1246_v20 }
 0x244   :  { %8102 = vmatpush1.bf16.msra.mxu0 %v11208_v35  ;;  %8360 = vmatpush1.bf16.msra.mxu1 %v11211_v36  ;;  %v12364_v35 = vsub.s32 2, %v1246_v20  ;;  %v12155_v36 = vld [vmem:[#allocation2 + $0x10] ss:$48 sps:$4 sm:$0xff]  }
 0x245   :  { %8103 = vmatprep.subr.bf16.mxu0 %v11216_v37  ;;  %8361 = vmatprep.subr.bf16.mxu1 %v11219_v38  ;;  %v1256_v37 = vrot.slane %v12358_v30, %v12354_v26  ;;  %v1252_v38 = vrot.slane %v12352_v25, %v12356_v28 }
 0x248   :  { %8104 = vmatpush1.bf16.msra.mxu0 %v11214_v39  ;;  %8362 = vmatpush1.bf16.msra.mxu1 %v11217_v40  ;;  %v12370_v39 = vsub.s32 5, %v1246_v20  ;;  %v12372_v40 = vsub.s32 6, %v1246_v20 }
 0x249   :  { %8105 = vmatprep.subr.bf16.mxu0 %v11222_v41  ;;  %8363 = vmatprep.subr.bf16.mxu1 %v11225_v42  ;;  %v11292_v41 = vld [vmem:[#allocation5 + $0x1270] ss:$48 sps:$4 sm:$0xff]   ;;  %v11295_v42 = vld [vmem:[#allocation5 + $0x1278] ss:$48 sps:$4 sm:$0xff]  }
 0x24c   :  { %8106 = vmatpush1.bf16.msra.mxu0 %v11220_v43  ;;  %8364 = vmatpush1.bf16.msra.mxu1 %v11223_v44  ;;  %v12374_v43 = vpop.permute.xlu0 %1231  ;;  %v1260_v44 = vrot.slane %v12358_v30, %v12356_v28 }
 0x24d   :  { %8107 = vmatprep.subr.bf16.mxu0 %v11228_v45  ;;  %8365 = vmatprep.subr.bf16.mxu1 %v11231_v46  ;;  %v11300_v45 = vld [vmem:[#allocation5 + $0x12d4] ss:$48 sps:$4 sm:$0xff]   ;;  %v11303_v46 = vld [vmem:[#allocation5 + $0x12dc] ss:$48 sps:$4 sm:$0xff]  }
 0x250   :  { %8108 = vmatpush1.bf16.msra.mxu0 %v11226_v47  ;;  %8366 = vmatpush1.bf16.msra.mxu1 %v11229_v48  ;;  %v1308_v47 = vrot.slane %v1248_v33, %v12354_v26  ;;  %v1380_v48 = vrot.slane %v12352_v25, %v12362_v34 }
 0x251   :  { %8109 = vmatprep.subr.bf16.mxu0 %v11234_v49  ;;  %8367 = vmatprep.subr.bf16.mxu1 %v11237_v50  ;;  %v1520_v49 = vrot.slane %v12352_v25, %v12364_v35  ;;  %v1388_v50 = vrot.slane %v12358_v30, %v12362_v34 }
 0x254   :  { %8110 = vmatpush1.bf16.msra.mxu0 %v11232_v51  ;;  %8368 = vmatpush1.bf16.msra.mxu1 %v11235_v52  ;;  %v1528_v51 = vrot.slane %v12358_v30, %v12364_v35  ;;  %v12156_v52 = vld [vmem:[#allocation2 + $0x1c] ss:$48 sps:$4 sm:$0xff]  }
 0x255   :  { %8111 = vmatprep.subr.bf16.mxu0 %v11240_v53  ;;  %8369 = vmatprep.subr.bf16.mxu1 %v11243_v54  ;;  %v12387_v53 = vpop.permute.xlu1 %1510  ;;  %v1316_v54 = vrot.slane %v1256_v37, %v12354_v26 }
 0x258   :  { %8112 = vmatpush1.bf16.msra.mxu0 %v11238_v55  ;;  %8370 = vmatpush1.bf16.msra.mxu1 %v11241_v56  ;;  %v1312_v55 = vrot.slane %v1252_v38, %v12354_v26  ;;  %v1384_v56 = vrot.slane %v12352_v25, %v12370_v39  ;;  %v11318_v38 = vld [vmem:[#allocation5 + $0x13f4] ss:$48 sps:$4 sm:$0xff]  }
 0x259   :  { %8113 = vmatprep.subr.bf16.mxu0 %v11246_v57  ;;  %8371 = vmatprep.subr.bf16.mxu1 %v11249_v58  ;;  %v1524_v57 = vrot.slane %v12352_v25, %v12372_v40  ;;  %v11298_v58 = vld [vmem:[#allocation5 + $0x12d0] ss:$48 sps:$4 sm:$0xff]  }
 0x25c   :  { %8114 = vmatpush1.bf16.msra.mxu0 %v11244_v59  ;;  %8372 = vmatpush1.bf16.msra.mxu1 %v11247_v60  ;;  %v11301_v59 = vld [vmem:[#allocation5 + $0x12d8] ss:$48 sps:$4 sm:$0xff]   ;;  %v1320_v60 = vrot.slane %v1260_v44, %v12354_v26 }
 0x25d   :  { %8115 = vmatprep.subr.bf16.mxu0 %v11252_v61  ;;  %8373 = vmatprep.subr.bf16.mxu1 %v11255_v62  ;;  %v1392_v61 = vrot.slane %v12358_v30, %v12370_v39  ;;  %v1532_v62 = vrot.slane %v12358_v30, %v12372_v40 }
 0x25f   :  { %v1592_v15 = vrot.slane %v1532_v62, %v12364_v35 }
 0x260   :  { %8116 = vmatpush1.bf16.msra.mxu0 %v11250_v63  ;;  %8374 = vmatpush1.bf16.msra.mxu1 %v11253_v0  ;;  %v11306_v63 = vld [vmem:[#allocation5 + $0x1334] ss:$48 sps:$4 sm:$0xff]   ;;  %v11309_v0 = vld [vmem:[#allocation5 + $0x133c] ss:$48 sps:$4 sm:$0xff]  }
 0x261   :  { %8117 = vmatprep.subr.bf16.mxu0 %v11258_v1  ;;  %8375 = vmatprep.subr.bf16.mxu1 %v11261_v2  ;;  %v1353_v1 = vmul.f32 %v1308_v47, %v12374_v43  ;;  %v12401_v2 = vpop.permute.xlu0 %1236 }
 0x262   :  { %v1367_v20 = vmul.f32 %v1316_v54, %v12401_v2 }
 0x264   :  { %8118 = vmatpush1.bf16.msra.mxu0 %v11256_v3  ;;  %8376 = vmatpush1.bf16.msra.mxu1 %v11259_v4  ;;  %v1440_v3 = vrot.slane %v1380_v48, %v12362_v34  ;;  %v1580_v4 = vrot.slane %v1520_v49, %v12364_v35 }
 0x265   :  { %8119 = vmatprep.subr.bf16.mxu0 %v11264_v5  ;;  %8377 = vmatprep.subr.bf16.mxu1 %v11267_v6  ;;  %v1448_v5 = vrot.slane %v1388_v50, %v12362_v34  ;;  %v1588_v6 = vrot.slane %v1528_v51, %v12364_v35 }
 0x267   :  { %v1499_v44 = vadd.f32 %v1448_v5, %v1367_v20 }
 0x268   :  { %8120 = vmatpush1.bf16.msra.mxu0 %v11262_v7  ;;  %8378 = vmatpush1.bf16.msra.mxu1 %v11265_v8  ;;  %v1355_v7 = vmul.f32 %v1316_v54, %v12374_v43  ;;  %v1354_v8 = vmul.f32 %v1312_v55, %v12374_v43 }
 0x269   :  { %8121 = vmatprep.subr.bf16.mxu0 %v11270_v9  ;;  %8379 = vmatprep.subr.bf16.mxu1 %v11273_v10  ;;  %v1444_v9 = vrot.slane %v1384_v56, %v12362_v34  ;;  %v1584_v10 = vrot.slane %v1524_v57, %v12364_v35  ;;  %v11319_v56 = vld [vmem:[#allocation5 + $0x13f8] ss:$48 sps:$4 sm:$0xff]  }
 0x26a   :  { %v1487_v25 = vadd.f32 %v1448_v5, %v1355_v7 }
 0x26b   :  { %v1626_v30 = vmul.f32 %v1584_v10, %v12387_v53 }
 0x26c   :  { %8122 = vmatpush1.bf16.msra.mxu0 %v11268_v11  ;;  %8380 = vmatpush1.bf16.msra.mxu1 %v11271_v12  ;;  %v11304_v11 = vld [vmem:[#allocation5 + $0x1330] ss:$48 sps:$4 sm:$0xff]   ;;  %v11307_v12 = vld [vmem:[#allocation5 + $0x1338] ss:$48 sps:$4 sm:$0xff]  }
 0x26d   :  { %8123 = vmatprep.subr.bf16.mxu0 %v11276_v13  ;;  %8381 = vmatprep.subr.bf16.mxu1 %v11279_v14  ;;  %v1356_v13 = vmul.f32 %v1320_v60, %v12374_v43  ;;  %v1452_v14 = vrot.slane %v1392_v61, %v12362_v34 }
 0x26f   :  { %v1488_v33 = vadd.f32 %v1452_v14, %v1356_v13 }
 0x270   :  { %8124 = vmatpush1.bf16.msra.mxu0 %v11274_v16  ;;  %8382 = vmatpush1.bf16.msra.mxu1 %v11277_v17  ;;  %v11312_v16 = vld [vmem:[#allocation5 + $0x1394] ss:$48 sps:$4 sm:$0xff]   ;;  %v11315_v17 = vld [vmem:[#allocation5 + $0x139c] ss:$48 sps:$4 sm:$0xff]  }
 0x271   :  { %8125 = vmatprep.subr.bf16.mxu0 %v11282_v18  ;;  %8383 = vmatprep.subr.bf16.mxu1 %v11285_v19  ;;  %v12414_v18 = vpop.permute.xlu1 %1514  ;;  %v1365_v19 = vmul.f32 %v1308_v47, %v12401_v2 }
 0x272   :  { %v1637_v37 = vmul.f32 %v1580_v4, %v12414_v18  ;;  %v1638_v47 = vmul.f32 %v1584_v10, %v12414_v18  ;;  %v1640_v49 = vmul.f32 %v1592_v15, %v12414_v18  ;;  %v11322_v10 = vld [vmem:[#allocation5 + $0x1450] ss:$48 sps:$4 sm:$0xff]  }
 0x274   :  { %8126 = vmatpush1.bf16.msra.mxu0 %v11280_v21  ;;  %8384 = vmatpush1.bf16.msra.mxu1 %v11283_v22  ;;  %v1485_v21 = vadd.f32 %v1440_v3, %v1353_v1  ;;  %v1625_v22 = vmul.f32 %v1580_v4, %v12387_v53 }
 0x275   :  { %8138 = vmatprep.subr.bf16.mxu0 %v11288_v23  ;;  %8396 = vmatprep.subr.bf16.mxu1 %v11291_v24  ;;  %v1366_v23 = vmul.f32 %v1312_v55, %v12401_v2  ;;  %v1368_v24 = vmul.f32 %v1320_v60, %v12401_v2  ;;  %v11316_v55 = vld [vmem:[#allocation5 + $0x13f0] ss:$48 sps:$4 sm:$0xff]   ;;  %v11327_v60 = vld [vmem:[#allocation5 + $0x145c] ss:$48 sps:$4 sm:$0xff]  }
 0x276   :  { %v1649_v50 = vadd.f32 %v1625_v22, %v1485_v21  ;;  %v11328_v21 = vld [vmem:[#allocation5 + $0x14b0] ss:$48 sps:$4 sm:$0xff]   ;;  %v11331_v22 = vld [vmem:[#allocation5 + $0x14b8] ss:$48 sps:$4 sm:$0xff]  }
 0x277   :  { %8128 = vmatmul.mubr.bf16.vlgmr.msra.gmra.mrb[4].mxu0 %v12155_v36  ;;  %8386 = vmatmul.mubr.bf16.vlgmr.msra.gmra.mrb[4].mxu1 %v12155_v36  ;;  %v1628_v36 = vmul.f32 %v1592_v15, %v12387_v53  ;;  %v1500_v48 = vadd.f32 %v1452_v14, %v1368_v24  ;;  %v11339_v24 = vld [vmem:[#allocation5 + $0x151c] ss:$48 sps:$4 sm:$0xff]  }
 0x278   :  { %8139 = vmatpush1.bf16.msra.mxu0 %v11286_v27  ;;  %8397 = vmatpush1.bf16.msra.mxu1 %v11289_v29  ;;  %v1627_v27 = vmul.f32 %v1588_v6, %v12387_v53  ;;  %v1486_v29 = vadd.f32 %v1444_v9, %v1354_v8 }
 0x279   :  { %8140 = vmatprep.subr.bf16.mxu0 %v11294_v31  ;;  %8398 = vmatprep.subr.bf16.mxu1 %v11297_v32  ;;  %v11310_v31 = vld [vmem:[#allocation5 + $0x1390] ss:$48 sps:$4 sm:$0xff]   ;;  %v11313_v32 = vld [vmem:[#allocation5 + $0x1398] ss:$48 sps:$4 sm:$0xff]   ;;  %v1652_v54 = vadd.f32 %v1628_v36, %v1488_v33  ;;  %v11348_v33 = vld [vmem:[#allocation5 + $0x15d4] ss:$48 sps:$4 sm:$0xff]  }
 0x27a   :  { %8170 = vmatprep.mubr.bf16.mxu0 %v12156_v52  ;;  %8428 = vmatprep.mubr.bf16.mxu1 %v12156_v52  ;;  %v1651_v51 = vadd.f32 %v1627_v27, %v1487_v25  ;;  %v1650_v52 = vadd.f32 %v1626_v30, %v1486_v29  ;;  %v11334_v25 = vld [vmem:[#allocation5 + $0x1510] ss:$48 sps:$4 sm:$0xff]   ;;  %v11337_v27 = vld [vmem:[#allocation5 + $0x1518] ss:$48 sps:$4 sm:$0xff]   ;;  %v11342_v29 = vld [vmem:[#allocation5 + $0x1574] ss:$48 sps:$4 sm:$0xff]  }
 0x27b   :  { %v11345_v30 = vld [vmem:[#allocation5 + $0x157c] ss:$48 sps:$4 sm:$0xff]  }
 0x27c   :  { %8141 = vmatpush1.bf16.msra.mxu0 %v11292_v41  ;;  %8399 = vmatpush1.bf16.msra.mxu1 %v11295_v42  ;;  %v11321_v41 = vld [vmem:[#allocation5 + $0x13fc] ss:$48 sps:$4 sm:$0xff]   ;;  %v1497_v42 = vadd.f32 %v1440_v3, %v1365_v19 }
 0x27d   :  { %8142 = vmatprep.subr.bf16.mxu0 %v11300_v45  ;;  %8400 = vmatprep.subr.bf16.mxu1 %v11303_v46  ;;  %v1639_v45 = vmul.f32 %v1588_v6, %v12414_v18  ;;  %v1498_v46 = vadd.f32 %v1444_v9, %v1366_v23  ;;  %v11336_v23 = vld [vmem:[#allocation5 + $0x1514] ss:$48 sps:$4 sm:$0xff]   ;;  %v11351_v36 = vld [vmem:[#allocation5 + $0x15dc] ss:$48 sps:$4 sm:$0xff]  }
 0x27e   :  { %v1661_v57 = vadd.f32 %v1637_v37, %v1497_v42  ;;  %v11346_v37 = vld [vmem:[#allocation5 + $0x15d0] ss:$48 sps:$4 sm:$0xff]   ;;  %v11357_v42 = vld [vmem:[#allocation5 + $0x163c] ss:$48 sps:$4 sm:$0xff]  }
 0x280   :  { %8143 = vmatpush1.bf16.msra.mxu0 %v11298_v58  ;;  %8401 = vmatpush1.bf16.msra.mxu1 %v11301_v59  ;;  %v1663_v58 = vadd.f32 %v1639_v45, %v1499_v44  ;;  %v11324_v59 = vld [vmem:[#allocation5 + $0x1454] ss:$48 sps:$4 sm:$0xff]   ;;  %v11352_v44 = vld [vmem:[#allocation5 + $0x1630] ss:$48 sps:$4 sm:$0xff]   ;;  %v11355_v45 = vld [vmem:[#allocation5 + $0x1638] ss:$48 sps:$4 sm:$0xff]  }
 0x281   :  { %8144 = vmatprep.subr.bf16.mxu0 %v11306_v63  ;;  %8402 = vmatprep.subr.bf16.mxu1 %v11309_v0  ;;  %v1662_v63 = vadd.f32 %v1638_v47, %v1498_v46  ;;  %v1664_v0 = vadd.f32 %v1640_v49, %v1500_v48  ;;  %v11360_v46 = vld [vmem:[#allocation5 + $0x1694] ss:$48 sps:$4 sm:$0xff]   ;;  %v11363_v47 = vld [vmem:[#allocation5 + $0x169c] ss:$48 sps:$4 sm:$0xff]   ;;  %v11358_v48 = vld [vmem:[#allocation5 + $0x1690] ss:$48 sps:$4 sm:$0xff]  }
 0x282   :  { %v11361_v49 = vld [vmem:[#allocation5 + $0x1698] ss:$48 sps:$4 sm:$0xff]  }
 0x284   :  { %8145 = vmatpush1.bf16.msra.mxu0 %v11304_v11  ;;  %8403 = vmatpush1.bf16.msra.mxu1 %v11307_v12  ;;  %v11325_v11 = vld [vmem:[#allocation5 + $0x1458] ss:$48 sps:$4 sm:$0xff]  }
 0x285   :  { %8146 = vmatprep.subr.bf16.mxu0 %v11312_v16  ;;  %8404 = vmatprep.subr.bf16.mxu1 %v11315_v17  ;;  %v11330_v16 = vld [vmem:[#allocation5 + $0x14b4] ss:$48 sps:$4 sm:$0xff]   ;;  %v11333_v17 = vld [vmem:[#allocation5 + $0x14bc] ss:$48 sps:$4 sm:$0xff]  }
 0x288   :  { %8147 = vmatpush1.bf16.msra.mxu0 %v11310_v31  ;;  %8405 = vmatpush1.bf16.msra.mxu1 %v11313_v32  ;;  %v11340_v31 = vld [vmem:[#allocation5 + $0x1570] ss:$48 sps:$4 sm:$0xff]   ;;  %v11343_v32 = vld [vmem:[#allocation5 + $0x1578] ss:$48 sps:$4 sm:$0xff]  }
 0x289   :  { %8148 = vmatprep.subr.bf16.mxu0 %v11318_v38  ;;  %8406 = vmatprep.subr.bf16.mxu1 %v11321_v41  ;;  %v11349_v38 = vld [vmem:[#allocation5 + $0x15d8] ss:$48 sps:$4 sm:$0xff]   ;;  %v11354_v41 = vld [vmem:[#allocation5 + $0x1634] ss:$48 sps:$4 sm:$0xff]  }
 0x28a   :  { %v7742_v61 = vpop.f32.mrb[0].mxu0  ;;  %v8000_v62 = vpop.f32.mrb[0].mxu1 }
 0x28b   :  { %v10247_v1 = vadd.f32 %v7742_v61, %v1649_v50  ;;  %v10251_v3 = vadd.f32 %v8000_v62, %v1651_v51  ;;  %v7744_v4 = vpop.f32.mrb[1].mxu0  ;;  %v8002_v5 = vpop.f32.mrb[1].mxu1  ;;  %v11366_v50 = vld [vmem:[#allocation5 + $0x16f4] ss:$48 sps:$4 sm:$0xff]   ;;  %v11369_v51 = vld [vmem:[#allocation5 + $0x16fc] ss:$48 sps:$4 sm:$0xff]  }
 0x28c   :  { %v10248_v6 = vadd.f32 %v7744_v4, %v1650_v52  ;;  %v10252_v7 = vadd.f32 %v8002_v5, %v1652_v54  ;;  %v7746_v8 = vpop.f32.mrb[2].mxu0  ;;  %v8004_v9 = vpop.f32.mrb[2].mxu1  ;;  %8149 = vmatpush1.bf16.msra.mxu0 %v11316_v55  ;;  %8407 = vmatpush1.bf16.msra.mxu1 %v11319_v56  ;;  %v11364_v52 = vld [vmem:[#allocation5 + $0x16f0] ss:$48 sps:$4 sm:$0xff]   ;;  %v11367_v54 = vld [vmem:[#allocation5 + $0x16f8] ss:$48 sps:$4 sm:$0xff]  }
 0x28d   :  { %9041 = vst [vmem:[#allocation8] sm:$0xff] %v10247_v1  ;;  %9043 = vst [vmem:[#allocation8 + $0x10] sm:$0xff] %v10251_v3  ;;  %v10249_v12 = vadd.f32 %v7746_v8, %v1661_v57  ;;  %v10253_v13 = vadd.f32 %v8004_v9, %v1663_v58  ;;  %v7748_v14 = vpop.f32.mrb[3].mxu0  ;;  %v8006_v15 = vpop.f32.mrb[3].mxu1  ;;  %8150 = vmatprep.subr.bf16.mxu0 %v11324_v59  ;;  %8408 = vmatprep.subr.bf16.mxu1 %v11327_v60  ;;  %v11372_v55 = vld [vmem:[#allocation5 + $0x1754] ss:$48 sps:$4 sm:$0xff]  }
 0x28e   :  { %9042 = vst [vmem:[#allocation8 + $0x8] sm:$0xff] %v10248_v6  ;;  %9044 = vst [vmem:[#allocation8 + $0x18] sm:$0xff] %v10252_v7  ;;  %v10250_v19 = vadd.f32 %v7748_v14, %v1662_v63  ;;  %v10254_v20 = vadd.f32 %v8006_v15, %v1664_v0  ;;  %v11375_v56 = vld [vmem:[#allocation5 + $0x175c] ss:$48 sps:$4 sm:$0xff]   ;;  %v11370_v57 = vld [vmem:[#allocation5 + $0x1750] ss:$48 sps:$4 sm:$0xff]  }
 0x28f   :  { %9053 = vst [vmem:[#allocation8 + $0x60] sm:$0xff] %v10249_v12  ;;  %9055 = vst [vmem:[#allocation8 + $0x70] sm:$0xff] %v10253_v13  ;;  %v11373_v58 = vld [vmem:[#allocation5 + $0x1758] ss:$48 sps:$4 sm:$0xff]   ;;  %v11378_v59 = vld [vmem:[#allocation5 + $0x17b4] ss:$48 sps:$4 sm:$0xff]  }
 0x290   :  { %9054 = vst [vmem:[#allocation8 + $0x68] sm:$0xff] %v10250_v19  ;;  %9056 = vst [vmem:[#allocation8 + $0x78] sm:$0xff] %v10254_v20  ;;  %8151 = vmatpush1.bf16.msra.mxu0 %v11322_v10  ;;  %8409 = vmatpush1.bf16.msra.mxu1 %v11325_v11  ;;  %v11381_v60 = vld [vmem:[#allocation5 + $0x17bc] ss:$48 sps:$4 sm:$0xff]   ;;  %v11376_v61 = vld [vmem:[#allocation5 + $0x17b0] ss:$48 sps:$4 sm:$0xff]  }
 0x291   :  { %8152 = vmatprep.subr.bf16.mxu0 %v11330_v16  ;;  %8410 = vmatprep.subr.bf16.mxu1 %v11333_v17  ;;  %v11379_v62 = vld [vmem:[#allocation5 + $0x17b8] ss:$48 sps:$4 sm:$0xff]   ;;  %v11384_v63 = vld [vmem:[#allocation5 + $0x1814] ss:$48 sps:$4 sm:$0xff]   ;;  %v11387_v0 = vld [vmem:[#allocation5 + $0x181c] ss:$48 sps:$4 sm:$0xff]  }
 0x292   :  { %v11382_v1 = vld [vmem:[#allocation5 + $0x1810] ss:$48 sps:$4 sm:$0xff]   ;;  %v11385_v3 = vld [vmem:[#allocation5 + $0x1818] ss:$48 sps:$4 sm:$0xff]   ;;  %v11390_v4 = vld [vmem:[#allocation5 + $0x1874] ss:$48 sps:$4 sm:$0xff]  }
 0x293   :  { %v11393_v5 = vld [vmem:[#allocation5 + $0x187c] ss:$48 sps:$4 sm:$0xff]   ;;  %v12157_v6 = vld [vmem:[#allocation2 + $0x18] ss:$48 sps:$4 sm:$0xff]   ;;  %v11388_v7 = vld [vmem:[#allocation5 + $0x1870] ss:$48 sps:$4 sm:$0xff]  }
 0x294   :  { %8153 = vmatpush1.bf16.msra.mxu0 %v11328_v21  ;;  %8411 = vmatpush1.bf16.msra.mxu1 %v11331_v22  ;;  %v11391_v8 = vld [vmem:[#allocation5 + $0x1878] ss:$48 sps:$4 sm:$0xff]   ;;  %v11396_v9 = vld [vmem:[#allocation5 + $0x18d4] ss:$48 sps:$4 sm:$0xff]   ;;  %v11399_v10 = vld [vmem:[#allocation5 + $0x18dc] ss:$48 sps:$4 sm:$0xff]  }
 0x295   :  { %8154 = vmatprep.subr.bf16.mxu0 %v11336_v23  ;;  %8412 = vmatprep.subr.bf16.mxu1 %v11339_v24  ;;  %v12158_v11 = vld [vmem:[#allocation2 + $0x24] ss:$48 sps:$4 sm:$0xff]   ;;  %v11394_v12 = vld [vmem:[#allocation5 + $0x18d0] ss:$48 sps:$4 sm:$0xff]   ;;  %v11397_v13 = vld [vmem:[#allocation5 + $0x18d8] ss:$48 sps:$4 sm:$0xff]  }
 0x296   :  { %v11402_v14 = vld [vmem:[#allocation5 + $0x1934] ss:$48 sps:$4 sm:$0xff]   ;;  %v11405_v15 = vld [vmem:[#allocation5 + $0x193c] ss:$48 sps:$4 sm:$0xff]   ;;  %v11400_v16 = vld [vmem:[#allocation5 + $0x1930] ss:$48 sps:$4 sm:$0xff]  }
 0x297   :  { %v11403_v17 = vld [vmem:[#allocation5 + $0x1938] ss:$48 sps:$4 sm:$0xff]   ;;  %v11408_v19 = vld [vmem:[#allocation5 + $0x1994] ss:$48 sps:$4 sm:$0xff]   ;;  %v11411_v20 = vld [vmem:[#allocation5 + $0x199c] ss:$48 sps:$4 sm:$0xff]  }
 0x298   :  { %8155 = vmatpush1.bf16.msra.mxu0 %v11334_v25  ;;  %8413 = vmatpush1.bf16.msra.mxu1 %v11337_v27  ;;  %v11406_v21 = vld [vmem:[#allocation5 + $0x1990] ss:$48 sps:$4 sm:$0xff]   ;;  %v11409_v22 = vld [vmem:[#allocation5 + $0x1998] ss:$48 sps:$4 sm:$0xff]   ;;  %v11414_v23 = vld [vmem:[#allocation5 + $0x19f4] ss:$48 sps:$4 sm:$0xff]  }
 0x299   :  { %8156 = vmatprep.subr.bf16.mxu0 %v11342_v29  ;;  %8414 = vmatprep.subr.bf16.mxu1 %v11345_v30  ;;  %v11417_v24 = vld [vmem:[#allocation5 + $0x19fc] ss:$48 sps:$4 sm:$0xff]   ;;  %v11412_v25 = vld [vmem:[#allocation5 + $0x19f0] ss:$48 sps:$4 sm:$0xff]   ;;  %v11415_v27 = vld [vmem:[#allocation5 + $0x19f8] ss:$48 sps:$4 sm:$0xff]  }
 0x29a   :  { %v11420_v29 = vld [vmem:[#allocation5 + $0x1a54] ss:$48 sps:$4 sm:$0xff]   ;;  %v11423_v30 = vld [vmem:[#allocation5 + $0x1a5c] ss:$48 sps:$4 sm:$0xff]  }
 0x29c   :  { %8157 = vmatpush1.bf16.msra.mxu0 %v11340_v31  ;;  %8415 = vmatpush1.bf16.msra.mxu1 %v11343_v32  ;;  %v11418_v31 = vld [vmem:[#allocation5 + $0x1a50] ss:$48 sps:$4 sm:$0xff]   ;;  %v11421_v32 = vld [vmem:[#allocation5 + $0x1a58] ss:$48 sps:$4 sm:$0xff]  }
 0x29d   :  { %8158 = vmatprep.subr.bf16.mxu0 %v11348_v33  ;;  %8416 = vmatprep.subr.bf16.mxu1 %v11351_v36  ;;  %v11426_v33 = vld [vmem:[#allocation5 + $0x1ab4] ss:$48 sps:$4 sm:$0xff]   ;;  %v11429_v36 = vld [vmem:[#allocation5 + $0x1abc] ss:$48 sps:$4 sm:$0xff]  }
 0x2a0   :  { %8159 = vmatpush1.bf16.msra.mxu0 %v11346_v37  ;;  %8417 = vmatpush1.bf16.msra.mxu1 %v11349_v38  ;;  %v11424_v37 = vld [vmem:[#allocation5 + $0x1ab0] ss:$48 sps:$4 sm:$0xff]   ;;  %v11427_v38 = vld [vmem:[#allocation5 + $0x1ab8] ss:$48 sps:$4 sm:$0xff]  }
 0x2a1   :  { %8160 = vmatprep.subr.bf16.mxu0 %v11354_v41  ;;  %8418 = vmatprep.subr.bf16.mxu1 %v11357_v42  ;;  %v11432_v41 = vld [vmem:[#allocation5 + $0x1b14] ss:$48 sps:$4 sm:$0xff]   ;;  %v11435_v42 = vld [vmem:[#allocation5 + $0x1b1c] ss:$48 sps:$4 sm:$0xff]  }
 0x2a4   :  { %8161 = vmatpush1.bf16.msra.mxu0 %v11352_v44  ;;  %8419 = vmatpush1.bf16.msra.mxu1 %v11355_v45  ;;  %v11430_v44 = vld [vmem:[#allocation5 + $0x1b10] ss:$48 sps:$4 sm:$0xff]   ;;  %v11433_v45 = vld [vmem:[#allocation5 + $0x1b18] ss:$48 sps:$4 sm:$0xff]  }
 0x2a5   :  { %8162 = vmatprep.subr.bf16.mxu0 %v11360_v46  ;;  %8420 = vmatprep.subr.bf16.mxu1 %v11363_v47  ;;  %v11438_v46 = vld [vmem:[#allocation5 + $0x1b74] ss:$48 sps:$4 sm:$0xff]   ;;  %v11441_v47 = vld [vmem:[#allocation5 + $0x1b7c] ss:$48 sps:$4 sm:$0xff]  }
 0x2a8   :  { %8163 = vmatpush1.bf16.msra.mxu0 %v11358_v48  ;;  %8421 = vmatpush1.bf16.msra.mxu1 %v11361_v49  ;;  %v11436_v48 = vld [vmem:[#allocation5 + $0x1b70] ss:$48 sps:$4 sm:$0xff]   ;;  %v11439_v49 = vld [vmem:[#allocation5 + $0x1b78] ss:$48 sps:$4 sm:$0xff]  }
 0x2a9   :  { %8164 = vmatprep.subr.bf16.mxu0 %v11366_v50  ;;  %8422 = vmatprep.subr.bf16.mxu1 %v11369_v51  ;;  %v11444_v50 = vld [vmem:[#allocation5 + $0x1bd4] ss:$48 sps:$4 sm:$0xff]   ;;  %v11447_v51 = vld [vmem:[#allocation5 + $0x1bdc] ss:$48 sps:$4 sm:$0xff]  }
 0x2ac   :  { %8165 = vmatpush1.bf16.msra.mxu0 %v11364_v52  ;;  %8423 = vmatpush1.bf16.msra.mxu1 %v11367_v54  ;;  %v11442_v52 = vld [vmem:[#allocation5 + $0x1bd0] ss:$48 sps:$4 sm:$0xff]   ;;  %v11445_v54 = vld [vmem:[#allocation5 + $0x1bd8] ss:$48 sps:$4 sm:$0xff]  }
 0x2ad   :  { %8166 = vmatprep.subr.bf16.mxu0 %v11372_v55  ;;  %8424 = vmatprep.subr.bf16.mxu1 %v11375_v56  ;;  %v11450_v55 = vld [vmem:[#allocation5 + $0x1c34] ss:$48 sps:$4 sm:$0xff]   ;;  %v11453_v56 = vld [vmem:[#allocation5 + $0x1c3c] ss:$48 sps:$4 sm:$0xff]  }
 0x2b0   :  { %8167 = vmatpush1.bf16.msra.mxu0 %v11370_v57  ;;  %8425 = vmatpush1.bf16.msra.mxu1 %v11373_v58  ;;  %v11448_v57 = vld [vmem:[#allocation5 + $0x1c30] ss:$48 sps:$4 sm:$0xff]   ;;  %v11451_v58 = vld [vmem:[#allocation5 + $0x1c38] ss:$48 sps:$4 sm:$0xff]  }
 0x2b1   :  { %8168 = vmatprep.subr.bf16.mxu0 %v11378_v59  ;;  %8426 = vmatprep.subr.bf16.mxu1 %v11381_v60  ;;  %v11456_v59 = vld [vmem:[#allocation5 + $0x1c94] ss:$48 sps:$4 sm:$0xff]   ;;  %v11459_v60 = vld [vmem:[#allocation5 + $0x1c9c] ss:$48 sps:$4 sm:$0xff]  }
 0x2b4   :  { %8169 = vmatpush1.bf16.msra.mxu0 %v11376_v61  ;;  %8427 = vmatpush1.bf16.msra.mxu1 %v11379_v62  ;;  %v11454_v61 = vld [vmem:[#allocation5 + $0x1c90] ss:$48 sps:$4 sm:$0xff]   ;;  %v11457_v62 = vld [vmem:[#allocation5 + $0x1c98] ss:$48 sps:$4 sm:$0xff]  }
 0x2b5   :  { %8181 = vmatprep.subr.bf16.mxu0 %v11384_v63  ;;  %8439 = vmatprep.subr.bf16.mxu1 %v11387_v0  ;;  %v11462_v63 = vld [vmem:[#allocation5 + $0x1cf4] ss:$48 sps:$4 sm:$0xff]   ;;  %v11465_v0 = vld [vmem:[#allocation5 + $0x1cfc] ss:$48 sps:$4 sm:$0xff]  }
 0x2b7   :  { %8171 = vmatmul.mubr.bf16.vlgmr.msra.gmra.mrb[4].mxu0 %v12157_v6  ;;  %8429 = vmatmul.mubr.bf16.vlgmr.msra.gmra.mrb[4].mxu1 %v12157_v6  ;;  %v11466_v6 = vld [vmem:[#allocation5 + $0x1d50] ss:$48 sps:$4 sm:$0xff]  }
 0x2b8   :  { %8182 = vmatpush1.bf16.msra.mxu0 %v11382_v1  ;;  %8440 = vmatpush1.bf16.msra.mxu1 %v11385_v3  ;;  %v11460_v1 = vld [vmem:[#allocation5 + $0x1cf0] ss:$48 sps:$4 sm:$0xff]   ;;  %v11463_v3 = vld [vmem:[#allocation5 + $0x1cf8] ss:$48 sps:$4 sm:$0xff]  }
 0x2b9   :  { %8183 = vmatprep.subr.bf16.mxu0 %v11390_v4  ;;  %8441 = vmatprep.subr.bf16.mxu1 %v11393_v5  ;;  %v11468_v4 = vld [vmem:[#allocation5 + $0x1d54] ss:$48 sps:$4 sm:$0xff]   ;;  %v11471_v5 = vld [vmem:[#allocation5 + $0x1d5c] ss:$48 sps:$4 sm:$0xff]  }
 0x2ba   :  { %8213 = vmatprep.mubr.bf16.mxu0 %v12158_v11  ;;  %8471 = vmatprep.mubr.bf16.mxu1 %v12158_v11  ;;  %v11475_v11 = vld [vmem:[#allocation5 + $0x1db8] ss:$48 sps:$4 sm:$0xff]  }
 0x2bc   :  { %8184 = vmatpush1.bf16.msra.mxu0 %v11388_v7  ;;  %8442 = vmatpush1.bf16.msra.mxu1 %v11391_v8  ;;  %v11469_v7 = vld [vmem:[#allocation5 + $0x1d58] ss:$48 sps:$4 sm:$0xff]   ;;  %v11474_v8 = vld [vmem:[#allocation5 + $0x1db4] ss:$48 sps:$4 sm:$0xff]  }
 0x2bd   :  { %8185 = vmatprep.subr.bf16.mxu0 %v11396_v9  ;;  %8443 = vmatprep.subr.bf16.mxu1 %v11399_v10  ;;  %v11477_v9 = vld [vmem:[#allocation5 + $0x1dbc] ss:$48 sps:$4 sm:$0xff]   ;;  %v11472_v10 = vld [vmem:[#allocation5 + $0x1db0] ss:$48 sps:$4 sm:$0xff]  }
 0x2c0   :  { %8186 = vmatpush1.bf16.msra.mxu0 %v11394_v12  ;;  %8444 = vmatpush1.bf16.msra.mxu1 %v11397_v13  ;;  %v11480_v12 = vld [vmem:[#allocation5 + $0x1e14] ss:$48 sps:$4 sm:$0xff]   ;;  %v11483_v13 = vld [vmem:[#allocation5 + $0x1e1c] ss:$48 sps:$4 sm:$0xff]  }
 0x2c1   :  { %8187 = vmatprep.subr.bf16.mxu0 %v11402_v14  ;;  %8445 = vmatprep.subr.bf16.mxu1 %v11405_v15  ;;  %v11478_v14 = vld [vmem:[#allocation5 + $0x1e10] ss:$48 sps:$4 sm:$0xff]   ;;  %v11481_v15 = vld [vmem:[#allocation5 + $0x1e18] ss:$48 sps:$4 sm:$0xff]  }
 0x2c4   :  { %8188 = vmatpush1.bf16.msra.mxu0 %v11400_v16  ;;  %8446 = vmatpush1.bf16.msra.mxu1 %v11403_v17  ;;  %v11486_v16 = vld [vmem:[#allocation5 + $0x1e74] ss:$48 sps:$4 sm:$0xff]   ;;  %v11489_v17 = vld [vmem:[#allocation5 + $0x1e7c] ss:$48 sps:$4 sm:$0xff]  }
 0x2c5   :  { %8189 = vmatprep.subr.bf16.mxu0 %v11408_v19  ;;  %8447 = vmatprep.subr.bf16.mxu1 %v11411_v20  ;;  %v12159_v19 = vld [vmem:[#allocation2 + $0x20] ss:$48 sps:$4 sm:$0xff]  }
 0x2c6   :  { %v11484_v20 = vld [vmem:[#allocation5 + $0x1e70] ss:$48 sps:$4 sm:$0xff]  }
 0x2c8   :  { %8190 = vmatpush1.bf16.msra.mxu0 %v11406_v21  ;;  %8448 = vmatpush1.bf16.msra.mxu1 %v11409_v22  ;;  %v11487_v21 = vld [vmem:[#allocation5 + $0x1e78] ss:$48 sps:$4 sm:$0xff]   ;;  %v11492_v22 = vld [vmem:[#allocation5 + $0x1ed4] ss:$48 sps:$4 sm:$0xff]  }
 0x2c9   :  { %8191 = vmatprep.subr.bf16.mxu0 %v11414_v23  ;;  %8449 = vmatprep.subr.bf16.mxu1 %v11417_v24  ;;  %v11495_v23 = vld [vmem:[#allocation5 + $0x1edc] ss:$48 sps:$4 sm:$0xff]  }
 0x2ca   :  { %v12160_v24 = vld [vmem:[#allocation2 + $0x2c] ss:$48 sps:$4 sm:$0xff]  }
 0x2cc   :  { %8192 = vmatpush1.bf16.msra.mxu0 %v11412_v25  ;;  %8450 = vmatpush1.bf16.msra.mxu1 %v11415_v27  ;;  %v11490_v25 = vld [vmem:[#allocation5 + $0x1ed0] ss:$48 sps:$4 sm:$0xff]   ;;  %v11493_v27 = vld [vmem:[#allocation5 + $0x1ed8] ss:$48 sps:$4 sm:$0xff]  }
 0x2cd   :  { %8193 = vmatprep.subr.bf16.mxu0 %v11420_v29  ;;  %8451 = vmatprep.subr.bf16.mxu1 %v11423_v30  ;;  %v11498_v29 = vld [vmem:[#allocation5 + $0x1f34] ss:$48 sps:$4 sm:$0xff]   ;;  %v11501_v30 = vld [vmem:[#allocation5 + $0x1f3c] ss:$48 sps:$4 sm:$0xff]  }
 0x2d0   :  { %8194 = vmatpush1.bf16.msra.mxu0 %v11418_v31  ;;  %8452 = vmatpush1.bf16.msra.mxu1 %v11421_v32  ;;  %v11496_v31 = vld [vmem:[#allocation5 + $0x1f30] ss:$48 sps:$4 sm:$0xff]   ;;  %v11499_v32 = vld [vmem:[#allocation5 + $0x1f38] ss:$48 sps:$4 sm:$0xff]  }
 0x2d1   :  { %8195 = vmatprep.subr.bf16.mxu0 %v11426_v33  ;;  %8453 = vmatprep.subr.bf16.mxu1 %v11429_v36  ;;  %v11504_v33 = vld [vmem:[#allocation5 + $0x1f94] ss:$48 sps:$4 sm:$0xff]   ;;  %v11507_v36 = vld [vmem:[#allocation5 + $0x1f9c] ss:$48 sps:$4 sm:$0xff]  }
 0x2d4   :  { %8196 = vmatpush1.bf16.msra.mxu0 %v11424_v37  ;;  %8454 = vmatpush1.bf16.msra.mxu1 %v11427_v38  ;;  %v11502_v37 = vld [vmem:[#allocation5 + $0x1f90] ss:$48 sps:$4 sm:$0xff]   ;;  %v11505_v38 = vld [vmem:[#allocation5 + $0x1f98] ss:$48 sps:$4 sm:$0xff]  }
 0x2d5   :  { %8197 = vmatprep.subr.bf16.mxu0 %v11432_v41  ;;  %8455 = vmatprep.subr.bf16.mxu1 %v11435_v42  ;;  %v11510_v41 = vld [vmem:[#allocation5 + $0x1ff4] ss:$48 sps:$4 sm:$0xff]   ;;  %v11513_v42 = vld [vmem:[#allocation5 + $0x1ffc] ss:$48 sps:$4 sm:$0xff]  }
 0x2d8   :  { %8198 = vmatpush1.bf16.msra.mxu0 %v11430_v44  ;;  %8456 = vmatpush1.bf16.msra.mxu1 %v11433_v45  ;;  %v11508_v44 = vld [vmem:[#allocation5 + $0x1ff0] ss:$48 sps:$4 sm:$0xff]   ;;  %v11511_v45 = vld [vmem:[#allocation5 + $0x1ff8] ss:$48 sps:$4 sm:$0xff]  }
 0x2d9   :  { %8199 = vmatprep.subr.bf16.mxu0 %v11438_v46  ;;  %8457 = vmatprep.subr.bf16.mxu1 %v11441_v47  ;;  %v11516_v46 = vld [vmem:[#allocation5 + $0x2054] ss:$48 sps:$4 sm:$0xff]   ;;  %v11519_v47 = vld [vmem:[#allocation5 + $0x205c] ss:$48 sps:$4 sm:$0xff]  }
 0x2dc   :  { %8200 = vmatpush1.bf16.msra.mxu0 %v11436_v48  ;;  %8458 = vmatpush1.bf16.msra.mxu1 %v11439_v49  ;;  %v11514_v48 = vld [vmem:[#allocation5 + $0x2050] ss:$48 sps:$4 sm:$0xff]   ;;  %v11517_v49 = vld [vmem:[#allocation5 + $0x2058] ss:$48 sps:$4 sm:$0xff]  }
 0x2dd   :  { %8201 = vmatprep.subr.bf16.mxu0 %v11444_v50  ;;  %8459 = vmatprep.subr.bf16.mxu1 %v11447_v51  ;;  %v11522_v50 = vld [vmem:[#allocation5 + $0x20b4] ss:$48 sps:$4 sm:$0xff]   ;;  %v11525_v51 = vld [vmem:[#allocation5 + $0x20bc] ss:$48 sps:$4 sm:$0xff]  }
 0x2e0   :  { %8202 = vmatpush1.bf16.msra.mxu0 %v11442_v52  ;;  %8460 = vmatpush1.bf16.msra.mxu1 %v11445_v54  ;;  %v11520_v52 = vld [vmem:[#allocation5 + $0x20b0] ss:$48 sps:$4 sm:$0xff]   ;;  %v11523_v54 = vld [vmem:[#allocation5 + $0x20b8] ss:$48 sps:$4 sm:$0xff]  }
 0x2e1   :  { %8203 = vmatprep.subr.bf16.mxu0 %v11450_v55  ;;  %8461 = vmatprep.subr.bf16.mxu1 %v11453_v56  ;;  %v11528_v55 = vld [vmem:[#allocation5 + $0x2114] ss:$48 sps:$4 sm:$0xff]   ;;  %v11531_v56 = vld [vmem:[#allocation5 + $0x211c] ss:$48 sps:$4 sm:$0xff]  }
 0x2e4   :  { %8204 = vmatpush1.bf16.msra.mxu0 %v11448_v57  ;;  %8462 = vmatpush1.bf16.msra.mxu1 %v11451_v58  ;;  %v11526_v57 = vld [vmem:[#allocation5 + $0x2110] ss:$48 sps:$4 sm:$0xff]   ;;  %v11529_v58 = vld [vmem:[#allocation5 + $0x2118] ss:$48 sps:$4 sm:$0xff]  }
 0x2e5   :  { %8205 = vmatprep.subr.bf16.mxu0 %v11456_v59  ;;  %8463 = vmatprep.subr.bf16.mxu1 %v11459_v60  ;;  %v11534_v59 = vld [vmem:[#allocation5 + $0x2174] ss:$48 sps:$4 sm:$0xff]   ;;  %v11537_v60 = vld [vmem:[#allocation5 + $0x217c] ss:$48 sps:$4 sm:$0xff]  }
 0x2e8   :  { %8206 = vmatpush1.bf16.msra.mxu0 %v11454_v61  ;;  %8464 = vmatpush1.bf16.msra.mxu1 %v11457_v62  ;;  %v11532_v61 = vld [vmem:[#allocation5 + $0x2170] ss:$48 sps:$4 sm:$0xff]   ;;  %v11535_v62 = vld [vmem:[#allocation5 + $0x2178] ss:$48 sps:$4 sm:$0xff]  }
 0x2e9   :  { %8207 = vmatprep.subr.bf16.mxu0 %v11462_v63  ;;  %8465 = vmatprep.subr.bf16.mxu1 %v11465_v0  ;;  %v11540_v63 = vld [vmem:[#allocation5 + $0x21d4] ss:$48 sps:$4 sm:$0xff]   ;;  %v11543_v0 = vld [vmem:[#allocation5 + $0x21dc] ss:$48 sps:$4 sm:$0xff]  }
 0x2ec   :  { %8208 = vmatpush1.bf16.msra.mxu0 %v11460_v1  ;;  %8466 = vmatpush1.bf16.msra.mxu1 %v11463_v3  ;;  %v11538_v1 = vld [vmem:[#allocation5 + $0x21d0] ss:$48 sps:$4 sm:$0xff]   ;;  %v11541_v3 = vld [vmem:[#allocation5 + $0x21d8] ss:$48 sps:$4 sm:$0xff]  }
 0x2ed   :  { %8209 = vmatprep.subr.bf16.mxu0 %v11468_v4  ;;  %8467 = vmatprep.subr.bf16.mxu1 %v11471_v5  ;;  %v11546_v4 = vld [vmem:[#allocation5 + $0x2234] ss:$48 sps:$4 sm:$0xff]   ;;  %v11549_v5 = vld [vmem:[#allocation5 + $0x223c] ss:$48 sps:$4 sm:$0xff]  }
 0x2f0   :  { %8210 = vmatpush1.bf16.msra.mxu0 %v11466_v6  ;;  %8468 = vmatpush1.bf16.msra.mxu1 %v11469_v7  ;;  %v11544_v6 = vld [vmem:[#allocation5 + $0x2230] ss:$48 sps:$4 sm:$0xff]   ;;  %v11547_v7 = vld [vmem:[#allocation5 + $0x2238] ss:$48 sps:$4 sm:$0xff]  }
 0x2f1   :  { %8211 = vmatprep.subr.bf16.mxu0 %v11474_v8  ;;  %8469 = vmatprep.subr.bf16.mxu1 %v11477_v9  ;;  %v11552_v8 = vld [vmem:[#allocation5 + $0x2294] ss:$48 sps:$4 sm:$0xff]   ;;  %v11555_v9 = vld [vmem:[#allocation5 + $0x229c] ss:$48 sps:$4 sm:$0xff]  }
 0x2f4   :  { %8212 = vmatpush1.bf16.msra.mxu0 %v11472_v10  ;;  %8470 = vmatpush1.bf16.msra.mxu1 %v11475_v11  ;;  %v11550_v10 = vld [vmem:[#allocation5 + $0x2290] ss:$48 sps:$4 sm:$0xff]   ;;  %v11553_v11 = vld [vmem:[#allocation5 + $0x2298] ss:$48 sps:$4 sm:$0xff]  }
 0x2f5   :  { %8224 = vmatprep.subr.bf16.mxu0 %v11480_v12  ;;  %8482 = vmatprep.subr.bf16.mxu1 %v11483_v13  ;;  %v11558_v12 = vld [vmem:[#allocation5 + $0x22f4] ss:$48 sps:$4 sm:$0xff]   ;;  %v11561_v13 = vld [vmem:[#allocation5 + $0x22fc] ss:$48 sps:$4 sm:$0xff]  }
 0x2f7   :  { %8214 = vmatmul.mubr.bf16.vlgmr.msra.gmra.mrb[4].mxu0 %v12159_v19  ;;  %8472 = vmatmul.mubr.bf16.vlgmr.msra.gmra.mrb[4].mxu1 %v12159_v19  ;;  %v11562_v19 = vld [vmem:[#allocation5 + $0x2350] ss:$48 sps:$4 sm:$0xff]  }
 0x2f8   :  { %8225 = vmatpush1.bf16.msra.mxu0 %v11478_v14  ;;  %8483 = vmatpush1.bf16.msra.mxu1 %v11481_v15  ;;  %v11556_v14 = vld [vmem:[#allocation5 + $0x22f0] ss:$48 sps:$4 sm:$0xff]   ;;  %v11559_v15 = vld [vmem:[#allocation5 + $0x22f8] ss:$48 sps:$4 sm:$0xff]  }
 0x2f9   :  { %8226 = vmatprep.subr.bf16.mxu0 %v11486_v16  ;;  %8484 = vmatprep.subr.bf16.mxu1 %v11489_v17  ;;  %v11564_v16 = vld [vmem:[#allocation5 + $0x2354] ss:$48 sps:$4 sm:$0xff]   ;;  %v11567_v17 = vld [vmem:[#allocation5 + $0x235c] ss:$48 sps:$4 sm:$0xff]  }
 0x2fa   :  { %8256 = vmatprep.mubr.bf16.mxu0 %v12160_v24  ;;  %8514 = vmatprep.mubr.bf16.mxu1 %v12160_v24  ;;  %v11571_v24 = vld [vmem:[#allocation5 + $0x23b8] ss:$48 sps:$4 sm:$0xff]  }
 0x2fc   :  { %8227 = vmatpush1.bf16.msra.mxu0 %v11484_v20  ;;  %8485 = vmatpush1.bf16.msra.mxu1 %v11487_v21  ;;  %v11565_v20 = vld [vmem:[#allocation5 + $0x2358] ss:$48 sps:$4 sm:$0xff]   ;;  %v11570_v21 = vld [vmem:[#allocation5 + $0x23b4] ss:$48 sps:$4 sm:$0xff]  }
 0x2fd   :  { %8228 = vmatprep.subr.bf16.mxu0 %v11492_v22  ;;  %8486 = vmatprep.subr.bf16.mxu1 %v11495_v23  ;;  %v11573_v22 = vld [vmem:[#allocation5 + $0x23bc] ss:$48 sps:$4 sm:$0xff]   ;;  %v11568_v23 = vld [vmem:[#allocation5 + $0x23b0] ss:$48 sps:$4 sm:$0xff]  }
 0x300   :  { %8229 = vmatpush1.bf16.msra.mxu0 %v11490_v25  ;;  %8487 = vmatpush1.bf16.msra.mxu1 %v11493_v27  ;;  %v11576_v25 = vld [vmem:[#allocation5 + $0x24] ss:$48 sps:$4 sm:$0xff]   ;;  %v11579_v27 = vld [vmem:[#allocation5 + $0x2c] ss:$48 sps:$4 sm:$0xff]  }
 0x301   :  { %8230 = vmatprep.subr.bf16.mxu0 %v11498_v29  ;;  %8488 = vmatprep.subr.bf16.mxu1 %v11501_v30  ;;  %v11574_v29 = vld [vmem:[#allocation5 + $0x20] ss:$48 sps:$4 sm:$0xff]   ;;  %v11577_v30 = vld [vmem:[#allocation5 + $0x28] ss:$48 sps:$4 sm:$0xff]  }
 0x304   :  { %8231 = vmatpush1.bf16.msra.mxu0 %v11496_v31  ;;  %8489 = vmatpush1.bf16.msra.mxu1 %v11499_v32  ;;  %v11582_v31 = vld [vmem:[#allocation5 + $0x84] ss:$48 sps:$4 sm:$0xff]   ;;  %v11585_v32 = vld [vmem:[#allocation5 + $0x8c] ss:$48 sps:$4 sm:$0xff]  }
 0x305   :  { %8232 = vmatprep.subr.bf16.mxu0 %v11504_v33  ;;  %8490 = vmatprep.subr.bf16.mxu1 %v11507_v36  ;;  %v12161_v33 = vld [vmem:[#allocation2 + $0x28] ss:$48 sps:$4 sm:$0xff]   ;;  %v11580_v36 = vld [vmem:[#allocation5 + $0x80] ss:$48 sps:$4 sm:$0xff]  }
 0x308   :  { %8233 = vmatpush1.bf16.msra.mxu0 %v11502_v37  ;;  %8491 = vmatpush1.bf16.msra.mxu1 %v11505_v38  ;;  %v11583_v37 = vld [vmem:[#allocation5 + $0x88] ss:$48 sps:$4 sm:$0xff]   ;;  %v11588_v38 = vld [vmem:[#allocation5 + $0xe4] ss:$48 sps:$4 sm:$0xff]  }
 0x309   :  { %8234 = vmatprep.subr.bf16.mxu0 %v11510_v41  ;;  %8492 = vmatprep.subr.bf16.mxu1 %v11513_v42  ;;  %v11591_v41 = vld [vmem:[#allocation5 + $0xec] ss:$48 sps:$4 sm:$0xff]   ;;  %v12162_v42 = vld [vmem:[#allocation2 + $0x4] ss:$48 sps:$4 sm:$0xff]  }
 0x30c   :  { %8235 = vmatpush1.bf16.msra.mxu0 %v11508_v44  ;;  %8493 = vmatpush1.bf16.msra.mxu1 %v11511_v45  ;;  %v11586_v44 = vld [vmem:[#allocation5 + $0xe0] ss:$48 sps:$4 sm:$0xff]   ;;  %v11589_v45 = vld [vmem:[#allocation5 + $0xe8] ss:$48 sps:$4 sm:$0xff]  }
 0x30d   :  { %8236 = vmatprep.subr.bf16.mxu0 %v11516_v46  ;;  %8494 = vmatprep.subr.bf16.mxu1 %v11519_v47  ;;  %v11594_v46 = vld [vmem:[#allocation5 + $0x144] ss:$48 sps:$4 sm:$0xff]   ;;  %v11597_v47 = vld [vmem:[#allocation5 + $0x14c] ss:$48 sps:$4 sm:$0xff]  }
 0x310   :  { %8237 = vmatpush1.bf16.msra.mxu0 %v11514_v48  ;;  %8495 = vmatpush1.bf16.msra.mxu1 %v11517_v49  ;;  %v11592_v48 = vld [vmem:[#allocation5 + $0x140] ss:$48 sps:$4 sm:$0xff]   ;;  %v11595_v49 = vld [vmem:[#allocation5 + $0x148] ss:$48 sps:$4 sm:$0xff]  }
 0x311   :  { %8238 = vmatprep.subr.bf16.mxu0 %v11522_v50  ;;  %8496 = vmatprep.subr.bf16.mxu1 %v11525_v51  ;;  %v11600_v50 = vld [vmem:[#allocation5 + $0x1a4] ss:$48 sps:$4 sm:$0xff]   ;;  %v11603_v51 = vld [vmem:[#allocation5 + $0x1ac] ss:$48 sps:$4 sm:$0xff]  }
 0x314   :  { %8239 = vmatpush1.bf16.msra.mxu0 %v11520_v52  ;;  %8497 = vmatpush1.bf16.msra.mxu1 %v11523_v54  ;;  %v11598_v52 = vld [vmem:[#allocation5 + $0x1a0] ss:$48 sps:$4 sm:$0xff]   ;;  %v11601_v54 = vld [vmem:[#allocation5 + $0x1a8] ss:$48 sps:$4 sm:$0xff]  }
 0x315   :  { %8240 = vmatprep.subr.bf16.mxu0 %v11528_v55  ;;  %8498 = vmatprep.subr.bf16.mxu1 %v11531_v56  ;;  %v11606_v55 = vld [vmem:[#allocation5 + $0x204] ss:$48 sps:$4 sm:$0xff]   ;;  %v11609_v56 = vld [vmem:[#allocation5 + $0x20c] ss:$48 sps:$4 sm:$0xff]  }
 0x318   :  { %8241 = vmatpush1.bf16.msra.mxu0 %v11526_v57  ;;  %8499 = vmatpush1.bf16.msra.mxu1 %v11529_v58  ;;  %v11604_v57 = vld [vmem:[#allocation5 + $0x200] ss:$48 sps:$4 sm:$0xff]   ;;  %v11607_v58 = vld [vmem:[#allocation5 + $0x208] ss:$48 sps:$4 sm:$0xff]  }
 0x319   :  { %8242 = vmatprep.subr.bf16.mxu0 %v11534_v59  ;;  %8500 = vmatprep.subr.bf16.mxu1 %v11537_v60  ;;  %v11612_v59 = vld [vmem:[#allocation5 + $0x264] ss:$48 sps:$4 sm:$0xff]   ;;  %v11615_v60 = vld [vmem:[#allocation5 + $0x26c] ss:$48 sps:$4 sm:$0xff]  }
 0x31c   :  { %8243 = vmatpush1.bf16.msra.mxu0 %v11532_v61  ;;  %8501 = vmatpush1.bf16.msra.mxu1 %v11535_v62  ;;  %v11610_v61 = vld [vmem:[#allocation5 + $0x260] ss:$48 sps:$4 sm:$0xff]   ;;  %v11613_v62 = vld [vmem:[#allocation5 + $0x268] ss:$48 sps:$4 sm:$0xff]  }
 0x31d   :  { %8244 = vmatprep.subr.bf16.mxu0 %v11540_v63  ;;  %8502 = vmatprep.subr.bf16.mxu1 %v11543_v0  ;;  %v11618_v63 = vld [vmem:[#allocation5 + $0x2c4] ss:$48 sps:$4 sm:$0xff]   ;;  %v11621_v0 = vld [vmem:[#allocation5 + $0x2cc] ss:$48 sps:$4 sm:$0xff]  }
 0x320   :  { %8245 = vmatpush1.bf16.msra.mxu0 %v11538_v1  ;;  %8503 = vmatpush1.bf16.msra.mxu1 %v11541_v3  ;;  %v11616_v1 = vld [vmem:[#allocation5 + $0x2c0] ss:$48 sps:$4 sm:$0xff]   ;;  %v11619_v3 = vld [vmem:[#allocation5 + $0x2c8] ss:$48 sps:$4 sm:$0xff]  }
 0x321   :  { %8246 = vmatprep.subr.bf16.mxu0 %v11546_v4  ;;  %8504 = vmatprep.subr.bf16.mxu1 %v11549_v5  ;;  %v11624_v4 = vld [vmem:[#allocation5 + $0x324] ss:$48 sps:$4 sm:$0xff]   ;;  %v11627_v5 = vld [vmem:[#allocation5 + $0x32c] ss:$48 sps:$4 sm:$0xff]  }
 0x324   :  { %8247 = vmatpush1.bf16.msra.mxu0 %v11544_v6  ;;  %8505 = vmatpush1.bf16.msra.mxu1 %v11547_v7  ;;  %v11622_v6 = vld [vmem:[#allocation5 + $0x320] ss:$48 sps:$4 sm:$0xff]   ;;  %v11625_v7 = vld [vmem:[#allocation5 + $0x328] ss:$48 sps:$4 sm:$0xff]  }
 0x325   :  { %8248 = vmatprep.subr.bf16.mxu0 %v11552_v8  ;;  %8506 = vmatprep.subr.bf16.mxu1 %v11555_v9  ;;  %v11630_v8 = vld [vmem:[#allocation5 + $0x384] ss:$48 sps:$4 sm:$0xff]   ;;  %v11633_v9 = vld [vmem:[#allocation5 + $0x38c] ss:$48 sps:$4 sm:$0xff]  }
 0x328   :  { %8249 = vmatpush1.bf16.msra.mxu0 %v11550_v10  ;;  %8507 = vmatpush1.bf16.msra.mxu1 %v11553_v11  ;;  %v11628_v10 = vld [vmem:[#allocation5 + $0x380] ss:$48 sps:$4 sm:$0xff]   ;;  %v11631_v11 = vld [vmem:[#allocation5 + $0x388] ss:$48 sps:$4 sm:$0xff]  }
 0x329   :  { %8250 = vmatprep.subr.bf16.mxu0 %v11558_v12  ;;  %8508 = vmatprep.subr.bf16.mxu1 %v11561_v13  ;;  %v11636_v12 = vld [vmem:[#allocation5 + $0x3e4] ss:$48 sps:$4 sm:$0xff]   ;;  %v11639_v13 = vld [vmem:[#allocation5 + $0x3ec] ss:$48 sps:$4 sm:$0xff]  }
 0x32c   :  { %8251 = vmatpush1.bf16.msra.mxu0 %v11556_v14  ;;  %8509 = vmatpush1.bf16.msra.mxu1 %v11559_v15  ;;  %v11634_v14 = vld [vmem:[#allocation5 + $0x3e0] ss:$48 sps:$4 sm:$0xff]   ;;  %v11637_v15 = vld [vmem:[#allocation5 + $0x3e8] ss:$48 sps:$4 sm:$0xff]  }
 0x32d   :  { %8252 = vmatprep.subr.bf16.mxu0 %v11564_v16  ;;  %8510 = vmatprep.subr.bf16.mxu1 %v11567_v17  ;;  %v11642_v16 = vld [vmem:[#allocation5 + $0x444] ss:$48 sps:$4 sm:$0xff]   ;;  %v11645_v17 = vld [vmem:[#allocation5 + $0x44c] ss:$48 sps:$4 sm:$0xff]  }
 0x330   :  { %8253 = vmatpush1.bf16.msra.mxu0 %v11562_v19  ;;  %8511 = vmatpush1.bf16.msra.mxu1 %v11565_v20  ;;  %v11640_v19 = vld [vmem:[#allocation5 + $0x440] ss:$48 sps:$4 sm:$0xff]   ;;  %v11643_v20 = vld [vmem:[#allocation5 + $0x448] ss:$48 sps:$4 sm:$0xff]  }
 0x331   :  { %8254 = vmatprep.subr.bf16.mxu0 %v11570_v21  ;;  %8512 = vmatprep.subr.bf16.mxu1 %v11573_v22  ;;  %v11648_v21 = vld [vmem:[#allocation5 + $0x4a4] ss:$48 sps:$4 sm:$0xff]   ;;  %v11651_v22 = vld [vmem:[#allocation5 + $0x4ac] ss:$48 sps:$4 sm:$0xff]  }
 0x334   :  { %8255 = vmatpush1.bf16.msra.mxu0 %v11568_v23  ;;  %8513 = vmatpush1.bf16.msra.mxu1 %v11571_v24  ;;  %v11646_v23 = vld [vmem:[#allocation5 + $0x4a0] ss:$48 sps:$4 sm:$0xff]   ;;  %v11649_v24 = vld [vmem:[#allocation5 + $0x4a8] ss:$48 sps:$4 sm:$0xff]  }
 0x335   :  { %8525 = vmatprep.subr.bf16.mxu0 %v11576_v25  ;;  %8783 = vmatprep.subr.bf16.mxu1 %v11579_v27  ;;  %v11654_v25 = vld [vmem:[#allocation5 + $0x504] ss:$48 sps:$4 sm:$0xff]   ;;  %v11657_v27 = vld [vmem:[#allocation5 + $0x50c] ss:$48 sps:$4 sm:$0xff]  }
 0x337   :  { %8257 = vmatmul.mubr.bf16.vlgmr.msra.gmra.mrb[4].mxu0 %v12161_v33  ;;  %8515 = vmatmul.mubr.bf16.vlgmr.msra.gmra.mrb[4].mxu1 %v12161_v33  ;;  %v11658_v33 = vld [vmem:[#allocation5 + $0x560] ss:$48 sps:$4 sm:$0xff]  }
 0x338   :  { %8526 = vmatpush1.bf16.msra.mxu0 %v11574_v29  ;;  %8784 = vmatpush1.bf16.msra.mxu1 %v11577_v30  ;;  %v11652_v29 = vld [vmem:[#allocation5 + $0x500] ss:$48 sps:$4 sm:$0xff]   ;;  %v11655_v30 = vld [vmem:[#allocation5 + $0x508] ss:$48 sps:$4 sm:$0xff]  }
 0x339   :  { %8527 = vmatprep.subr.bf16.mxu0 %v11582_v31  ;;  %8785 = vmatprep.subr.bf16.mxu1 %v11585_v32  ;;  %v11660_v31 = vld [vmem:[#allocation5 + $0x564] ss:$48 sps:$4 sm:$0xff]   ;;  %v11663_v32 = vld [vmem:[#allocation5 + $0x56c] ss:$48 sps:$4 sm:$0xff]  }
 0x33a   :  { %8557 = vmatprep.mubr.bf16.mxu0 %v12162_v42  ;;  %8815 = vmatprep.mubr.bf16.mxu1 %v12162_v42  ;;  %v11667_v42 = vld [vmem:[#allocation5 + $0x5c8] ss:$48 sps:$4 sm:$0xff]  }
 0x33c   :  { %8528 = vmatpush1.bf16.msra.mxu0 %v11580_v36  ;;  %8786 = vmatpush1.bf16.msra.mxu1 %v11583_v37  ;;  %v11661_v36 = vld [vmem:[#allocation5 + $0x568] ss:$48 sps:$4 sm:$0xff]   ;;  %v11666_v37 = vld [vmem:[#allocation5 + $0x5c4] ss:$48 sps:$4 sm:$0xff]  }
 0x33d   :  { %8529 = vmatprep.subr.bf16.mxu0 %v11588_v38  ;;  %8787 = vmatprep.subr.bf16.mxu1 %v11591_v41  ;;  %v11669_v38 = vld [vmem:[#allocation5 + $0x5cc] ss:$48 sps:$4 sm:$0xff]   ;;  %v11664_v41 = vld [vmem:[#allocation5 + $0x5c0] ss:$48 sps:$4 sm:$0xff]  }
 0x340   :  { %8530 = vmatpush1.bf16.msra.mxu0 %v11586_v44  ;;  %8788 = vmatpush1.bf16.msra.mxu1 %v11589_v45  ;;  %v11672_v44 = vld [vmem:[#allocation5 + $0x624] ss:$48 sps:$4 sm:$0xff]   ;;  %v11675_v45 = vld [vmem:[#allocation5 + $0x62c] ss:$48 sps:$4 sm:$0xff]  }
 0x341   :  { %8531 = vmatprep.subr.bf16.mxu0 %v11594_v46  ;;  %8789 = vmatprep.subr.bf16.mxu1 %v11597_v47  ;;  %v11670_v46 = vld [vmem:[#allocation5 + $0x620] ss:$48 sps:$4 sm:$0xff]   ;;  %v11673_v47 = vld [vmem:[#allocation5 + $0x628] ss:$48 sps:$4 sm:$0xff]  }
 0x344   :  { %8532 = vmatpush1.bf16.msra.mxu0 %v11592_v48  ;;  %8790 = vmatpush1.bf16.msra.mxu1 %v11595_v49  ;;  %v11678_v48 = vld [vmem:[#allocation5 + $0x684] ss:$48 sps:$4 sm:$0xff]   ;;  %v11681_v49 = vld [vmem:[#allocation5 + $0x68c] ss:$48 sps:$4 sm:$0xff]  }
 0x345   :  { %8533 = vmatprep.subr.bf16.mxu0 %v11600_v50  ;;  %8791 = vmatprep.subr.bf16.mxu1 %v11603_v51  ;;  %v12163_v50 = vld [vmem:[#allocation2] ss:$48 sps:$4 sm:$0xff]  }
 0x346   :  { %v11676_v51 = vld [vmem:[#allocation5 + $0x680] ss:$48 sps:$4 sm:$0xff]  }
 0x348   :  { %8534 = vmatpush1.bf16.msra.mxu0 %v11598_v52  ;;  %8792 = vmatpush1.bf16.msra.mxu1 %v11601_v54  ;;  %v11679_v52 = vld [vmem:[#allocation5 + $0x688] ss:$48 sps:$4 sm:$0xff]   ;;  %v11684_v54 = vld [vmem:[#allocation5 + $0x6e4] ss:$48 sps:$4 sm:$0xff]  }
 0x349   :  { %8535 = vmatprep.subr.bf16.mxu0 %v11606_v55  ;;  %8793 = vmatprep.subr.bf16.mxu1 %v11609_v56  ;;  %v11687_v55 = vld [vmem:[#allocation5 + $0x6ec] ss:$48 sps:$4 sm:$0xff]  }
 0x34a   :  { %v12164_v56 = vld [vmem:[#allocation2 + $0xc] ss:$48 sps:$4 sm:$0xff]  }
 0x34c   :  { %8536 = vmatpush1.bf16.msra.mxu0 %v11604_v57  ;;  %8794 = vmatpush1.bf16.msra.mxu1 %v11607_v58  ;;  %v11682_v57 = vld [vmem:[#allocation5 + $0x6e0] ss:$48 sps:$4 sm:$0xff]   ;;  %v11685_v58 = vld [vmem:[#allocation5 + $0x6e8] ss:$48 sps:$4 sm:$0xff]  }
 0x34d   :  { %8537 = vmatprep.subr.bf16.mxu0 %v11612_v59  ;;  %8795 = vmatprep.subr.bf16.mxu1 %v11615_v60  ;;  %v11690_v59 = vld [vmem:[#allocation5 + $0x744] ss:$48 sps:$4 sm:$0xff]   ;;  %v11693_v60 = vld [vmem:[#allocation5 + $0x74c] ss:$48 sps:$4 sm:$0xff]  }
 0x350   :  { %8538 = vmatpush1.bf16.msra.mxu0 %v11610_v61  ;;  %8796 = vmatpush1.bf16.msra.mxu1 %v11613_v62  ;;  %v11688_v61 = vld [vmem:[#allocation5 + $0x740] ss:$48 sps:$4 sm:$0xff]   ;;  %v11691_v62 = vld [vmem:[#allocation5 + $0x748] ss:$48 sps:$4 sm:$0xff]  }
 0x351   :  { %8539 = vmatprep.subr.bf16.mxu0 %v11618_v63  ;;  %8797 = vmatprep.subr.bf16.mxu1 %v11621_v0  ;;  %v11696_v63 = vld [vmem:[#allocation5 + $0x7a4] ss:$48 sps:$4 sm:$0xff]   ;;  %v11699_v0 = vld [vmem:[#allocation5 + $0x7ac] ss:$48 sps:$4 sm:$0xff]  }
 0x354   :  { %8540 = vmatpush1.bf16.msra.mxu0 %v11616_v1  ;;  %8798 = vmatpush1.bf16.msra.mxu1 %v11619_v3  ;;  %v11694_v1 = vld [vmem:[#allocation5 + $0x7a0] ss:$48 sps:$4 sm:$0xff]   ;;  %v11697_v3 = vld [vmem:[#allocation5 + $0x7a8] ss:$48 sps:$4 sm:$0xff]  }
 0x355   :  { %8541 = vmatprep.subr.bf16.mxu0 %v11624_v4  ;;  %8799 = vmatprep.subr.bf16.mxu1 %v11627_v5  ;;  %v11702_v4 = vld [vmem:[#allocation5 + $0x804] ss:$48 sps:$4 sm:$0xff]   ;;  %v11705_v5 = vld [vmem:[#allocation5 + $0x80c] ss:$48 sps:$4 sm:$0xff]  }
 0x358   :  { %8542 = vmatpush1.bf16.msra.mxu0 %v11622_v6  ;;  %8800 = vmatpush1.bf16.msra.mxu1 %v11625_v7  ;;  %v11700_v6 = vld [vmem:[#allocation5 + $0x800] ss:$48 sps:$4 sm:$0xff]   ;;  %v11703_v7 = vld [vmem:[#allocation5 + $0x808] ss:$48 sps:$4 sm:$0xff]  }
 0x359   :  { %8543 = vmatprep.subr.bf16.mxu0 %v11630_v8  ;;  %8801 = vmatprep.subr.bf16.mxu1 %v11633_v9  ;;  %v11708_v8 = vld [vmem:[#allocation5 + $0x864] ss:$48 sps:$4 sm:$0xff]   ;;  %v11711_v9 = vld [vmem:[#allocation5 + $0x86c] ss:$48 sps:$4 sm:$0xff]  }
 0x35c   :  { %8544 = vmatpush1.bf16.msra.mxu0 %v11628_v10  ;;  %8802 = vmatpush1.bf16.msra.mxu1 %v11631_v11  ;;  %v11706_v10 = vld [vmem:[#allocation5 + $0x860] ss:$48 sps:$4 sm:$0xff]   ;;  %v11709_v11 = vld [vmem:[#allocation5 + $0x868] ss:$48 sps:$4 sm:$0xff]  }
 0x35d   :  { %8545 = vmatprep.subr.bf16.mxu0 %v11636_v12  ;;  %8803 = vmatprep.subr.bf16.mxu1 %v11639_v13  ;;  %v11714_v12 = vld [vmem:[#allocation5 + $0x8c4] ss:$48 sps:$4 sm:$0xff]   ;;  %v11717_v13 = vld [vmem:[#allocation5 + $0x8cc] ss:$48 sps:$4 sm:$0xff]  }
 0x360   :  { %8546 = vmatpush1.bf16.msra.mxu0 %v11634_v14  ;;  %8804 = vmatpush1.bf16.msra.mxu1 %v11637_v15  ;;  %v11712_v14 = vld [vmem:[#allocation5 + $0x8c0] ss:$48 sps:$4 sm:$0xff]   ;;  %v11715_v15 = vld [vmem:[#allocation5 + $0x8c8] ss:$48 sps:$4 sm:$0xff]  }
 0x361   :  { %8547 = vmatprep.subr.bf16.mxu0 %v11642_v16  ;;  %8805 = vmatprep.subr.bf16.mxu1 %v11645_v17  ;;  %v11720_v16 = vld [vmem:[#allocation5 + $0x924] ss:$48 sps:$4 sm:$0xff]   ;;  %v11723_v17 = vld [vmem:[#allocation5 + $0x92c] ss:$48 sps:$4 sm:$0xff]  }
 0x364   :  { %8548 = vmatpush1.bf16.msra.mxu0 %v11640_v19  ;;  %8806 = vmatpush1.bf16.msra.mxu1 %v11643_v20  ;;  %v11718_v19 = vld [vmem:[#allocation5 + $0x920] ss:$48 sps:$4 sm:$0xff]   ;;  %v11721_v20 = vld [vmem:[#allocation5 + $0x928] ss:$48 sps:$4 sm:$0xff]  }
 0x365   :  { %8549 = vmatprep.subr.bf16.mxu0 %v11648_v21  ;;  %8807 = vmatprep.subr.bf16.mxu1 %v11651_v22  ;;  %v11726_v21 = vld [vmem:[#allocation5 + $0x984] ss:$48 sps:$4 sm:$0xff]   ;;  %v11729_v22 = vld [vmem:[#allocation5 + $0x98c] ss:$48 sps:$4 sm:$0xff]  }
 0x368   :  { %8550 = vmatpush1.bf16.msra.mxu0 %v11646_v23  ;;  %8808 = vmatpush1.bf16.msra.mxu1 %v11649_v24  ;;  %v11724_v23 = vld [vmem:[#allocation5 + $0x980] ss:$48 sps:$4 sm:$0xff]   ;;  %v11727_v24 = vld [vmem:[#allocation5 + $0x988] ss:$48 sps:$4 sm:$0xff]  }
 0x369   :  { %8551 = vmatprep.subr.bf16.mxu0 %v11654_v25  ;;  %8809 = vmatprep.subr.bf16.mxu1 %v11657_v27  ;;  %v11732_v25 = vld [vmem:[#allocation5 + $0x9e4] ss:$48 sps:$4 sm:$0xff]   ;;  %v11735_v27 = vld [vmem:[#allocation5 + $0x9ec] ss:$48 sps:$4 sm:$0xff]  }
 0x36c   :  { %8552 = vmatpush1.bf16.msra.mxu0 %v11652_v29  ;;  %8810 = vmatpush1.bf16.msra.mxu1 %v11655_v30  ;;  %v11730_v29 = vld [vmem:[#allocation5 + $0x9e0] ss:$48 sps:$4 sm:$0xff]   ;;  %v11733_v30 = vld [vmem:[#allocation5 + $0x9e8] ss:$48 sps:$4 sm:$0xff]  }
 0x36d   :  { %8553 = vmatprep.subr.bf16.mxu0 %v11660_v31  ;;  %8811 = vmatprep.subr.bf16.mxu1 %v11663_v32  ;;  %v11738_v31 = vld [vmem:[#allocation5 + $0xa44] ss:$48 sps:$4 sm:$0xff]   ;;  %v11741_v32 = vld [vmem:[#allocation5 + $0xa4c] ss:$48 sps:$4 sm:$0xff]  }
 0x370   :  { %8554 = vmatpush1.bf16.msra.mxu0 %v11658_v33  ;;  %8812 = vmatpush1.bf16.msra.mxu1 %v11661_v36  ;;  %v11736_v33 = vld [vmem:[#allocation5 + $0xa40] ss:$48 sps:$4 sm:$0xff]   ;;  %v11739_v36 = vld [vmem:[#allocation5 + $0xa48] ss:$48 sps:$4 sm:$0xff]  }
 0x371   :  { %8555 = vmatprep.subr.bf16.mxu0 %v11666_v37  ;;  %8813 = vmatprep.subr.bf16.mxu1 %v11669_v38  ;;  %v11744_v37 = vld [vmem:[#allocation5 + $0xaa4] ss:$48 sps:$4 sm:$0xff]   ;;  %v11747_v38 = vld [vmem:[#allocation5 + $0xaac] ss:$48 sps:$4 sm:$0xff]  }
 0x374   :  { %8556 = vmatpush1.bf16.msra.mxu0 %v11664_v41  ;;  %8814 = vmatpush1.bf16.msra.mxu1 %v11667_v42  ;;  %v11742_v41 = vld [vmem:[#allocation5 + $0xaa0] ss:$48 sps:$4 sm:$0xff]   ;;  %v11745_v42 = vld [vmem:[#allocation5 + $0xaa8] ss:$48 sps:$4 sm:$0xff]  }
 0x375   :  { %8568 = vmatprep.subr.bf16.mxu0 %v11672_v44  ;;  %8826 = vmatprep.subr.bf16.mxu1 %v11675_v45  ;;  %v11750_v44 = vld [vmem:[#allocation5 + $0xb04] ss:$48 sps:$4 sm:$0xff]   ;;  %v11753_v45 = vld [vmem:[#allocation5 + $0xb0c] ss:$48 sps:$4 sm:$0xff]  }
 0x377   :  { %8558 = vmatmul.mubr.bf16.vlgmr.msra.gmra.mrb[8].mxu0 %v12163_v50  ;;  %8816 = vmatmul.mubr.bf16.vlgmr.msra.gmra.mrb[8].mxu1 %v12163_v50  ;;  %v11754_v50 = vld [vmem:[#allocation5 + $0xb60] ss:$48 sps:$4 sm:$0xff]  }
 0x378   :  { %8569 = vmatpush1.bf16.msra.mxu0 %v11670_v46  ;;  %8827 = vmatpush1.bf16.msra.mxu1 %v11673_v47  ;;  %v11748_v46 = vld [vmem:[#allocation5 + $0xb00] ss:$48 sps:$4 sm:$0xff]   ;;  %v11751_v47 = vld [vmem:[#allocation5 + $0xb08] ss:$48 sps:$4 sm:$0xff]  }
 0x379   :  { %8570 = vmatprep.subr.bf16.mxu0 %v11678_v48  ;;  %8828 = vmatprep.subr.bf16.mxu1 %v11681_v49  ;;  %v11756_v48 = vld [vmem:[#allocation5 + $0xb64] ss:$48 sps:$4 sm:$0xff]   ;;  %v11759_v49 = vld [vmem:[#allocation5 + $0xb6c] ss:$48 sps:$4 sm:$0xff]  }
 0x37a   :  { %8600 = vmatprep.mubr.bf16.mxu0 %v12164_v56  ;;  %8858 = vmatprep.mubr.bf16.mxu1 %v12164_v56  ;;  %v11763_v56 = vld [vmem:[#allocation5 + $0xbc8] ss:$48 sps:$4 sm:$0xff]  }
 0x37c   :  { %8571 = vmatpush1.bf16.msra.mxu0 %v11676_v51  ;;  %8829 = vmatpush1.bf16.msra.mxu1 %v11679_v52  ;;  %v11757_v51 = vld [vmem:[#allocation5 + $0xb68] ss:$48 sps:$4 sm:$0xff]   ;;  %v11762_v52 = vld [vmem:[#allocation5 + $0xbc4] ss:$48 sps:$4 sm:$0xff]  }
 0x37d   :  { %8572 = vmatprep.subr.bf16.mxu0 %v11684_v54  ;;  %8830 = vmatprep.subr.bf16.mxu1 %v11687_v55  ;;  %v11765_v54 = vld [vmem:[#allocation5 + $0xbcc] ss:$48 sps:$4 sm:$0xff]   ;;  %v11760_v55 = vld [vmem:[#allocation5 + $0xbc0] ss:$48 sps:$4 sm:$0xff]  }
 0x380   :  { %8573 = vmatpush1.bf16.msra.mxu0 %v11682_v57  ;;  %8831 = vmatpush1.bf16.msra.mxu1 %v11685_v58  ;;  %v11768_v57 = vld [vmem:[#allocation5 + $0xc24] ss:$48 sps:$4 sm:$0xff]   ;;  %v11771_v58 = vld [vmem:[#allocation5 + $0xc2c] ss:$48 sps:$4 sm:$0xff]  }
 0x381   :  { %8574 = vmatprep.subr.bf16.mxu0 %v11690_v59  ;;  %8832 = vmatprep.subr.bf16.mxu1 %v11693_v60  ;;  %v11766_v59 = vld [vmem:[#allocation5 + $0xc20] ss:$48 sps:$4 sm:$0xff]   ;;  %v11769_v60 = vld [vmem:[#allocation5 + $0xc28] ss:$48 sps:$4 sm:$0xff]  }
 0x384   :  { %8575 = vmatpush1.bf16.msra.mxu0 %v11688_v61  ;;  %8833 = vmatpush1.bf16.msra.mxu1 %v11691_v62  ;;  %v11774_v61 = vld [vmem:[#allocation5 + $0xc84] ss:$48 sps:$4 sm:$0xff]   ;;  %v11777_v62 = vld [vmem:[#allocation5 + $0xc8c] ss:$48 sps:$4 sm:$0xff]  }
 0x385   :  { %8576 = vmatprep.subr.bf16.mxu0 %v11696_v63  ;;  %8834 = vmatprep.subr.bf16.mxu1 %v11699_v0  ;;  %v12165_v63 = vld [vmem:[#allocation2 + $0x8] ss:$48 sps:$4 sm:$0xff]   ;;  %v11772_v0 = vld [vmem:[#allocation5 + $0xc80] ss:$48 sps:$4 sm:$0xff]  }
 0x388   :  { %8577 = vmatpush1.bf16.msra.mxu0 %v11694_v1  ;;  %8835 = vmatpush1.bf16.msra.mxu1 %v11697_v3  ;;  %v11775_v1 = vld [vmem:[#allocation5 + $0xc88] ss:$48 sps:$4 sm:$0xff]   ;;  %v11780_v3 = vld [vmem:[#allocation5 + $0xce4] ss:$48 sps:$4 sm:$0xff]  }
 0x389   :  { %8578 = vmatprep.subr.bf16.mxu0 %v11702_v4  ;;  %8836 = vmatprep.subr.bf16.mxu1 %v11705_v5  ;;  %v11783_v4 = vld [vmem:[#allocation5 + $0xcec] ss:$48 sps:$4 sm:$0xff]   ;;  %v12166_v5 = vld [vmem:[#allocation2 + $0x14] ss:$48 sps:$4 sm:$0xff]  }
 0x38c   :  { %8579 = vmatpush1.bf16.msra.mxu0 %v11700_v6  ;;  %8837 = vmatpush1.bf16.msra.mxu1 %v11703_v7  ;;  %v11778_v6 = vld [vmem:[#allocation5 + $0xce0] ss:$48 sps:$4 sm:$0xff]   ;;  %v11781_v7 = vld [vmem:[#allocation5 + $0xce8] ss:$48 sps:$4 sm:$0xff]  }
 0x38d   :  { %8580 = vmatprep.subr.bf16.mxu0 %v11708_v8  ;;  %8838 = vmatprep.subr.bf16.mxu1 %v11711_v9  ;;  %v11786_v8 = vld [vmem:[#allocation5 + $0xd44] ss:$48 sps:$4 sm:$0xff]   ;;  %v11789_v9 = vld [vmem:[#allocation5 + $0xd4c] ss:$48 sps:$4 sm:$0xff]  }
 0x390   :  { %8581 = vmatpush1.bf16.msra.mxu0 %v11706_v10  ;;  %8839 = vmatpush1.bf16.msra.mxu1 %v11709_v11  ;;  %v11784_v10 = vld [vmem:[#allocation5 + $0xd40] ss:$48 sps:$4 sm:$0xff]   ;;  %v11787_v11 = vld [vmem:[#allocation5 + $0xd48] ss:$48 sps:$4 sm:$0xff]  }
 0x391   :  { %8582 = vmatprep.subr.bf16.mxu0 %v11714_v12  ;;  %8840 = vmatprep.subr.bf16.mxu1 %v11717_v13  ;;  %v11792_v12 = vld [vmem:[#allocation5 + $0xda4] ss:$48 sps:$4 sm:$0xff]   ;;  %v11795_v13 = vld [vmem:[#allocation5 + $0xdac] ss:$48 sps:$4 sm:$0xff]  }
 0x394   :  { %8583 = vmatpush1.bf16.msra.mxu0 %v11712_v14  ;;  %8841 = vmatpush1.bf16.msra.mxu1 %v11715_v15  ;;  %v11790_v14 = vld [vmem:[#allocation5 + $0xda0] ss:$48 sps:$4 sm:$0xff]   ;;  %v11793_v15 = vld [vmem:[#allocation5 + $0xda8] ss:$48 sps:$4 sm:$0xff]  }
 0x395   :  { %8584 = vmatprep.subr.bf16.mxu0 %v11720_v16  ;;  %8842 = vmatprep.subr.bf16.mxu1 %v11723_v17  ;;  %v11798_v16 = vld [vmem:[#allocation5 + $0xe04] ss:$48 sps:$4 sm:$0xff]   ;;  %v11801_v17 = vld [vmem:[#allocation5 + $0xe0c] ss:$48 sps:$4 sm:$0xff]  }
 0x398   :  { %8585 = vmatpush1.bf16.msra.mxu0 %v11718_v19  ;;  %8843 = vmatpush1.bf16.msra.mxu1 %v11721_v20  ;;  %v11796_v19 = vld [vmem:[#allocation5 + $0xe00] ss:$48 sps:$4 sm:$0xff]   ;;  %v11799_v20 = vld [vmem:[#allocation5 + $0xe08] ss:$48 sps:$4 sm:$0xff]  }
 0x399   :  { %8586 = vmatprep.subr.bf16.mxu0 %v11726_v21  ;;  %8844 = vmatprep.subr.bf16.mxu1 %v11729_v22  ;;  %v11804_v21 = vld [vmem:[#allocation5 + $0xe64] ss:$48 sps:$4 sm:$0xff]   ;;  %v11807_v22 = vld [vmem:[#allocation5 + $0xe6c] ss:$48 sps:$4 sm:$0xff]  }
 0x39c   :  { %8587 = vmatpush1.bf16.msra.mxu0 %v11724_v23  ;;  %8845 = vmatpush1.bf16.msra.mxu1 %v11727_v24  ;;  %v11802_v23 = vld [vmem:[#allocation5 + $0xe60] ss:$48 sps:$4 sm:$0xff]   ;;  %v11805_v24 = vld [vmem:[#allocation5 + $0xe68] ss:$48 sps:$4 sm:$0xff]  }
 0x39d   :  { %8588 = vmatprep.subr.bf16.mxu0 %v11732_v25  ;;  %8846 = vmatprep.subr.bf16.mxu1 %v11735_v27  ;;  %v11810_v25 = vld [vmem:[#allocation5 + $0xec4] ss:$48 sps:$4 sm:$0xff]   ;;  %v11813_v27 = vld [vmem:[#allocation5 + $0xecc] ss:$48 sps:$4 sm:$0xff]  }
 0x3a0   :  { %8589 = vmatpush1.bf16.msra.mxu0 %v11730_v29  ;;  %8847 = vmatpush1.bf16.msra.mxu1 %v11733_v30  ;;  %v11808_v29 = vld [vmem:[#allocation5 + $0xec0] ss:$48 sps:$4 sm:$0xff]   ;;  %v11811_v30 = vld [vmem:[#allocation5 + $0xec8] ss:$48 sps:$4 sm:$0xff]  }
 0x3a1   :  { %8590 = vmatprep.subr.bf16.mxu0 %v11738_v31  ;;  %8848 = vmatprep.subr.bf16.mxu1 %v11741_v32  ;;  %v11816_v31 = vld [vmem:[#allocation5 + $0xf24] ss:$48 sps:$4 sm:$0xff]   ;;  %v11819_v32 = vld [vmem:[#allocation5 + $0xf2c] ss:$48 sps:$4 sm:$0xff]  }
 0x3a4   :  { %8591 = vmatpush1.bf16.msra.mxu0 %v11736_v33  ;;  %8849 = vmatpush1.bf16.msra.mxu1 %v11739_v36  ;;  %v11814_v33 = vld [vmem:[#allocation5 + $0xf20] ss:$48 sps:$4 sm:$0xff]   ;;  %v11817_v36 = vld [vmem:[#allocation5 + $0xf28] ss:$48 sps:$4 sm:$0xff]  }
 0x3a5   :  { %8592 = vmatprep.subr.bf16.mxu0 %v11744_v37  ;;  %8850 = vmatprep.subr.bf16.mxu1 %v11747_v38  ;;  %v11822_v37 = vld [vmem:[#allocation5 + $0xf84] ss:$48 sps:$4 sm:$0xff]   ;;  %v11825_v38 = vld [vmem:[#allocation5 + $0xf8c] ss:$48 sps:$4 sm:$0xff]  }
 0x3a8   :  { %8593 = vmatpush1.bf16.msra.mxu0 %v11742_v41  ;;  %8851 = vmatpush1.bf16.msra.mxu1 %v11745_v42  ;;  %v11820_v41 = vld [vmem:[#allocation5 + $0xf80] ss:$48 sps:$4 sm:$0xff]   ;;  %v11823_v42 = vld [vmem:[#allocation5 + $0xf88] ss:$48 sps:$4 sm:$0xff]  }
 0x3a9   :  { %8594 = vmatprep.subr.bf16.mxu0 %v11750_v44  ;;  %8852 = vmatprep.subr.bf16.mxu1 %v11753_v45  ;;  %v11828_v44 = vld [vmem:[#allocation5 + $0xfe4] ss:$48 sps:$4 sm:$0xff]   ;;  %v11831_v45 = vld [vmem:[#allocation5 + $0xfec] ss:$48 sps:$4 sm:$0xff]  }
 0x3ac   :  { %8595 = vmatpush1.bf16.msra.mxu0 %v11748_v46  ;;  %8853 = vmatpush1.bf16.msra.mxu1 %v11751_v47  ;;  %v11826_v46 = vld [vmem:[#allocation5 + $0xfe0] ss:$48 sps:$4 sm:$0xff]   ;;  %v11829_v47 = vld [vmem:[#allocation5 + $0xfe8] ss:$48 sps:$4 sm:$0xff]  }
 0x3ad   :  { %8596 = vmatprep.subr.bf16.mxu0 %v11756_v48  ;;  %8854 = vmatprep.subr.bf16.mxu1 %v11759_v49  ;;  %v11834_v48 = vld [vmem:[#allocation5 + $0x1044] ss:$48 sps:$4 sm:$0xff]   ;;  %v11837_v49 = vld [vmem:[#allocation5 + $0x104c] ss:$48 sps:$4 sm:$0xff]  }
 0x3b0   :  { %8597 = vmatpush1.bf16.msra.mxu0 %v11754_v50  ;;  %8855 = vmatpush1.bf16.msra.mxu1 %v11757_v51  ;;  %v11832_v50 = vld [vmem:[#allocation5 + $0x1040] ss:$48 sps:$4 sm:$0xff]   ;;  %v11835_v51 = vld [vmem:[#allocation5 + $0x1048] ss:$48 sps:$4 sm:$0xff]  }
 0x3b1   :  { %8598 = vmatprep.subr.bf16.mxu0 %v11762_v52  ;;  %8856 = vmatprep.subr.bf16.mxu1 %v11765_v54  ;;  %v11840_v52 = vld [vmem:[#allocation5 + $0x10a4] ss:$48 sps:$4 sm:$0xff]   ;;  %v11843_v54 = vld [vmem:[#allocation5 + $0x10ac] ss:$48 sps:$4 sm:$0xff]  }
 0x3b4   :  { %8599 = vmatpush1.bf16.msra.mxu0 %v11760_v55  ;;  %8857 = vmatpush1.bf16.msra.mxu1 %v11763_v56  ;;  %v11838_v55 = vld [vmem:[#allocation5 + $0x10a0] ss:$48 sps:$4 sm:$0xff]   ;;  %v11841_v56 = vld [vmem:[#allocation5 + $0x10a8] ss:$48 sps:$4 sm:$0xff]  }
 0x3b5   :  { %8611 = vmatprep.subr.bf16.mxu0 %v11768_v57  ;;  %8869 = vmatprep.subr.bf16.mxu1 %v11771_v58  ;;  %v11846_v57 = vld [vmem:[#allocation5 + $0x1104] ss:$48 sps:$4 sm:$0xff]   ;;  %v11849_v58 = vld [vmem:[#allocation5 + $0x110c] ss:$48 sps:$4 sm:$0xff]  }
 0x3b7   :  { %8601 = vmatmul.mubr.bf16.vlgmr.msra.gmra.mrb[8].mxu0 %v12165_v63  ;;  %8859 = vmatmul.mubr.bf16.vlgmr.msra.gmra.mrb[8].mxu1 %v12165_v63  ;;  %v11850_v63 = vld [vmem:[#allocation5 + $0x1160] ss:$48 sps:$4 sm:$0xff]  }
 0x3b8   :  { %8612 = vmatpush1.bf16.msra.mxu0 %v11766_v59  ;;  %8870 = vmatpush1.bf16.msra.mxu1 %v11769_v60  ;;  %v11844_v59 = vld [vmem:[#allocation5 + $0x1100] ss:$48 sps:$4 sm:$0xff]   ;;  %v11847_v60 = vld [vmem:[#allocation5 + $0x1108] ss:$48 sps:$4 sm:$0xff]  }
 0x3b9   :  { %8613 = vmatprep.subr.bf16.mxu0 %v11774_v61  ;;  %8871 = vmatprep.subr.bf16.mxu1 %v11777_v62  ;;  %v11852_v61 = vld [vmem:[#allocation5 + $0x1164] ss:$48 sps:$4 sm:$0xff]   ;;  %v11855_v62 = vld [vmem:[#allocation5 + $0x116c] ss:$48 sps:$4 sm:$0xff]  }
 0x3ba   :  { %8643 = vmatprep.mubr.bf16.mxu0 %v12166_v5  ;;  %8901 = vmatprep.mubr.bf16.mxu1 %v12166_v5  ;;  %v11859_v5 = vld [vmem:[#allocation5 + $0x11c8] ss:$48 sps:$4 sm:$0xff]  }
 0x3bc   :  { %8614 = vmatpush1.bf16.msra.mxu0 %v11772_v0  ;;  %8872 = vmatpush1.bf16.msra.mxu1 %v11775_v1  ;;  %v11853_v0 = vld [vmem:[#allocation5 + $0x1168] ss:$48 sps:$4 sm:$0xff]   ;;  %v11858_v1 = vld [vmem:[#allocation5 + $0x11c4] ss:$48 sps:$4 sm:$0xff]  }
 0x3bd   :  { %8615 = vmatprep.subr.bf16.mxu0 %v11780_v3  ;;  %8873 = vmatprep.subr.bf16.mxu1 %v11783_v4  ;;  %v11861_v3 = vld [vmem:[#allocation5 + $0x11cc] ss:$48 sps:$4 sm:$0xff]   ;;  %v11856_v4 = vld [vmem:[#allocation5 + $0x11c0] ss:$48 sps:$4 sm:$0xff]  }
 0x3c0   :  { %8616 = vmatpush1.bf16.msra.mxu0 %v11778_v6  ;;  %8874 = vmatpush1.bf16.msra.mxu1 %v11781_v7  ;;  %v11864_v6 = vld [vmem:[#allocation5 + $0x1224] ss:$48 sps:$4 sm:$0xff]   ;;  %v11867_v7 = vld [vmem:[#allocation5 + $0x122c] ss:$48 sps:$4 sm:$0xff]  }
 0x3c1   :  { %8617 = vmatprep.subr.bf16.mxu0 %v11786_v8  ;;  %8875 = vmatprep.subr.bf16.mxu1 %v11789_v9  ;;  %v1223_v8 = vld [vmem:[#allocation7 + $0x10] sm:$0x77]  ;;  %v12428_v9 = vld [vmem:[#allocation7 + $0x18] sm:$0x77] }
 0x3c4   :  { %8618 = vmatpush1.bf16.msra.mxu0 %v11784_v10  ;;  %8876 = vmatpush1.bf16.msra.mxu1 %v11787_v11  ;;  %v11862_v10 = vld [vmem:[#allocation5 + $0x1220] ss:$48 sps:$4 sm:$0xff]   ;;  %v11865_v11 = vld [vmem:[#allocation5 + $0x1228] ss:$48 sps:$4 sm:$0xff]  }
 0x3c5   :  { %8619 = vmatprep.subr.bf16.mxu0 %v11792_v12  ;;  %8877 = vmatprep.subr.bf16.mxu1 %v11795_v13  ;;  %v11870_v12 = vld [vmem:[#allocation5 + $0x1284] ss:$48 sps:$4 sm:$0xff]   ;;  %v11873_v13 = vld [vmem:[#allocation5 + $0x128c] ss:$48 sps:$4 sm:$0xff]  }
 0x3c8   :  { %8620 = vmatpush1.bf16.msra.mxu0 %v11790_v14  ;;  %8878 = vmatpush1.bf16.msra.mxu1 %v11793_v15  ;;  %v1264_v14 = vrot.slane %v1223_v8, %v12354_v26  ;;  %v1272_v15 = vrot.slane %v12428_v9, %v12354_v26 }
 0x3c9   :  { %8621 = vmatprep.subr.bf16.mxu0 %v11798_v16  ;;  %8879 = vmatprep.subr.bf16.mxu1 %v11801_v17  ;;  %v12167_v16 = vld [vmem:[#allocation2 + $0x10] ss:$48 sps:$4 sm:$0xff]   ;;  %v1268_v17 = vrot.slane %v1223_v8, %v12356_v28 }
 0x3cc   :  { %8622 = vmatpush1.bf16.msra.mxu0 %v11796_v19  ;;  %8880 = vmatpush1.bf16.msra.mxu1 %v11799_v20  ;;  %v11868_v19 = vld [vmem:[#allocation5 + $0x1280] ss:$48 sps:$4 sm:$0xff]   ;;  %v11871_v20 = vld [vmem:[#allocation5 + $0x1288] ss:$48 sps:$4 sm:$0xff]  }
 0x3cd   :  { %8623 = vmatprep.subr.bf16.mxu0 %v11804_v21  ;;  %8881 = vmatprep.subr.bf16.mxu1 %v11807_v22  ;;  %v1276_v21 = vrot.slane %v12428_v9, %v12356_v28  ;;  %v11876_v22 = vld [vmem:[#allocation5 + $0x12e4] ss:$48 sps:$4 sm:$0xff]  }
 0x3d0   :  { %8624 = vmatpush1.bf16.msra.mxu0 %v11802_v23  ;;  %8882 = vmatpush1.bf16.msra.mxu1 %v11805_v24  ;;  %v11879_v23 = vld [vmem:[#allocation5 + $0x12ec] ss:$48 sps:$4 sm:$0xff]   ;;  %v1324_v24 = vrot.slane %v1264_v14, %v12354_v26 }
 0x3d1   :  { %8625 = vmatprep.subr.bf16.mxu0 %v11810_v25  ;;  %8883 = vmatprep.subr.bf16.mxu1 %v11813_v27  ;;  %v1396_v25 = vrot.slane %v1223_v8, %v12362_v34  ;;  %v1536_v27 = vrot.slane %v1223_v8, %v12364_v35 }
 0x3d4   :  { %8626 = vmatpush1.bf16.msra.mxu0 %v11808_v29  ;;  %8884 = vmatpush1.bf16.msra.mxu1 %v11811_v30  ;;  %v1332_v29 = vrot.slane %v1272_v15, %v12354_v26  ;;  %v1404_v30 = vrot.slane %v12428_v9, %v12362_v34 }
 0x3d5   :  { %8627 = vmatprep.subr.bf16.mxu0 %v11816_v31  ;;  %8885 = vmatprep.subr.bf16.mxu1 %v11819_v32  ;;  %v12168_v31 = vld [vmem:[#allocation2 + $0x1c] ss:$48 sps:$4 sm:$0xff]   ;;  %v1544_v32 = vrot.slane %v12428_v9, %v12364_v35 }
 0x3d8   :  { %8628 = vmatpush1.bf16.msra.mxu0 %v11814_v33  ;;  %8886 = vmatpush1.bf16.msra.mxu1 %v11817_v36  ;;  %v1328_v33 = vrot.slane %v1268_v17, %v12354_v26  ;;  %v1400_v36 = vrot.slane %v1223_v8, %v12370_v39  ;;  %v11894_v17 = vld [vmem:[#allocation5 + $0x1404] ss:$48 sps:$4 sm:$0xff]  }
 0x3d9   :  { %8629 = vmatprep.subr.bf16.mxu0 %v11822_v37  ;;  %8887 = vmatprep.subr.bf16.mxu1 %v11825_v38  ;;  %v1540_v37 = vrot.slane %v1223_v8, %v12372_v40  ;;  %v11874_v38 = vld [vmem:[#allocation5 + $0x12e0] ss:$48 sps:$4 sm:$0xff]  }
 0x3dc   :  { %8630 = vmatpush1.bf16.msra.mxu0 %v11820_v41  ;;  %8888 = vmatpush1.bf16.msra.mxu1 %v11823_v42  ;;  %v11877_v41 = vld [vmem:[#allocation5 + $0x12e8] ss:$48 sps:$4 sm:$0xff]   ;;  %v1336_v42 = vrot.slane %v1276_v21, %v12354_v26 }
 0x3dd   :  { %8631 = vmatprep.subr.bf16.mxu0 %v11828_v44  ;;  %8889 = vmatprep.subr.bf16.mxu1 %v11831_v45  ;;  %v1408_v44 = vrot.slane %v12428_v9, %v12370_v39  ;;  %v1548_v45 = vrot.slane %v12428_v9, %v12372_v40 }
 0x3e0   :  { %8632 = vmatpush1.bf16.msra.mxu0 %v11826_v46  ;;  %8890 = vmatpush1.bf16.msra.mxu1 %v11829_v47  ;;  %v11882_v46 = vld [vmem:[#allocation5 + $0x1344] ss:$48 sps:$4 sm:$0xff]   ;;  %v11885_v47 = vld [vmem:[#allocation5 + $0x134c] ss:$48 sps:$4 sm:$0xff]  }
 0x3e1   :  { %8633 = vmatprep.subr.bf16.mxu0 %v11834_v48  ;;  %8891 = vmatprep.subr.bf16.mxu1 %v11837_v49  ;;  %v1357_v48 = vmul.f32 %v1324_v24, %v12374_v43  ;;  %v1456_v49 = vrot.slane %v1396_v25, %v12362_v34 }
 0x3e4   :  { %8634 = vmatpush1.bf16.msra.mxu0 %v11832_v50  ;;  %8892 = vmatpush1.bf16.msra.mxu1 %v11835_v51  ;;  %v1596_v50 = vrot.slane %v1536_v27, %v12364_v35  ;;  %v1359_v51 = vmul.f32 %v1332_v29, %v12374_v43 }
 0x3e5   :  { %8635 = vmatprep.subr.bf16.mxu0 %v11840_v52  ;;  %8893 = vmatprep.subr.bf16.mxu1 %v11843_v54  ;;  %v1464_v52 = vrot.slane %v1404_v30, %v12362_v34  ;;  %v1604_v54 = vrot.slane %v1544_v32, %v12364_v35 }
 0x3e7   :  { %v1491_v8 = vadd.f32 %v1464_v52, %v1359_v51  ;;  %v1631_v9 = vmul.f32 %v1604_v54, %v12387_v53 }
 0x3e8   :  { %8636 = vmatpush1.bf16.msra.mxu0 %v11838_v55  ;;  %8894 = vmatpush1.bf16.msra.mxu1 %v11841_v56  ;;  %v1358_v55 = vmul.f32 %v1328_v33, %v12374_v43  ;;  %v1460_v56 = vrot.slane %v1400_v36, %v12362_v34  ;;  %v11895_v36 = vld [vmem:[#allocation5 + $0x1408] ss:$48 sps:$4 sm:$0xff]  }
 0x3e9   :  { %8637 = vmatprep.subr.bf16.mxu0 %v11846_v57  ;;  %8895 = vmatprep.subr.bf16.mxu1 %v11849_v58  ;;  %v1600_v57 = vrot.slane %v1540_v37, %v12364_v35  ;;  %v11880_v58 = vld [vmem:[#allocation5 + $0x1340] ss:$48 sps:$4 sm:$0xff]   ;;  %v1655_v30 = vadd.f32 %v1631_v9, %v1491_v8  ;;  %v11913_v9 = vld [vmem:[#allocation5 + $0x1528] ss:$48 sps:$4 sm:$0xff]  }
 0x3ea   :  { %v11910_v8 = vld [vmem:[#allocation5 + $0x1520] ss:$48 sps:$4 sm:$0xff]  }
 0x3ec   :  { %8638 = vmatpush1.bf16.msra.mxu0 %v11844_v59  ;;  %8896 = vmatpush1.bf16.msra.mxu1 %v11847_v60  ;;  %v11883_v59 = vld [vmem:[#allocation5 + $0x1348] ss:$48 sps:$4 sm:$0xff]   ;;  %v1360_v60 = vmul.f32 %v1336_v42, %v12374_v43 }
 0x3ed   :  { %8639 = vmatprep.subr.bf16.mxu0 %v11852_v61  ;;  %8897 = vmatprep.subr.bf16.mxu1 %v11855_v62  ;;  %v1468_v61 = vrot.slane %v1408_v44, %v12362_v34  ;;  %v1608_v62 = vrot.slane %v1548_v45, %v12364_v35 }
 0x3ef   :  { %v1492_v14 = vadd.f32 %v1468_v61, %v1360_v60  ;;  %v1632_v15 = vmul.f32 %v1608_v62, %v12387_v53  ;;  %v1644_v27 = vmul.f32 %v1608_v62, %v12414_v18 }
 0x3f0   :  { %8640 = vmatpush1.bf16.msra.mxu0 %v11850_v63  ;;  %8898 = vmatpush1.bf16.msra.mxu1 %v11853_v0  ;;  %v11888_v63 = vld [vmem:[#allocation5 + $0x13a4] ss:$48 sps:$4 sm:$0xff]   ;;  %v11891_v0 = vld [vmem:[#allocation5 + $0x13ac] ss:$48 sps:$4 sm:$0xff]  }
 0x3f1   :  { %8641 = vmatprep.subr.bf16.mxu0 %v11858_v1  ;;  %8899 = vmatprep.subr.bf16.mxu1 %v11861_v3  ;;  %v1369_v1 = vmul.f32 %v1324_v24, %v12401_v2  ;;  %v1371_v3 = vmul.f32 %v1332_v29, %v12401_v2  ;;  %v1642_v24 = vmul.f32 %v1600_v57, %v12414_v18 }
 0x3f2   :  { %v1656_v32 = vadd.f32 %v1632_v15, %v1492_v14  ;;  %v11924_v14 = vld [vmem:[#allocation5 + $0x15e4] ss:$48 sps:$4 sm:$0xff]   ;;  %v11927_v15 = vld [vmem:[#allocation5 + $0x15ec] ss:$48 sps:$4 sm:$0xff]  }
 0x3f3   :  { %v1503_v21 = vadd.f32 %v1464_v52, %v1371_v3 }
 0x3f4   :  { %8642 = vmatpush1.bf16.msra.mxu0 %v11856_v4  ;;  %8900 = vmatpush1.bf16.msra.mxu1 %v11859_v5  ;;  %v1489_v4 = vadd.f32 %v1456_v49, %v1357_v48  ;;  %v1629_v5 = vmul.f32 %v1596_v50, %v12387_v53 }
 0x3f5   :  { %8654 = vmatprep.subr.bf16.mxu0 %v11864_v6  ;;  %8912 = vmatprep.subr.bf16.mxu1 %v11867_v7  ;;  %v1370_v6 = vmul.f32 %v1328_v33, %v12401_v2  ;;  %v1372_v7 = vmul.f32 %v1336_v42, %v12401_v2  ;;  %v11892_v33 = vld [vmem:[#allocation5 + $0x1400] ss:$48 sps:$4 sm:$0xff]   ;;  %v11903_v42 = vld [vmem:[#allocation5 + $0x146c] ss:$48 sps:$4 sm:$0xff]  }
 0x3f6   :  { %v1653_v29 = vadd.f32 %v1629_v5, %v1489_v4  ;;  %v11904_v4 = vld [vmem:[#allocation5 + $0x14c0] ss:$48 sps:$4 sm:$0xff]   ;;  %v11907_v5 = vld [vmem:[#allocation5 + $0x14c8] ss:$48 sps:$4 sm:$0xff]  }
 0x3f7   :  { %8644 = vmatmul.mubr.bf16.vlgmr.msra.gmra.mrb[8].mxu0 %v12167_v16  ;;  %8902 = vmatmul.mubr.bf16.vlgmr.msra.gmra.mrb[8].mxu1 %v12167_v16  ;;  %v1641_v16 = vmul.f32 %v1596_v50, %v12414_v18  ;;  %v1504_v25 = vadd.f32 %v1468_v61, %v1372_v7  ;;  %v11915_v7 = vld [vmem:[#allocation5 + $0x152c] ss:$48 sps:$4 sm:$0xff]  }
 0x3f8   :  { %8655 = vmatpush1.bf16.msra.mxu0 %v11862_v10  ;;  %8913 = vmatpush1.bf16.msra.mxu1 %v11865_v11  ;;  %v1490_v10 = vadd.f32 %v1460_v56, %v1358_v55  ;;  %v1630_v11 = vmul.f32 %v1600_v57, %v12387_v53  ;;  %v11898_v57 = vld [vmem:[#allocation5 + $0x1460] ss:$48 sps:$4 sm:$0xff]  }
 0x3f9   :  { %8656 = vmatprep.subr.bf16.mxu0 %v11870_v12  ;;  %8914 = vmatprep.subr.bf16.mxu1 %v11873_v13  ;;  %v11886_v12 = vld [vmem:[#allocation5 + $0x13a0] ss:$48 sps:$4 sm:$0xff]   ;;  %v11889_v13 = vld [vmem:[#allocation5 + $0x13a8] ss:$48 sps:$4 sm:$0xff]  }
 0x3fa   :  { %8686 = vmatprep.mubr.bf16.mxu0 %v12168_v31  ;;  %8944 = vmatprep.mubr.bf16.mxu1 %v12168_v31  ;;  %v1654_v31 = vadd.f32 %v1630_v11, %v1490_v10  ;;  %v11918_v10 = vld [vmem:[#allocation5 + $0x1584] ss:$48 sps:$4 sm:$0xff]   ;;  %v11921_v11 = vld [vmem:[#allocation5 + $0x158c] ss:$48 sps:$4 sm:$0xff]  }
 0x3fc   :  { %8657 = vmatpush1.bf16.msra.mxu0 %v11868_v19  ;;  %8915 = vmatpush1.bf16.msra.mxu1 %v11871_v20  ;;  %v11897_v19 = vld [vmem:[#allocation5 + $0x140c] ss:$48 sps:$4 sm:$0xff]   ;;  %v1501_v20 = vadd.f32 %v1456_v49, %v1369_v1 }
 0x3fd   :  { %8658 = vmatprep.subr.bf16.mxu0 %v11876_v22  ;;  %8916 = vmatprep.subr.bf16.mxu1 %v11879_v23  ;;  %v1643_v22 = vmul.f32 %v1604_v54, %v12414_v18  ;;  %v1502_v23 = vadd.f32 %v1460_v56, %v1370_v6  ;;  %v11912_v6 = vld [vmem:[#allocation5 + $0x1524] ss:$48 sps:$4 sm:$0xff]  }
 0x3fe   :  { %v1665_v37 = vadd.f32 %v1641_v16, %v1501_v20  ;;  %v11922_v16 = vld [vmem:[#allocation5 + $0x15e0] ss:$48 sps:$4 sm:$0xff]   ;;  %v11933_v20 = vld [vmem:[#allocation5 + $0x164c] ss:$48 sps:$4 sm:$0xff]  }
 0x400   :  { %8659 = vmatpush1.bf16.msra.mxu0 %v11874_v38  ;;  %8917 = vmatpush1.bf16.msra.mxu1 %v11877_v41  ;;  %v1667_v38 = vadd.f32 %v1643_v22, %v1503_v21  ;;  %v11900_v41 = vld [vmem:[#allocation5 + $0x1464] ss:$48 sps:$4 sm:$0xff]   ;;  %v11928_v21 = vld [vmem:[#allocation5 + $0x1640] ss:$48 sps:$4 sm:$0xff]   ;;  %v11931_v22 = vld [vmem:[#allocation5 + $0x1648] ss:$48 sps:$4 sm:$0xff]  }
 0x401   :  { %8660 = vmatprep.subr.bf16.mxu0 %v11882_v46  ;;  %8918 = vmatprep.subr.bf16.mxu1 %v11885_v47  ;;  %v1666_v46 = vadd.f32 %v1642_v24, %v1502_v23  ;;  %v1668_v47 = vadd.f32 %v1644_v27, %v1504_v25  ;;  %v11936_v23 = vld [vmem:[#allocation5 + $0x16a4] ss:$48 sps:$4 sm:$0xff]   ;;  %v11939_v24 = vld [vmem:[#allocation5 + $0x16ac] ss:$48 sps:$4 sm:$0xff]   ;;  %v11934_v25 = vld [vmem:[#allocation5 + $0x16a0] ss:$48 sps:$4 sm:$0xff]  }
 0x402   :  { %v11937_v27 = vld [vmem:[#allocation5 + $0x16a8] ss:$48 sps:$4 sm:$0xff]  }
 0x404   :  { %8661 = vmatpush1.bf16.msra.mxu0 %v11880_v58  ;;  %8919 = vmatpush1.bf16.msra.mxu1 %v11883_v59  ;;  %v11901_v58 = vld [vmem:[#allocation5 + $0x1468] ss:$48 sps:$4 sm:$0xff]  }
 0x405   :  { %8662 = vmatprep.subr.bf16.mxu0 %v11888_v63  ;;  %8920 = vmatprep.subr.bf16.mxu1 %v11891_v0  ;;  %v11906_v63 = vld [vmem:[#allocation5 + $0x14c4] ss:$48 sps:$4 sm:$0xff]   ;;  %v11909_v0 = vld [vmem:[#allocation5 + $0x14cc] ss:$48 sps:$4 sm:$0xff]  }
 0x408   :  { %8663 = vmatpush1.bf16.msra.mxu0 %v11886_v12  ;;  %8921 = vmatpush1.bf16.msra.mxu1 %v11889_v13  ;;  %v11916_v12 = vld [vmem:[#allocation5 + $0x1580] ss:$48 sps:$4 sm:$0xff]   ;;  %v11919_v13 = vld [vmem:[#allocation5 + $0x1588] ss:$48 sps:$4 sm:$0xff]  }
 0x409   :  { %8664 = vmatprep.subr.bf16.mxu0 %v11894_v17  ;;  %8922 = vmatprep.subr.bf16.mxu1 %v11897_v19  ;;  %v11925_v17 = vld [vmem:[#allocation5 + $0x15e8] ss:$48 sps:$4 sm:$0xff]   ;;  %v11930_v19 = vld [vmem:[#allocation5 + $0x1644] ss:$48 sps:$4 sm:$0xff]  }
 0x40a   :  { %v8258_v44 = vpop.f32.mrb[4].mxu0  ;;  %v8516_v45 = vpop.f32.mrb[4].mxu1 }
 0x40b   :  { %v10255_v48 = vadd.f32 %v8258_v44, %v1653_v29  ;;  %v10259_v49 = vadd.f32 %v8516_v45, %v1655_v30  ;;  %v8260_v50 = vpop.f32.mrb[5].mxu0  ;;  %v8518_v51 = vpop.f32.mrb[5].mxu1  ;;  %v11942_v29 = vld [vmem:[#allocation5 + $0x1704] ss:$48 sps:$4 sm:$0xff]   ;;  %v11945_v30 = vld [vmem:[#allocation5 + $0x170c] ss:$48 sps:$4 sm:$0xff]  }
 0x40c   :  { %v10256_v52 = vadd.f32 %v8260_v50, %v1654_v31  ;;  %v10260_v54 = vadd.f32 %v8518_v51, %v1656_v32  ;;  %v8262_v55 = vpop.f32.mrb[6].mxu0  ;;  %v8520_v56 = vpop.f32.mrb[6].mxu1  ;;  %8665 = vmatpush1.bf16.msra.mxu0 %v11892_v33  ;;  %8923 = vmatpush1.bf16.msra.mxu1 %v11895_v36  ;;  %v11940_v31 = vld [vmem:[#allocation5 + $0x1700] ss:$48 sps:$4 sm:$0xff]   ;;  %v11943_v32 = vld [vmem:[#allocation5 + $0x1708] ss:$48 sps:$4 sm:$0xff]  }
 0x40d   :  { %9045 = vst [vmem:[#allocation8 + $0x20] sm:$0xff] %v10255_v48  ;;  %9047 = vst [vmem:[#allocation8 + $0x30] sm:$0xff] %v10259_v49  ;;  %v10257_v59 = vadd.f32 %v8262_v55, %v1665_v37  ;;  %v10261_v60 = vadd.f32 %v8520_v56, %v1667_v38  ;;  %v8264_v61 = vpop.f32.mrb[7].mxu0  ;;  %v8522_v62 = vpop.f32.mrb[7].mxu1  ;;  %8666 = vmatprep.subr.bf16.mxu0 %v11900_v41  ;;  %8924 = vmatprep.subr.bf16.mxu1 %v11903_v42  ;;  %v11948_v33 = vld [vmem:[#allocation5 + $0x1764] ss:$48 sps:$4 sm:$0xff]  }
 0x40e   :  { %9046 = vst [vmem:[#allocation8 + $0x28] sm:$0xff] %v10256_v52  ;;  %9048 = vst [vmem:[#allocation8 + $0x38] sm:$0xff] %v10260_v54  ;;  %v10258_v1 = vadd.f32 %v8264_v61, %v1666_v46  ;;  %v10262_v3 = vadd.f32 %v8522_v62, %v1668_v47  ;;  %v11951_v36 = vld [vmem:[#allocation5 + $0x176c] ss:$48 sps:$4 sm:$0xff]   ;;  %v11946_v37 = vld [vmem:[#allocation5 + $0x1760] ss:$48 sps:$4 sm:$0xff]  }
 0x40f   :  { %9057 = vst [vmem:[#allocation8 + $0x80] sm:$0xff] %v10257_v59  ;;  %9059 = vst [vmem:[#allocation8 + $0x90] sm:$0xff] %v10261_v60  ;;  %v11949_v38 = vld [vmem:[#allocation5 + $0x1768] ss:$48 sps:$4 sm:$0xff]   ;;  %v11954_v41 = vld [vmem:[#allocation5 + $0x17c4] ss:$48 sps:$4 sm:$0xff]  }
 0x410   :  { %9058 = vst [vmem:[#allocation8 + $0x88] sm:$0xff] %v10258_v1  ;;  %9060 = vst [vmem:[#allocation8 + $0x98] sm:$0xff] %v10262_v3  ;;  %8667 = vmatpush1.bf16.msra.mxu0 %v11898_v57  ;;  %8925 = vmatpush1.bf16.msra.mxu1 %v11901_v58  ;;  %v11957_v42 = vld [vmem:[#allocation5 + $0x17cc] ss:$48 sps:$4 sm:$0xff]   ;;  %v11952_v44 = vld [vmem:[#allocation5 + $0x17c0] ss:$48 sps:$4 sm:$0xff]  }
 0x411   :  { %8668 = vmatprep.subr.bf16.mxu0 %v11906_v63  ;;  %8926 = vmatprep.subr.bf16.mxu1 %v11909_v0  ;;  %v11955_v45 = vld [vmem:[#allocation5 + $0x17c8] ss:$48 sps:$4 sm:$0xff]   ;;  %v11960_v46 = vld [vmem:[#allocation5 + $0x1824] ss:$48 sps:$4 sm:$0xff]   ;;  %v11963_v47 = vld [vmem:[#allocation5 + $0x182c] ss:$48 sps:$4 sm:$0xff]  }
 0x412   :  { %v11958_v48 = vld [vmem:[#allocation5 + $0x1820] ss:$48 sps:$4 sm:$0xff]   ;;  %v11961_v49 = vld [vmem:[#allocation5 + $0x1828] ss:$48 sps:$4 sm:$0xff]   ;;  %v11966_v50 = vld [vmem:[#allocation5 + $0x1884] ss:$48 sps:$4 sm:$0xff]  }
 0x413   :  { %v11969_v51 = vld [vmem:[#allocation5 + $0x188c] ss:$48 sps:$4 sm:$0xff]   ;;  %v12169_v52 = vld [vmem:[#allocation2 + $0x18] ss:$48 sps:$4 sm:$0xff]   ;;  %v11964_v54 = vld [vmem:[#allocation5 + $0x1880] ss:$48 sps:$4 sm:$0xff]  }
 0x414   :  { %8669 = vmatpush1.bf16.msra.mxu0 %v11904_v4  ;;  %8927 = vmatpush1.bf16.msra.mxu1 %v11907_v5  ;;  %v11967_v55 = vld [vmem:[#allocation5 + $0x1888] ss:$48 sps:$4 sm:$0xff]   ;;  %v11972_v56 = vld [vmem:[#allocation5 + $0x18e4] ss:$48 sps:$4 sm:$0xff]   ;;  %v11975_v57 = vld [vmem:[#allocation5 + $0x18ec] ss:$48 sps:$4 sm:$0xff]  }
 0x415   :  { %8670 = vmatprep.subr.bf16.mxu0 %v11912_v6  ;;  %8928 = vmatprep.subr.bf16.mxu1 %v11915_v7  ;;  %v12170_v58 = vld [vmem:[#allocation2 + $0x24] ss:$48 sps:$4 sm:$0xff]   ;;  %v11970_v59 = vld [vmem:[#allocation5 + $0x18e0] ss:$48 sps:$4 sm:$0xff]   ;;  %v11973_v60 = vld [vmem:[#allocation5 + $0x18e8] ss:$48 sps:$4 sm:$0xff]  }
 0x416   :  { %v11978_v61 = vld [vmem:[#allocation5 + $0x1944] ss:$48 sps:$4 sm:$0xff]   ;;  %v11981_v62 = vld [vmem:[#allocation5 + $0x194c] ss:$48 sps:$4 sm:$0xff]   ;;  %v11976_v63 = vld [vmem:[#allocation5 + $0x1940] ss:$48 sps:$4 sm:$0xff]  }
 0x417   :  { %v11979_v0 = vld [vmem:[#allocation5 + $0x1948] ss:$48 sps:$4 sm:$0xff]   ;;  %v11984_v1 = vld [vmem:[#allocation5 + $0x19a4] ss:$48 sps:$4 sm:$0xff]   ;;  %v11987_v3 = vld [vmem:[#allocation5 + $0x19ac] ss:$48 sps:$4 sm:$0xff]  }
 0x418   :  { %8671 = vmatpush1.bf16.msra.mxu0 %v11910_v8  ;;  %8929 = vmatpush1.bf16.msra.mxu1 %v11913_v9  ;;  %v11982_v4 = vld [vmem:[#allocation5 + $0x19a0] ss:$48 sps:$4 sm:$0xff]   ;;  %v11985_v5 = vld [vmem:[#allocation5 + $0x19a8] ss:$48 sps:$4 sm:$0xff]   ;;  %v11990_v6 = vld [vmem:[#allocation5 + $0x1a04] ss:$48 sps:$4 sm:$0xff]  }
 0x419   :  { %8672 = vmatprep.subr.bf16.mxu0 %v11918_v10  ;;  %8930 = vmatprep.subr.bf16.mxu1 %v11921_v11  ;;  %v11993_v7 = vld [vmem:[#allocation5 + $0x1a0c] ss:$48 sps:$4 sm:$0xff]   ;;  %v11988_v8 = vld [vmem:[#allocation5 + $0x1a00] ss:$48 sps:$4 sm:$0xff]   ;;  %v11991_v9 = vld [vmem:[#allocation5 + $0x1a08] ss:$48 sps:$4 sm:$0xff]  }
 0x41a   :  { %v11996_v10 = vld [vmem:[#allocation5 + $0x1a64] ss:$48 sps:$4 sm:$0xff]   ;;  %v11999_v11 = vld [vmem:[#allocation5 + $0x1a6c] ss:$48 sps:$4 sm:$0xff]  }
 0x41c   :  { %8673 = vmatpush1.bf16.msra.mxu0 %v11916_v12  ;;  %8931 = vmatpush1.bf16.msra.mxu1 %v11919_v13  ;;  %v11994_v12 = vld [vmem:[#allocation5 + $0x1a60] ss:$48 sps:$4 sm:$0xff]   ;;  %v11997_v13 = vld [vmem:[#allocation5 + $0x1a68] ss:$48 sps:$4 sm:$0xff]  }
 0x41d   :  { %8674 = vmatprep.subr.bf16.mxu0 %v11924_v14  ;;  %8932 = vmatprep.subr.bf16.mxu1 %v11927_v15  ;;  %v12002_v14 = vld [vmem:[#allocation5 + $0x1ac4] ss:$48 sps:$4 sm:$0xff]   ;;  %v12005_v15 = vld [vmem:[#allocation5 + $0x1acc] ss:$48 sps:$4 sm:$0xff]  }
 0x420   :  { %8675 = vmatpush1.bf16.msra.mxu0 %v11922_v16  ;;  %8933 = vmatpush1.bf16.msra.mxu1 %v11925_v17  ;;  %v12000_v16 = vld [vmem:[#allocation5 + $0x1ac0] ss:$48 sps:$4 sm:$0xff]   ;;  %v12003_v17 = vld [vmem:[#allocation5 + $0x1ac8] ss:$48 sps:$4 sm:$0xff]  }
 0x421   :  { %8676 = vmatprep.subr.bf16.mxu0 %v11930_v19  ;;  %8934 = vmatprep.subr.bf16.mxu1 %v11933_v20  ;;  %v12008_v19 = vld [vmem:[#allocation5 + $0x1b24] ss:$48 sps:$4 sm:$0xff]   ;;  %v12011_v20 = vld [vmem:[#allocation5 + $0x1b2c] ss:$48 sps:$4 sm:$0xff]  }
 0x424   :  { %8677 = vmatpush1.bf16.msra.mxu0 %v11928_v21  ;;  %8935 = vmatpush1.bf16.msra.mxu1 %v11931_v22  ;;  %v12006_v21 = vld [vmem:[#allocation5 + $0x1b20] ss:$48 sps:$4 sm:$0xff]   ;;  %v12009_v22 = vld [vmem:[#allocation5 + $0x1b28] ss:$48 sps:$4 sm:$0xff]  }
 0x425   :  { %8678 = vmatprep.subr.bf16.mxu0 %v11936_v23  ;;  %8936 = vmatprep.subr.bf16.mxu1 %v11939_v24  ;;  %v12014_v23 = vld [vmem:[#allocation5 + $0x1b84] ss:$48 sps:$4 sm:$0xff]   ;;  %v12017_v24 = vld [vmem:[#allocation5 + $0x1b8c] ss:$48 sps:$4 sm:$0xff]  }
 0x428   :  { %8679 = vmatpush1.bf16.msra.mxu0 %v11934_v25  ;;  %8937 = vmatpush1.bf16.msra.mxu1 %v11937_v27  ;;  %v12012_v25 = vld [vmem:[#allocation5 + $0x1b80] ss:$48 sps:$4 sm:$0xff]   ;;  %v12015_v27 = vld [vmem:[#allocation5 + $0x1b88] ss:$48 sps:$4 sm:$0xff]  }
 0x429   :  { %8680 = vmatprep.subr.bf16.mxu0 %v11942_v29  ;;  %8938 = vmatprep.subr.bf16.mxu1 %v11945_v30  ;;  %v12020_v29 = vld [vmem:[#allocation5 + $0x1be4] ss:$48 sps:$4 sm:$0xff]   ;;  %v12023_v30 = vld [vmem:[#allocation5 + $0x1bec] ss:$48 sps:$4 sm:$0xff]  }
 0x42c   :  { %8681 = vmatpush1.bf16.msra.mxu0 %v11940_v31  ;;  %8939 = vmatpush1.bf16.msra.mxu1 %v11943_v32  ;;  %v12018_v31 = vld [vmem:[#allocation5 + $0x1be0] ss:$48 sps:$4 sm:$0xff]   ;;  %v12021_v32 = vld [vmem:[#allocation5 + $0x1be8] ss:$48 sps:$4 sm:$0xff]  }
 0x42d   :  { %8682 = vmatprep.subr.bf16.mxu0 %v11948_v33  ;;  %8940 = vmatprep.subr.bf16.mxu1 %v11951_v36  ;;  %v12026_v33 = vld [vmem:[#allocation5 + $0x1c44] ss:$48 sps:$4 sm:$0xff]   ;;  %v12029_v36 = vld [vmem:[#allocation5 + $0x1c4c] ss:$48 sps:$4 sm:$0xff]  }
 0x430   :  { %8683 = vmatpush1.bf16.msra.mxu0 %v11946_v37  ;;  %8941 = vmatpush1.bf16.msra.mxu1 %v11949_v38  ;;  %v12024_v37 = vld [vmem:[#allocation5 + $0x1c40] ss:$48 sps:$4 sm:$0xff]   ;;  %v12027_v38 = vld [vmem:[#allocation5 + $0x1c48] ss:$48 sps:$4 sm:$0xff]  }
 0x431   :  { %8684 = vmatprep.subr.bf16.mxu0 %v11954_v41  ;;  %8942 = vmatprep.subr.bf16.mxu1 %v11957_v42  ;;  %v12032_v41 = vld [vmem:[#allocation5 + $0x1ca4] ss:$48 sps:$4 sm:$0xff]   ;;  %v12035_v42 = vld [vmem:[#allocation5 + $0x1cac] ss:$48 sps:$4 sm:$0xff]  }
 0x434   :  { %8685 = vmatpush1.bf16.msra.mxu0 %v11952_v44  ;;  %8943 = vmatpush1.bf16.msra.mxu1 %v11955_v45  ;;  %v12030_v44 = vld [vmem:[#allocation5 + $0x1ca0] ss:$48 sps:$4 sm:$0xff]   ;;  %v12033_v45 = vld [vmem:[#allocation5 + $0x1ca8] ss:$48 sps:$4 sm:$0xff]  }
 0x435   :  { %8697 = vmatprep.subr.bf16.mxu0 %v11960_v46  ;;  %8955 = vmatprep.subr.bf16.mxu1 %v11963_v47  ;;  %v12038_v46 = vld [vmem:[#allocation5 + $0x1d04] ss:$48 sps:$4 sm:$0xff]   ;;  %v12041_v47 = vld [vmem:[#allocation5 + $0x1d0c] ss:$48 sps:$4 sm:$0xff]  }
 0x437   :  { %8687 = vmatmul.mubr.bf16.vlgmr.msra.gmra.mrb[8].mxu0 %v12169_v52  ;;  %8945 = vmatmul.mubr.bf16.vlgmr.msra.gmra.mrb[8].mxu1 %v12169_v52  ;;  %v12042_v52 = vld [vmem:[#allocation5 + $0x1d60] ss:$48 sps:$4 sm:$0xff]  }
 0x438   :  { %8698 = vmatpush1.bf16.msra.mxu0 %v11958_v48  ;;  %8956 = vmatpush1.bf16.msra.mxu1 %v11961_v49  ;;  %v12036_v48 = vld [vmem:[#allocation5 + $0x1d00] ss:$48 sps:$4 sm:$0xff]   ;;  %v12039_v49 = vld [vmem:[#allocation5 + $0x1d08] ss:$48 sps:$4 sm:$0xff]  }
 0x439   :  { %8699 = vmatprep.subr.bf16.mxu0 %v11966_v50  ;;  %8957 = vmatprep.subr.bf16.mxu1 %v11969_v51  ;;  %v12044_v50 = vld [vmem:[#allocation5 + $0x1d64] ss:$48 sps:$4 sm:$0xff]   ;;  %v12047_v51 = vld [vmem:[#allocation5 + $0x1d6c] ss:$48 sps:$4 sm:$0xff]  }
 0x43a   :  { %8729 = vmatprep.mubr.bf16.mxu0 %v12170_v58  ;;  %8987 = vmatprep.mubr.bf16.mxu1 %v12170_v58  ;;  %v12051_v58 = vld [vmem:[#allocation5 + $0x1dc8] ss:$48 sps:$4 sm:$0xff]  }
 0x43c   :  { %8700 = vmatpush1.bf16.msra.mxu0 %v11964_v54  ;;  %8958 = vmatpush1.bf16.msra.mxu1 %v11967_v55  ;;  %v12045_v54 = vld [vmem:[#allocation5 + $0x1d68] ss:$48 sps:$4 sm:$0xff]   ;;  %v12050_v55 = vld [vmem:[#allocation5 + $0x1dc4] ss:$48 sps:$4 sm:$0xff]  }
 0x43d   :  { %8701 = vmatprep.subr.bf16.mxu0 %v11972_v56  ;;  %8959 = vmatprep.subr.bf16.mxu1 %v11975_v57  ;;  %v12053_v56 = vld [vmem:[#allocation5 + $0x1dcc] ss:$48 sps:$4 sm:$0xff]   ;;  %v12048_v57 = vld [vmem:[#allocation5 + $0x1dc0] ss:$48 sps:$4 sm:$0xff]  }
 0x440   :  { %8702 = vmatpush1.bf16.msra.mxu0 %v11970_v59  ;;  %8960 = vmatpush1.bf16.msra.mxu1 %v11973_v60  ;;  %v12056_v59 = vld [vmem:[#allocation5 + $0x1e24] ss:$48 sps:$4 sm:$0xff]   ;;  %v12059_v60 = vld [vmem:[#allocation5 + $0x1e2c] ss:$48 sps:$4 sm:$0xff]  }
 0x441   :  { %8703 = vmatprep.subr.bf16.mxu0 %v11978_v61  ;;  %8961 = vmatprep.subr.bf16.mxu1 %v11981_v62  ;;  %v12054_v61 = vld [vmem:[#allocation5 + $0x1e20] ss:$48 sps:$4 sm:$0xff]   ;;  %v12057_v62 = vld [vmem:[#allocation5 + $0x1e28] ss:$48 sps:$4 sm:$0xff]  }
 0x444   :  { %8704 = vmatpush1.bf16.msra.mxu0 %v11976_v63  ;;  %8962 = vmatpush1.bf16.msra.mxu1 %v11979_v0  ;;  %v12062_v63 = vld [vmem:[#allocation5 + $0x1e84] ss:$48 sps:$4 sm:$0xff]   ;;  %v12065_v0 = vld [vmem:[#allocation5 + $0x1e8c] ss:$48 sps:$4 sm:$0xff]  }
 0x445   :  { %8705 = vmatprep.subr.bf16.mxu0 %v11984_v1  ;;  %8963 = vmatprep.subr.bf16.mxu1 %v11987_v3  ;;  %v12171_v1 = vld [vmem:[#allocation2 + $0x20] ss:$48 sps:$4 sm:$0xff]  }
 0x446   :  { %v12060_v3 = vld [vmem:[#allocation5 + $0x1e80] ss:$48 sps:$4 sm:$0xff]  }
 0x448   :  { %8706 = vmatpush1.bf16.msra.mxu0 %v11982_v4  ;;  %8964 = vmatpush1.bf16.msra.mxu1 %v11985_v5  ;;  %v12063_v4 = vld [vmem:[#allocation5 + $0x1e88] ss:$48 sps:$4 sm:$0xff]   ;;  %v12068_v5 = vld [vmem:[#allocation5 + $0x1ee4] ss:$48 sps:$4 sm:$0xff]  }
 0x449   :  { %8707 = vmatprep.subr.bf16.mxu0 %v11990_v6  ;;  %8965 = vmatprep.subr.bf16.mxu1 %v11993_v7  ;;  %v12071_v6 = vld [vmem:[#allocation5 + $0x1eec] ss:$48 sps:$4 sm:$0xff]  }
 0x44a   :  { %v12172_v7 = vld [vmem:[#allocation2 + $0x2c] ss:$48 sps:$4 sm:$0xff]  }
 0x44c   :  { %8708 = vmatpush1.bf16.msra.mxu0 %v11988_v8  ;;  %8966 = vmatpush1.bf16.msra.mxu1 %v11991_v9  ;;  %v12066_v8 = vld [vmem:[#allocation5 + $0x1ee0] ss:$48 sps:$4 sm:$0xff]   ;;  %v12069_v9 = vld [vmem:[#allocation5 + $0x1ee8] ss:$48 sps:$4 sm:$0xff]  }
 0x44d   :  { %8709 = vmatprep.subr.bf16.mxu0 %v11996_v10  ;;  %8967 = vmatprep.subr.bf16.mxu1 %v11999_v11  ;;  %v12074_v10 = vld [vmem:[#allocation5 + $0x1f44] ss:$48 sps:$4 sm:$0xff]   ;;  %v12077_v11 = vld [vmem:[#allocation5 + $0x1f4c] ss:$48 sps:$4 sm:$0xff]  }
 0x450   :  { %8710 = vmatpush1.bf16.msra.mxu0 %v11994_v12  ;;  %8968 = vmatpush1.bf16.msra.mxu1 %v11997_v13  ;;  %v12072_v12 = vld [vmem:[#allocation5 + $0x1f40] ss:$48 sps:$4 sm:$0xff]   ;;  %v12075_v13 = vld [vmem:[#allocation5 + $0x1f48] ss:$48 sps:$4 sm:$0xff]  }
 0x451   :  { %8711 = vmatprep.subr.bf16.mxu0 %v12002_v14  ;;  %8969 = vmatprep.subr.bf16.mxu1 %v12005_v15  ;;  %v12080_v14 = vld [vmem:[#allocation5 + $0x1fa4] ss:$48 sps:$4 sm:$0xff]   ;;  %v12083_v15 = vld [vmem:[#allocation5 + $0x1fac] ss:$48 sps:$4 sm:$0xff]  }
 0x454   :  { %8712 = vmatpush1.bf16.msra.mxu0 %v12000_v16  ;;  %8970 = vmatpush1.bf16.msra.mxu1 %v12003_v17  ;;  %v12078_v16 = vld [vmem:[#allocation5 + $0x1fa0] ss:$48 sps:$4 sm:$0xff]   ;;  %v12081_v17 = vld [vmem:[#allocation5 + $0x1fa8] ss:$48 sps:$4 sm:$0xff]  }
 0x455   :  { %8713 = vmatprep.subr.bf16.mxu0 %v12008_v19  ;;  %8971 = vmatprep.subr.bf16.mxu1 %v12011_v20  ;;  %v12086_v19 = vld [vmem:[#allocation5 + $0x2004] ss:$48 sps:$4 sm:$0xff]   ;;  %v12089_v20 = vld [vmem:[#allocation5 + $0x200c] ss:$48 sps:$4 sm:$0xff]  }
 0x458   :  { %8714 = vmatpush1.bf16.msra.mxu0 %v12006_v21  ;;  %8972 = vmatpush1.bf16.msra.mxu1 %v12009_v22  ;;  %v12084_v21 = vld [vmem:[#allocation5 + $0x2000] ss:$48 sps:$4 sm:$0xff]   ;;  %v12087_v22 = vld [vmem:[#allocation5 + $0x2008] ss:$48 sps:$4 sm:$0xff]  }
 0x459   :  { %8715 = vmatprep.subr.bf16.mxu0 %v12014_v23  ;;  %8973 = vmatprep.subr.bf16.mxu1 %v12017_v24  ;;  %v12092_v23 = vld [vmem:[#allocation5 + $0x2064] ss:$48 sps:$4 sm:$0xff]   ;;  %v12095_v24 = vld [vmem:[#allocation5 + $0x206c] ss:$48 sps:$4 sm:$0xff]  }
 0x45c   :  { %8716 = vmatpush1.bf16.msra.mxu0 %v12012_v25  ;;  %8974 = vmatpush1.bf16.msra.mxu1 %v12015_v27  ;;  %v12090_v25 = vld [vmem:[#allocation5 + $0x2060] ss:$48 sps:$4 sm:$0xff]   ;;  %v12093_v27 = vld [vmem:[#allocation5 + $0x2068] ss:$48 sps:$4 sm:$0xff]  }
 0x45d   :  { %8717 = vmatprep.subr.bf16.mxu0 %v12020_v29  ;;  %8975 = vmatprep.subr.bf16.mxu1 %v12023_v30  ;;  %v12098_v29 = vld [vmem:[#allocation5 + $0x20c4] ss:$48 sps:$4 sm:$0xff]   ;;  %v12101_v30 = vld [vmem:[#allocation5 + $0x20cc] ss:$48 sps:$4 sm:$0xff]  }
 0x460   :  { %8718 = vmatpush1.bf16.msra.mxu0 %v12018_v31  ;;  %8976 = vmatpush1.bf16.msra.mxu1 %v12021_v32  ;;  %v12096_v31 = vld [vmem:[#allocation5 + $0x20c0] ss:$48 sps:$4 sm:$0xff]   ;;  %v12099_v32 = vld [vmem:[#allocation5 + $0x20c8] ss:$48 sps:$4 sm:$0xff]  }
 0x461   :  { %8719 = vmatprep.subr.bf16.mxu0 %v12026_v33  ;;  %8977 = vmatprep.subr.bf16.mxu1 %v12029_v36  ;;  %v12104_v33 = vld [vmem:[#allocation5 + $0x2124] ss:$48 sps:$4 sm:$0xff]   ;;  %v12107_v36 = vld [vmem:[#allocation5 + $0x212c] ss:$48 sps:$4 sm:$0xff]  }
 0x464   :  { %8720 = vmatpush1.bf16.msra.mxu0 %v12024_v37  ;;  %8978 = vmatpush1.bf16.msra.mxu1 %v12027_v38  ;;  %v12102_v37 = vld [vmem:[#allocation5 + $0x2120] ss:$48 sps:$4 sm:$0xff]   ;;  %v12105_v38 = vld [vmem:[#allocation5 + $0x2128] ss:$48 sps:$4 sm:$0xff]  }
 0x465   :  { %8721 = vmatprep.subr.bf16.mxu0 %v12032_v41  ;;  %8979 = vmatprep.subr.bf16.mxu1 %v12035_v42  ;;  %v12110_v41 = vld [vmem:[#allocation5 + $0x2184] ss:$48 sps:$4 sm:$0xff]   ;;  %v12113_v42 = vld [vmem:[#allocation5 + $0x218c] ss:$48 sps:$4 sm:$0xff]  }
 0x468   :  { %8722 = vmatpush1.bf16.msra.mxu0 %v12030_v44  ;;  %8980 = vmatpush1.bf16.msra.mxu1 %v12033_v45  ;;  %v12108_v44 = vld [vmem:[#allocation5 + $0x2180] ss:$48 sps:$4 sm:$0xff]   ;;  %v12111_v45 = vld [vmem:[#allocation5 + $0x2188] ss:$48 sps:$4 sm:$0xff]  }
 0x469   :  { %8723 = vmatprep.subr.bf16.mxu0 %v12038_v46  ;;  %8981 = vmatprep.subr.bf16.mxu1 %v12041_v47  ;;  %v12116_v46 = vld [vmem:[#allocation5 + $0x21e4] ss:$48 sps:$4 sm:$0xff]   ;;  %v12119_v47 = vld [vmem:[#allocation5 + $0x21ec] ss:$48 sps:$4 sm:$0xff]  }
 0x46c   :  { %8724 = vmatpush1.bf16.msra.mxu0 %v12036_v48  ;;  %8982 = vmatpush1.bf16.msra.mxu1 %v12039_v49  ;;  %v12114_v48 = vld [vmem:[#allocation5 + $0x21e0] ss:$48 sps:$4 sm:$0xff]   ;;  %v12117_v49 = vld [vmem:[#allocation5 + $0x21e8] ss:$48 sps:$4 sm:$0xff]  }
 0x46d   :  { %8725 = vmatprep.subr.bf16.mxu0 %v12044_v50  ;;  %8983 = vmatprep.subr.bf16.mxu1 %v12047_v51  ;;  %v12122_v50 = vld [vmem:[#allocation5 + $0x2244] ss:$48 sps:$4 sm:$0xff]   ;;  %v12125_v51 = vld [vmem:[#allocation5 + $0x224c] ss:$48 sps:$4 sm:$0xff]  }
 0x470   :  { %8726 = vmatpush1.bf16.msra.mxu0 %v12042_v52  ;;  %8984 = vmatpush1.bf16.msra.mxu1 %v12045_v54  ;;  %v12120_v52 = vld [vmem:[#allocation5 + $0x2240] ss:$48 sps:$4 sm:$0xff]   ;;  %v12123_v54 = vld [vmem:[#allocation5 + $0x2248] ss:$48 sps:$4 sm:$0xff]  }
 0x471   :  { %8727 = vmatprep.subr.bf16.mxu0 %v12050_v55  ;;  %8985 = vmatprep.subr.bf16.mxu1 %v12053_v56  ;;  %v12128_v55 = vld [vmem:[#allocation5 + $0x22a4] ss:$48 sps:$4 sm:$0xff]   ;;  %v12131_v56 = vld [vmem:[#allocation5 + $0x22ac] ss:$48 sps:$4 sm:$0xff]  }
 0x474   :  { %8728 = vmatpush1.bf16.msra.mxu0 %v12048_v57  ;;  %8986 = vmatpush1.bf16.msra.mxu1 %v12051_v58  ;;  %v12126_v57 = vld [vmem:[#allocation5 + $0x22a0] ss:$48 sps:$4 sm:$0xff]   ;;  %v12129_v58 = vld [vmem:[#allocation5 + $0x22a8] ss:$48 sps:$4 sm:$0xff]  }
 0x475   :  { %8740 = vmatprep.subr.bf16.mxu0 %v12056_v59  ;;  %8998 = vmatprep.subr.bf16.mxu1 %v12059_v60  ;;  %v12134_v59 = vld [vmem:[#allocation5 + $0x2304] ss:$48 sps:$4 sm:$0xff]   ;;  %v12137_v60 = vld [vmem:[#allocation5 + $0x230c] ss:$48 sps:$4 sm:$0xff]  }
 0x477   :  { %8730 = vmatmul.mubr.bf16.vlgmr.msra.gmra.mrb[8].mxu0 %v12171_v1  ;;  %8988 = vmatmul.mubr.bf16.vlgmr.msra.gmra.mrb[8].mxu1 %v12171_v1  ;;  %v12138_v1 = vld [vmem:[#allocation5 + $0x2360] ss:$48 sps:$4 sm:$0xff]  }
 0x478   :  { %8741 = vmatpush1.bf16.msra.mxu0 %v12054_v61  ;;  %8999 = vmatpush1.bf16.msra.mxu1 %v12057_v62  ;;  %v12132_v61 = vld [vmem:[#allocation5 + $0x2300] ss:$48 sps:$4 sm:$0xff]   ;;  %v12135_v62 = vld [vmem:[#allocation5 + $0x2308] ss:$48 sps:$4 sm:$0xff]  }
 0x479   :  { %8742 = vmatprep.subr.bf16.mxu0 %v12062_v63  ;;  %9000 = vmatprep.subr.bf16.mxu1 %v12065_v0  ;;  %v12140_v63 = vld [vmem:[#allocation5 + $0x2364] ss:$48 sps:$4 sm:$0xff]   ;;  %v12143_v0 = vld [vmem:[#allocation5 + $0x236c] ss:$48 sps:$4 sm:$0xff]  }
 0x47a   :  { %8772 = vmatprep.mubr.bf16.mxu0 %v12172_v7  ;;  %9030 = vmatprep.mubr.bf16.mxu1 %v12172_v7  ;;  %v12147_v7 = vld [vmem:[#allocation5 + $0x23c8] ss:$48 sps:$4 sm:$0xff]  }
 0x47c   :  { %8743 = vmatpush1.bf16.msra.mxu0 %v12060_v3  ;;  %9001 = vmatpush1.bf16.msra.mxu1 %v12063_v4  ;;  %v12141_v3 = vld [vmem:[#allocation5 + $0x2368] ss:$48 sps:$4 sm:$0xff]   ;;  %v12146_v4 = vld [vmem:[#allocation5 + $0x23c4] ss:$48 sps:$4 sm:$0xff]  }
 0x47d   :  { %8744 = vmatprep.subr.bf16.mxu0 %v12068_v5  ;;  %9002 = vmatprep.subr.bf16.mxu1 %v12071_v6  ;;  %v12149_v5 = vld [vmem:[#allocation5 + $0x23cc] ss:$48 sps:$4 sm:$0xff]   ;;  %v12144_v6 = vld [vmem:[#allocation5 + $0x23c0] ss:$48 sps:$4 sm:$0xff]  }
 0x480   :  { %8745 = vmatpush1.bf16.msra.mxu0 %v12066_v8  ;;  %9003 = vmatpush1.bf16.msra.mxu1 %v12069_v9  ;;  %v12173_v8 = vld [vmem:[#allocation2 + $0x28] ss:$48 sps:$4 sm:$0xff]   ;;  %v1225_v9 = vld [vmem:[#allocation7 + $0x20] sm:$0x77] }
 0x481   :  { %8746 = vmatprep.subr.bf16.mxu0 %v12074_v10  ;;  %9004 = vmatprep.subr.bf16.mxu1 %v12077_v11  ;;  %v1226_v10 = vld [vmem:[#allocation7 + $0x28] sm:$0x77]  ;;  %v1280_v11 = vrot.slane %v1225_v9, %v12354_v26 }
 0x484   :  { %8747 = vmatpush1.bf16.msra.mxu0 %v12072_v12  ;;  %9005 = vmatpush1.bf16.msra.mxu1 %v12075_v13  ;;  %v1288_v12 = vrot.slane %v1226_v10, %v12354_v26  ;;  %v1412_v13 = vrot.slane %v1225_v9, %v12362_v34 }
 0x485   :  { %8748 = vmatprep.subr.bf16.mxu0 %v12080_v14  ;;  %9006 = vmatprep.subr.bf16.mxu1 %v12083_v15  ;;  %v1340_v14 = vrot.slane %v1280_v11, %v12354_v26  ;;  %v1552_v15 = vrot.slane %v1225_v9, %v12364_v35 }
 0x488   :  { %8749 = vmatpush1.bf16.msra.mxu0 %v12078_v16  ;;  %9007 = vmatpush1.bf16.msra.mxu1 %v12081_v17  ;;  %v1284_v16 = vrot.slane %v1225_v9, %v12356_v28  ;;  %v1292_v17 = vrot.slane %v1226_v10, %v12356_v28 }
 0x489   :  { %8750 = vmatprep.subr.bf16.mxu0 %v12086_v19  ;;  %9008 = vmatprep.subr.bf16.mxu1 %v12089_v20  ;;  %v1348_v19 = vrot.slane %v1288_v12, %v12354_v26  ;;  %v1420_v20 = vrot.slane %v1226_v10, %v12362_v34 }
 0x48a   :  { %v1352_v28 = vrot.slane %v1292_v17, %v12354_v26 }
 0x48c   :  { %8751 = vmatpush1.bf16.msra.mxu0 %v12084_v21  ;;  %9009 = vmatpush1.bf16.msra.mxu1 %v12087_v22  ;;  %v1560_v21 = vrot.slane %v1226_v10, %v12364_v35  ;;  %v1472_v22 = vrot.slane %v1412_v13, %v12362_v34 }
 0x48d   :  { %8752 = vmatprep.subr.bf16.mxu0 %v12092_v23  ;;  %9010 = vmatprep.subr.bf16.mxu1 %v12095_v24  ;;  %v1361_v23 = vmul.f32 %v1340_v14, %v12374_v43  ;;  %v1612_v24 = vrot.slane %v1552_v15, %v12364_v35 }
 0x490   :  { %8753 = vmatpush1.bf16.msra.mxu0 %v12090_v25  ;;  %9011 = vmatpush1.bf16.msra.mxu1 %v12093_v27  ;;  %v1344_v25 = vrot.slane %v1284_v16, %v12354_v26  ;;  %v1416_v27 = vrot.slane %v1225_v9, %v12370_v39  ;;  %v1364_v26 = vmul.f32 %v1352_v28, %v12374_v43 }
 0x491   :  { %8754 = vmatprep.subr.bf16.mxu0 %v12098_v29  ;;  %9012 = vmatprep.subr.bf16.mxu1 %v12101_v30  ;;  %v1556_v29 = vrot.slane %v1225_v9, %v12372_v40  ;;  %v1424_v30 = vrot.slane %v1226_v10, %v12370_v39 }
 0x493   :  { %v1484_v39 = vrot.slane %v1424_v30, %v12362_v34 }
 0x494   :  { %8755 = vmatpush1.bf16.msra.mxu0 %v12096_v31  ;;  %9013 = vmatpush1.bf16.msra.mxu1 %v12099_v32  ;;  %v1564_v31 = vrot.slane %v1226_v10, %v12372_v40  ;;  %v1363_v32 = vmul.f32 %v1348_v19, %v12374_v43 }
 0x495   :  { %8756 = vmatprep.subr.bf16.mxu0 %v12104_v33  ;;  %9014 = vmatprep.subr.bf16.mxu1 %v12107_v36  ;;  %v1480_v33 = vrot.slane %v1420_v20, %v12362_v34  ;;  %v1620_v36 = vrot.slane %v1560_v21, %v12364_v35 }
 0x496   :  { %v1624_v40 = vrot.slane %v1564_v31, %v12364_v35 }
 0x498   :  { %8757 = vmatpush1.bf16.msra.mxu0 %v12102_v37  ;;  %9015 = vmatpush1.bf16.msra.mxu1 %v12105_v38  ;;  %v1493_v37 = vadd.f32 %v1472_v22, %v1361_v23  ;;  %v1633_v38 = vmul.f32 %v1612_v24, %v12387_v53 }
 0x499   :  { %8758 = vmatprep.subr.bf16.mxu0 %v12110_v41  ;;  %9016 = vmatprep.subr.bf16.mxu1 %v12113_v42  ;;  %v1362_v41 = vmul.f32 %v1344_v25, %v12374_v43  ;;  %v1476_v42 = vrot.slane %v1416_v27, %v12362_v34  ;;  %v1496_v43 = vadd.f32 %v1484_v39, %v1364_v26 }
 0x49a   :  { %v1636_v34 = vmul.f32 %v1624_v40, %v12387_v53 }
 0x49c   :  { %8759 = vmatpush1.bf16.msra.mxu0 %v12108_v44  ;;  %9017 = vmatpush1.bf16.msra.mxu1 %v12111_v45  ;;  %v1616_v44 = vrot.slane %v1556_v29, %v12364_v35  ;;  %v1495_v45 = vadd.f32 %v1480_v33, %v1363_v32  ;;  %v1645_v35 = vmul.f32 %v1612_v24, %v12414_v18 }
 0x49d   :  { %8760 = vmatprep.subr.bf16.mxu0 %v12116_v46  ;;  %9018 = vmatprep.subr.bf16.mxu1 %v12119_v47  ;;  %v1635_v46 = vmul.f32 %v1620_v36, %v12387_v53  ;;  %v1373_v47 = vmul.f32 %v1340_v14, %v12401_v2 }
 0x4a0   :  { %8761 = vmatpush1.bf16.msra.mxu0 %v12114_v48  ;;  %9019 = vmatpush1.bf16.msra.mxu1 %v12117_v49  ;;  %v1375_v48 = vmul.f32 %v1348_v19, %v12401_v2  ;;  %v1374_v49 = vmul.f32 %v1344_v25, %v12401_v2 }
 0x4a1   :  { %8762 = vmatprep.subr.bf16.mxu0 %v12122_v50  ;;  %9020 = vmatprep.subr.bf16.mxu1 %v12125_v51  ;;  %v1376_v50 = vmul.f32 %v1352_v28, %v12401_v2  ;;  %v1657_v51 = vadd.f32 %v1633_v38, %v1493_v37  ;;  %v1648_v2 = vmul.f32 %v1624_v40, %v12414_v18 }
 0x4a4   :  { %8763 = vmatpush1.bf16.msra.mxu0 %v12120_v52  ;;  %9021 = vmatpush1.bf16.msra.mxu1 %v12123_v54  ;;  %v1494_v52 = vadd.f32 %v1476_v42, %v1362_v41  ;;  %v1634_v54 = vmul.f32 %v1616_v44, %v12387_v53 }
 0x4a5   :  { %8764 = vmatprep.subr.bf16.mxu0 %v12128_v55  ;;  %9022 = vmatprep.subr.bf16.mxu1 %v12131_v56  ;;  %v1659_v55 = vadd.f32 %v1635_v46, %v1495_v45  ;;  %v1505_v56 = vadd.f32 %v1472_v22, %v1373_v47 }
 0x4a8   :  { %8765 = vmatpush1.bf16.msra.mxu0 %v12126_v57  ;;  %9023 = vmatpush1.bf16.msra.mxu1 %v12129_v58  ;;  %v1507_v57 = vadd.f32 %v1480_v33, %v1375_v48  ;;  %v1647_v58 = vmul.f32 %v1620_v36, %v12414_v18 }
 0x4a9   :  { %8766 = vmatprep.subr.bf16.mxu0 %v12134_v59  ;;  %9024 = vmatprep.subr.bf16.mxu1 %v12137_v60  ;;  %v1506_v59 = vadd.f32 %v1476_v42, %v1374_v49  ;;  %v1646_v60 = vmul.f32 %v1616_v44, %v12414_v18 }
 0x4ab   :  { %v1670_v12 = vadd.f32 %v1646_v60, %v1506_v59 }
 0x4ac   :  { %8767 = vmatpush1.bf16.msra.mxu0 %v12132_v61  ;;  %9025 = vmatpush1.bf16.msra.mxu1 %v12135_v62  ;;  %v1508_v61 = vadd.f32 %v1484_v39, %v1376_v50 }
 0x4ad   :  { %8768 = vmatprep.subr.bf16.mxu0 %v12140_v63  ;;  %9026 = vmatprep.subr.bf16.mxu1 %v12143_v0  ;;  %v1658_v0 = vadd.f32 %v1634_v54, %v1494_v52 }
 0x4ae   :  { %v1672_v13 = vadd.f32 %v1648_v2, %v1508_v61 }
 0x4b0   :  { %8769 = vmatpush1.bf16.msra.mxu0 %v12138_v1  ;;  %9027 = vmatpush1.bf16.msra.mxu1 %v12141_v3  ;;  %v1660_v1 = vadd.f32 %v1636_v34, %v1496_v43 }
 0x4b1   :  { %8770 = vmatprep.subr.bf16.mxu0 %v12146_v4  ;;  %9028 = vmatprep.subr.bf16.mxu1 %v12149_v5 }
 0x4b4   :  { %8771 = vmatpush1.bf16.msra.mxu0 %v12144_v6  ;;  %9029 = vmatpush1.bf16.msra.mxu1 %v12147_v7  ;;  %v1669_v6 = vadd.f32 %v1645_v35, %v1505_v56  ;;  %v1671_v7 = vadd.f32 %v1647_v58, %v1507_v57 }
 0x4b7   :  { %8773 = vmatmul.mubr.bf16.vlgmr.msra.gmra.mrb[8].mxu0 %v12173_v8  ;;  %9031 = vmatmul.mubr.bf16.vlgmr.msra.gmra.mrb[8].mxu1 %v12173_v8 }
 0x58a   :  { %v8774_v62 = vpop.f32.mrb[8].mxu0  ;;  %v9032_v63 = vpop.f32.mrb[8].mxu1 }
 0x58b   :  { %v10263_v53 = vadd.f32 %v8774_v62, %v1657_v51  ;;  %v10267_v3 = vadd.f32 %v9032_v63, %v1659_v55  ;;  %v8776_v4 = vpop.f32.mrb[9].mxu0  ;;  %v9034_v5 = vpop.f32.mrb[9].mxu1 }
 0x58c   :  { %v10264_v8 = vadd.f32 %v8776_v4, %v1658_v0  ;;  %v10268_v9 = vadd.f32 %v9034_v5, %v1660_v1  ;;  %v8778_v10 = vpop.f32.mrb[10].mxu0  ;;  %v9036_v11 = vpop.f32.mrb[10].mxu1 }
 0x58d   :  { %9049 = vst [vmem:[#allocation8 + $0x40] sm:$0xff] %v10263_v53  ;;  %9051 = vst [vmem:[#allocation8 + $0x50] sm:$0xff] %v10267_v3  ;;  %v10265_v18 = vadd.f32 %v8778_v10, %v1669_v6  ;;  %v10269_v14 = vadd.f32 %v9036_v11, %v1671_v7  ;;  %v8780_v15 = vpop.f32.mrb[11].mxu0  ;;  %v9038_v16 = vpop.f32.mrb[11].mxu1 }
 0x58e   :  { %9050 = vst [vmem:[#allocation8 + $0x48] sm:$0xff] %v10264_v8  ;;  %9052 = vst [vmem:[#allocation8 + $0x58] sm:$0xff] %v10268_v9  ;;  %v10266_v17 = vadd.f32 %v8780_v15, %v1670_v12  ;;  %v10270_v19 = vadd.f32 %v9038_v16, %v1672_v13 }
 0x58f   :  { %9061 = vst [vmem:[#allocation8 + $0xa0] sm:$0xff] %v10265_v18  ;;  %9063 = vst [vmem:[#allocation8 + $0xb0] sm:$0xff] %v10269_v14 }
 0x590   :  { %9062 = vst [vmem:[#allocation8 + $0xa8] sm:$0xff] %v10266_v17  ;;  %9064 = vst [vmem:[#allocation8 + $0xb8] sm:$0xff] %v10270_v19 }
 0x591   :  { %12251 = shalt.err (!%p12248_p0)
}
 0x592   :  { %s12252_s6 = scalar_lea.hbm %s12532_s4, 3072 }
 0x593   :  { %p12253_p1 = scmp.ne.s32.totalorder %s12532_s4, %s12252_s6  ;;  %p12256_p2 = scmp.lt.u32.totalorder %s12252_s6, %s12532_s4 }
 0x595   :  { %p12258_p3 = pnand %p12256_p2, %p12253_p1 }
 0x597   :  { %12261 = shalt.err (!%p12258_p3)
}
 0x598   :  { %s12276_s11 = smov 1536   ;;  %s12277_s12 = smov 96  }
 0x599   :  { %9076 = dma.vmem_to_hbm [thread:$0]  %s9071_s28, 3072, %s12532_s4, [#allocation4], %s12276_s11, %s12276_s11, %s12277_s12  }
 0x59a   :  { %12266 = dma.done.wait [#allocation4], 3072  }
 0x59b   :  { %12267 = vsyncadd [#allocation4], 4294964224 }
 0x59c   :  { %9080 = vsyncpa [#allocation3], 1 }
 0x59d   :  { %9081 = vsyncpa [#allocation6], 1 }
 0x59e   :  { %9082 = vsyncpa [#allocation4], 1 }

</bundles_post_ra>
